<compile_context>
chip_gen: v7x
topology: tpu7x:2x2x1
jax: 0.10.0
libtpu: 0.0.40
codegen_flags: <defaults>
</compile_context>

<pallas_src>
import functools

import numpy as np
import jax
import jax.numpy as jnp
from jax.experimental import pallas as pl
from jax.experimental.pallas import tpu as pltpu

LANE = 128


def _round_up(x, m):
    return ((x + m - 1) // m) * m


def _is_v5e():
    try:
        kind = jax.devices()[0].device_kind.lower()
    except Exception:
        return False
    return ("v5 lite" in kind) or ("v5e" in kind) or ("v5litepod" in kind)


def _pick_tn(cout_p):
    # v5e MXU is 128-wide: tn=256 only costs VMEM there; v6e/v7x benefit.
    if cout_p % 256 == 0 and not _is_v5e():
        return 256
    return 128


def _pick_batch_block(n, ho, wo):
    # Batch several images per grid step when the spatial map is small so the
    # matmul M dim (bb*Ho*Wo) reaches ~256 and per-step overhead amortizes.
    target = max(1, 256 // (ho * wo))
    for cand in (8, 4, 2, 1):
        if cand <= target and n % cand == 0:
            return cand
    return 1


# ------------------------------ kernel helpers -------------------------------

def _zero_halo_border(pad_ref):
    """Zero only the 1-px border of the halo scratch (interior is overwritten)."""
    Hp, Wp, C = pad_ref.shape
    zr = jnp.zeros((1, Wp, C), pad_ref.dtype)
    zc = jnp.zeros((Hp - 2, 1, C), pad_ref.dtype)
    pad_ref[0:1, :, :] = zr
    pad_ref[Hp - 1:Hp, :, :] = zr
    pad_ref[1:Hp - 1, 0:1, :] = zc
    pad_ref[1:Hp - 1, Wp - 1:Wp, :] = zc


def _fill_halo_and_cols(src, pad_ref, col_ref, row0, *, stride, ho, wo,
                        hs_ref=None, hs_b=0):
    """Write `src` (H,W,C) into the halo scratch and scatter its nine shifted
    (optionally strided) windows into col_ref[row0:row0+ho*wo, :9*C].
    If hs_ref is given, also store the center-tap window (== relu(bn1(x))
    subsampled with the conv stride) for the projection shortcut."""
    H, W, C = src.shape
    M = ho * wo
    pad_ref[1:H + 1, 1:W + 1, :] = src.astype(pad_ref.dtype)
    for kh in range(3):
        for kw in range(3):
            if stride == 1:
                win = pad_ref[kh:kh + ho, kw:kw + wo, :]
            else:
                win = pad_ref[pl.ds(kh, ho, stride=stride),
                              pl.ds(kw, wo, stride=stride), :]
            if hs_ref is not None and kh == 1 and kw == 1:
                hs_ref[hs_b] = win.astype(hs_ref.dtype)
            t = (kh * 3 + kw) * C
            col_ref[row0:row0 + M, t:t + C] = win.reshape(M, C).astype(col_ref.dtype)


# ----------------------------- Pallas kernels ---------------------------------

def _conv1_kernel(x_ref, w_ref, s1_ref, b1_ref, s2_ref, b2_ref, *rest,
                  stride, emit_hs):
    """bn1+relu -> 3x3 conv(stride) (single im2col matmul) -> bn2+relu."""
    if emit_hs:
        o_ref, hs_ref, hpad_ref, col_ref = rest
    else:
        o_ref, hpad_ref, col_ref = rest
        hs_ref = None

    Bb, H, W, Cin = x_ref.shape
    _, Ho, Wo, TN = o_ref.shape
    M = Ho * Wo
    j = pl.program_id(1)

    # The im2col staging depends only on the image block -> build once,
    # reuse across Cout tiles (j is the innermost, 'arbitrary' grid axis).
    @pl.when(j == 0)
    def _build():
        _zero_halo_border(hpad_ref)
        s1 = s1_ref[...].astype(jnp.float32)
        b1 = b1_ref[...].astype(jnp.float32)
        for b in range(Bb):
            h = jnp.maximum(x_ref[b].astype(jnp.float32) * s1 + b1, 0.0)
            _fill_halo_and_cols(h, hpad_ref, col_ref, b * M,
                                stride=stride, ho=Ho, wo=Wo,
                                hs_ref=hs_ref, hs_b=b)

    # One MXU matmul over the full contraction (K = 9*Cin): accumulation stays
    # in the MXU instead of nine f32 accumulator round trips through VMEM.
    acc = jnp.dot(col_ref[...], w_ref[...], preferred_element_type=jnp.float32)
    out = jnp.maximum(acc * s2_ref[...] + b2_ref[...], 0.0)   # bn2 + relu
    o_ref[...] = out.reshape(Bb, Ho, Wo, TN).astype(o_ref.dtype)


def _conv2_eq_kernel(y1_ref, xsc_ref, w_ref, o_ref, ypad_ref, col_ref):
    """3x3 conv (stride 1, im2col matmul) + identity-residual add."""
    Bb, Ho, Wo, Cmid = y1_ref.shape
    TN = o_ref.shape[-1]
    M = Ho * Wo
    j = pl.program_id(1)

    @pl.when(j == 0)
    def _build():
        _zero_halo_border(ypad_ref)
        for b in range(Bb):
            _fill_halo_and_cols(y1_ref[b], ypad_ref, col_ref, b * M,
                                stride=1, ho=Ho, wo=Wo)

    acc = jnp.dot(col_ref[...], w_ref[...], preferred_element_type=jnp.float32)
    acc = acc.reshape(Bb, Ho, Wo, TN) + xsc_ref[...].astype(jnp.float32)
    o_ref[...] = acc.astype(o_ref.dtype)


def _conv2_proj_kernel(y1_ref, hs_ref, w_ref, o_ref, ypad_ref, col_ref):
    """3x3 conv (stride 1) with the 1x1 projection shortcut folded into the
    same matmul (shortcut activation appended as extra contraction columns)."""
    Bb, Ho, Wo, Cmid = y1_ref.shape
    Cin = hs_ref.shape[-1]
    TN = o_ref.shape[-1]
    M = Ho * Wo
    K9 = 9 * Cmid
    j = pl.program_id(1)

    @pl.when(j == 0)
    def _build():
        _zero_halo_border(ypad_ref)
        for b in range(Bb):
            _fill_halo_and_cols(y1_ref[b], ypad_ref, col_ref, b * M,
                                stride=1, ho=Ho, wo=Wo)
            col_ref[b * M:(b + 1) * M, K9:K9 + Cin] = (
                hs_ref[b].reshape(M, Cin).astype(col_ref.dtype))

    acc = jnp.dot(col_ref[...], w_ref[...], preferred_element_type=jnp.float32)
    o_ref[...] = acc.reshape(Bb, Ho, Wo, TN).astype(o_ref.dtype)


# ------------------------------ pallas_call wrappers --------------------------

_SEM = pltpu.CompilerParams(dimension_semantics=("parallel", "arbitrary"))


def _conv1_call(x_p, w1, s1, b1, s2, b2, *, stride, tn, bb, out_dtype, emit_hs):
    N, H, W, Cin_p = x_p.shape
    K, Cout_p = w1.shape
    Ho = (H - 1) // stride + 1
    Wo = (W - 1) // stride + 1
    cdt = x_p.dtype
    hdt = cdt if stride == 1 else jnp.float32      # 32-bit halo for strided reads
    grid = (N // bb, Cout_p // tn)

    out_shapes = [jax.ShapeDtypeStruct((N, Ho, Wo, Cout_p), out_dtype)]
    out_specs = [pl.BlockSpec((bb, Ho, Wo, tn), lambda nb, j: (nb, 0, 0, j))]
    if emit_hs:   # bn1+relu'd, stride-subsampled activation for the 1x1 shortcut
        out_shapes.append(jax.ShapeDtypeStruct((N, Ho, Wo, Cin_p), cdt))
        out_specs.append(pl.BlockSpec((bb, Ho, Wo, Cin_p),
                                      lambda nb, j: (nb, 0, 0, 0)))

    return pl.pallas_call(
        functools.partial(_conv1_kernel, stride=stride, emit_hs=emit_hs),
        out_shape=tuple(out_shapes) if emit_hs else out_shapes[0],
        grid=grid,
        in_specs=[
            pl.BlockSpec((bb, H, W, Cin_p), lambda nb, j: (nb, 0, 0, 0)),   # x
            pl.BlockSpec((K, tn), lambda nb, j: (0, j)),                    # w1 (im2col)
            pl.BlockSpec((1, Cin_p), lambda nb, j: (0, 0)),                 # bn1 scale
            pl.BlockSpec((1, Cin_p), lambda nb, j: (0, 0)),                 # bn1 bias
            pl.BlockSpec((1, tn), lambda nb, j: (0, j)),                    # bn2 scale
            pl.BlockSpec((1, tn), lambda nb, j: (0, j)),                    # bn2 bias
        ],
        out_specs=tuple(out_specs) if emit_hs else out_specs[0],
        scratch_shapes=[pltpu.VMEM((H + 2, W + 2, Cin_p), hdt),
                        pltpu.VMEM((bb * Ho * Wo, K), cdt)],
        compiler_params=_SEM,
    )(x_p, w1, s1, b1, s2, b2)


def _conv2_eq_call(y1, x_p, w2, *, tn, bb, out_dtype):
    N, Ho, Wo, Cmid = y1.shape
    K, Cout_p = w2.shape
    cdt = y1.dtype
    grid = (N // bb, Cout_p // tn)
    return pl.pallas_call(
        _conv2_eq_kernel,
        out_shape=jax.ShapeDtypeStruct((N, Ho, Wo, Cout_p), out_dtype),
        grid=grid,
        in_specs=[
            pl.BlockSpec((bb, Ho, Wo, Cmid), lambda nb, j: (nb, 0, 0, 0)),  # conv1 out
            pl.BlockSpec((bb, Ho, Wo, tn), lambda nb, j: (nb, 0, 0, j)),    # identity shortcut
            pl.BlockSpec((K, tn), lambda nb, j: (0, j)),                    # w2 (im2col)
        ],
        out_specs=pl.BlockSpec((bb, Ho, Wo, tn), lambda nb, j: (nb, 0, 0, j)),
        scratch_shapes=[pltpu.VMEM((Ho + 2, Wo + 2, Cmid), cdt),
                        pltpu.VMEM((bb * Ho * Wo, K), cdt)],
        compiler_params=_SEM,
    )(y1, x_p, w2)


def _conv2_proj_call(y1, hs, wcat, *, tn, bb, out_dtype):
    N, Ho, Wo, Cmid = y1.shape
    Cin_p = hs.shape[-1]
    K, Cout_p = wcat.shape
    cdt = y1.dtype
    grid = (N // bb, Cout_p // tn)
    return pl.pallas_call(
        _conv2_proj_kernel,
        out_shape=jax.ShapeDtypeStruct((N, Ho, Wo, Cout_p), out_dtype),
        grid=grid,
        in_specs=[
            pl.BlockSpec((bb, Ho, Wo, Cmid), lambda nb, j: (nb, 0, 0, 0)),  # conv1 out
            pl.BlockSpec((bb, Ho, Wo, Cin_p), lambda nb, j: (nb, 0, 0, 0)), # shortcut act
            pl.BlockSpec((K, tn), lambda nb, j: (0, j)),                    # [w2; wsc]
        ],
        out_specs=pl.BlockSpec((bb, Ho, Wo, tn), lambda nb, j: (nb, 0, 0, j)),
        scratch_shapes=[pltpu.VMEM((Ho + 2, Wo + 2, Cmid), cdt),
                        pltpu.VMEM((bb * Ho * Wo, K), cdt)],
        compiler_params=_SEM,
    )(y1, hs, wcat)


# --------------------------------- Forward ------------------------------------

def basic_block_forward_nhwc(x_p, kp, *, stride, equal_in_out, compute_dtype):
    """Channel-padded NHWC in, channel-padded NHWC out. Chain blocks in this
    layout; only convert NCHW<->NHWC / slice channels at network boundaries."""
    N, H, W, Cin_p = x_p.shape
    Cout_p = kp["bn2_scale"].shape[-1]
    tn = _pick_tn(Cout_p)
    Ho = (H - 1) // stride + 1
    Wo = (W - 1) // stride + 1
    bb = _pick_batch_block(N, Ho, Wo)
    x_p = x_p.astype(compute_dtype)

    if equal_in_out:
        assert stride == 1, "identity shortcut requires stride 1"
        out1 = _conv1_call(x_p, kp["w1"], kp["bn1_scale"], kp["bn1_bias"],
                           kp["bn2_scale"], kp["bn2_bias"],
                           stride=stride, tn=tn, bb=bb,
                           out_dtype=compute_dtype, emit_hs=False)
        y = _conv2_eq_call(out1, x_p, kp["w2"], tn=tn, bb=bb,
                           out_dtype=compute_dtype)
    else:
        out1, hs = _conv1_call(x_p, kp["w1"], kp["bn1_scale"], kp["bn1_bias"],
                               kp["bn2_scale"], kp["bn2_bias"],
                               stride=stride, tn=tn, bb=bb,
                               out_dtype=compute_dtype, emit_hs=True)
        y = _conv2_proj_call(out1, hs, kp["w2"], tn=tn, bb=bb,
                             out_dtype=compute_dtype)
    return y


@functools.partial(jax.jit,
                   static_argnames=("stride", "equal_in_out", "cout", "compute_dtype"))
def basic_block_forward(x_nchw, kp, *, stride, equal_in_out, cout,
                        compute_dtype=jnp.bfloat16):
    x = jnp.transpose(x_nchw, (0, 2, 3, 1))                       # NCHW -> NHWC
    Cin = x.shape[-1]
    Cin_p = kp["bn1_scale"].shape[-1]
    if Cin_p > Cin:
        x = jnp.pad(x, ((0, 0), (0, 0), (0, 0), (0, Cin_p - Cin)))
    y = basic_block_forward_nhwc(x, kp, stride=stride, equal_in_out=equal_in_out,
                                 compute_dtype=compute_dtype)
    y = y[..., :cout]
    return jnp.transpose(y, (0, 3, 1, 2))                         # NHWC -> NCHW


# --------------------------- Parameter construction ---------------------------

def init_params(key, cin, cout, equal_in_out):
    """'Logical' (PyTorch-layout) parameters, BN folded to inference scale/bias."""
    ks = jax.random.split(key, 11)
    eps = 1e-5

    def bn_params(k0, k1, k2, k3, c):
        gamma = 1.0 + 0.1 * jax.random.normal(k0, (c,), jnp.float32)
        beta = 0.1 * jax.random.normal(k1, (c,), jnp.float32)
        rmean = 0.05 * jax.random.normal(k2, (c,), jnp.float32)
        rvar = 1.0 + 0.2 * jax.random.uniform(k3, (c,), jnp.float32)
        scale = gamma / jnp.sqrt(rvar + eps)
        bias = beta - rmean * scale
        return scale, bias

    bn1_scale, bn1_bias = bn_params(ks[0], ks[1], ks[2], ks[3], cin)
    bn2_scale, bn2_bias = bn_params(ks[4], ks[5], ks[6], ks[7], cout)
    w1 = jax.random.normal(ks[8], (cout, cin, 3, 3), jnp.float32) / np.sqrt(9 * cin)
    w2 = jax.random.normal(ks[9], (cout, cout, 3, 3), jnp.float32) / np.sqrt(9 * cout)
    raw = dict(bn1_scale=bn1_scale, bn1_bias=bn1_bias,
               bn2_scale=bn2_scale, bn2_bias=bn2_bias, w1=w1, w2=w2)
    if not equal_in_out:
        raw["wsc"] = jax.random.normal(ks[10], (cout, cin, 1, 1), jnp.float32) / np.sqrt(cin)
    return raw


def make_kernel_params(raw, equal_in_out, compute_dtype=jnp.bfloat16):
    """Pad channels to 128, reshape 3x3 weights to im2col (9*Ci_p, Co_p) matrices,
    and (proj case) append the 1x1 shortcut rows so conv2 is a single matmul."""
    w1 = raw["w1"]
    w2 = raw["w2"]
    cout, cin = int(w1.shape[0]), int(w1.shape[1])
    cin_p = _round_up(cin, LANE)
    cout_p = _round_up(cout, LANE)

    def pad_vec(v, cp):
        return jnp.pad(v.astype(jnp.float32), (0, cp - v.shape[0])).reshape(1, cp)

    def conv_to_im2col(w, ci_p, co_p):   # (Co,Ci,3,3) -> (9*ci_p, co_p), K order (kh,kw,ci)
        wt = jnp.transpose(w, (2, 3, 1, 0)).astype(jnp.float32)
        wt = jnp.pad(wt, ((0, 0), (0, 0),
                          (0, ci_p - wt.shape[2]), (0, co_p - wt.shape[3])))
        return wt.reshape(9 * ci_p, co_p)

    w1m = conv_to_im2col(w1, cin_p, cout_p)
    w2m = conv_to_im2col(w2, cout_p, cout_p)
    if not equal_in_out:
        wsc = raw["wsc"].reshape(cout, cin).T.astype(jnp.float32)     # (cin, cout)
        wsc = jnp.pad(wsc, ((0, cin_p - cin), (0, cout_p - cout)))
        w2m = jnp.concatenate([w2m, wsc], axis=0)                     # [w2; wsc]

    return dict(
        bn1_scale=pad_vec(raw["bn1_scale"], cin_p),
        bn1_bias=pad_vec(raw["bn1_bias"], cin_p),
        bn2_scale=pad_vec(raw["bn2_scale"], cout_p),
        bn2_bias=pad_vec(raw["bn2_bias"], cout_p),
        w1=w1m.astype(compute_dtype),
        w2=w2m.astype(compute_dtype),
    )


# ------------------------------ NumPy reference --------------------------------

def _np_im2col(x, k, stride, pad):
    N, H, W, C = x.shape
    Ho = (H + 2 * pad - k) // stride + 1
    Wo = (W + 2 * pad - k) // stride + 1
    xp = np.pad(x, ((0, 0), (pad, pad), (pad, pad), (0, 0)))
    cols = []
    for kh in range(k):
        for kw in range(k):
            cols.append(xp[:, kh:kh + (Ho - 1) * stride + 1:stride,
                              kw:kw + (Wo - 1) * stride + 1:stride, :])
    patches = np.stack(cols, axis=3)
    return patches.reshape(N * Ho * Wo, k * k * C), (N, Ho, Wo)


def np_basic_block(x_nchw, p, stride, equal_in_out):
    x = np.transpose(np.asarray(x_nchw), (0, 2, 3, 1)).astype(np.float32)
    N, H, W, Cin = x.shape
    s1 = np.asarray(p["bn1_scale"]); b1 = np.asarray(p["bn1_bias"])
    s2 = np.asarray(p["bn2_scale"]); b2 = np.asarray(p["bn2_bias"])
    w1 = np.asarray(p["w1"]); w2 = np.asarray(p["w2"])
    Cout = w1.shape[0]
    w1m = np.transpose(w1, (2, 3, 1, 0)).reshape(9 * Cin, Cout)
    w2m = np.transpose(w2, (2, 3, 1, 0)).reshape(9 * Cout, Cout)
    h = np.maximum(x * s1 + b1, 0.0)
    pa1, (_, Ho, Wo) = _np_im2col(h, 3, stride, 1)
    out = np.maximum(pa1 @ w1m * s2 + b2, 0.0)
    out_img = out.reshape(N, Ho, Wo, Cout)
    pa2, _ = _np_im2col(out_img, 3, 1, 1)
    if equal_in_out:
        shortcut = x.reshape(-1, Cin)
    else:
        wscm = np.asarray(p["wsc"]).reshape(Cout, Cin).T
        shortcut = h[:, ::stride, ::stride, :].reshape(-1, Cin) @ wscm
    y = (pa2 @ w2m + shortcut).reshape(N, Ho, Wo, Cout)
    return np.transpose(y, (0, 3, 1, 2))


# ------------------------------------ Main -------------------------------------

if __name__ == "__main__":
    key = jax.random.PRNGKey(0)
    k_p1, k_x1, k_p2, k_x2 = jax.random.split(key, 4)

    # Case 1: in_planes != out_planes, stride 2 (projection-shortcut path).
    N, Cin, H, W, Cout, stride = 2, 4, 16, 16, 8, 2
    raw1 = init_params(k_p1, Cin, Cout, equal_in_out=False)
    x1 = jax.random.normal(k_x1, (N, Cin, H, W), jnp.float32)
    ref1 = np_basic_block(x1, raw1, stride, equal_in_out=False)

    # (a) default bf16 MXU path (f32 accumulation / epilogues).
    kp1 = make_kernel_params(raw1, equal_in_out=False)
    y1 = jax.block_until_ready(basic_block_forward(
        x1, kp1, stride=stride, equal_in_out=False, cout=Cout))
    assert y1.shape == (N, Cout, H // stride, W // stride)
    np.testing.assert_allclose(np.asarray(y1.astype(jnp.float32)), ref1,
                               rtol=5e-2, atol=5e-2)

    # (b) f32 path.
    kp1f = make_kernel_params(raw1, equal_in_out=False, compute_dtype=jnp.float32)
    y1f = jax.block_until_ready(basic_block_forward(
        x1, kp1f, stride=stride, equal_in_out=False, cout=Cout,
        compute_dtype=jnp.float32))
    np.testing.assert_allclose(np.asarray(y1f), ref1, rtol=2e-2, atol=2e-2)

    # Case 2: in_planes == out_planes, stride 1 (identity shortcut on original x).
    Cio = 8
    raw2 = init_params(k_p2, Cio, Cio, equal_in_out=True)
    x2 = jax.random.normal(k_x2, (N, Cio, H, W), jnp.float32)
    ref2 = np_basic_block(x2, raw2, 1, equal_in_out=True)

    kp2 = make_kernel_params(raw2, equal_in_out=True)
    y2 = jax.block_until_ready(basic_block_forward(
        x2, kp2, stride=1, equal_in_out=True, cout=Cio))
    assert y2.shape == (N, Cio, H, W)
    np.testing.assert_allclose(np.asarray(y2.astype(jnp.float32)), ref2,
                               rtol=5e-2, atol=5e-2)

    kp2f = make_kernel_params(raw2, equal_in_out=True, compute_dtype=jnp.float32)
    y2f = jax.block_until_ready(basic_block_forward(
        x2, kp2f, stride=1, equal_in_out=True, cout=Cio,
        compute_dtype=jnp.float32))
    np.testing.assert_allclose(np.asarray(y2f), ref2, rtol=2e-2, atol=2e-2)

    print("KERNEL_OK")
</pallas_src>

<mosaic_0001>
module attributes {stable_mosaic.version = 11 : i64} {
  func.func @_conv1_kernel(%arg0: i32, %arg1: i32, %arg2: memref<2x16x16x128xbf16, #tpu.memory_space<vmem>>, %arg3: memref<1152x128xbf16, #tpu.memory_space<vmem>>, %arg4: memref<1x128xf32, #tpu.memory_space<vmem>>, %arg5: memref<1x128xf32, #tpu.memory_space<vmem>>, %arg6: memref<1x128xf32, #tpu.memory_space<vmem>>, %arg7: memref<1x128xf32, #tpu.memory_space<vmem>>, %arg8: memref<2x8x8x128xbf16, #tpu.memory_space<vmem>>, %arg9: memref<2x8x8x128xbf16, #tpu.memory_space<vmem>>, %arg10: memref<18x18x128xf32, #tpu.memory_space<vmem>>, %arg11: memref<128x1152xbf16, #tpu.memory_space<vmem>>) attributes {dimension_semantics = [#tpu.dimension_semantics<parallel>, #tpu.dimension_semantics<arbitrary>], iteration_bounds = array<i64: 1, 1>, scalar_prefetch = 0 : i64, scratch_operands = 2 : i64, tpu.core_type = #tpu.core_type<tc>, window_params = [{transform_indices = @transform_0, window_bounds = array<i64: 2, 16, 16, 128>}, {transform_indices = @transform_1, window_bounds = array<i64: 1152, 128>}, {pipeline_mode = #tpu.pipeline_mode<synchronous>, transform_indices = @transform_2, window_bounds = array<i64: 1, 128>}, {pipeline_mode = #tpu.pipeline_mode<synchronous>, transform_indices = @transform_3, window_bounds = array<i64: 1, 128>}, {transform_indices = @transform_4, window_bounds = array<i64: 1, 128>}, {transform_indices = @transform_5, window_bounds = array<i64: 1, 128>}, {transform_indices = @transform_6, window_bounds = array<i64: 2, 8, 8, 128>}, {transform_indices = @transform_7, window_bounds = array<i64: 2, 8, 8, 128>}]} {
    %c0_i32 = arith.constant 0 : i32
    %0 = arith.cmpi eq, %arg1, %c0_i32 : i32
    %1 = arith.extui %0 : i1 to i32
    %c0_i32_0 = arith.constant 0 : i32
    %2 = arith.cmpi ne, %1, %c0_i32_0 : i32
    scf.if %2 {
      %cst_13 = arith.constant 0.000000e+00 : f32
      %17 = vector.broadcast %cst_13 : f32 to vector<1x18x128xf32>
      %cst_14 = arith.constant 0.000000e+00 : f32
      %18 = vector.broadcast %cst_14 : f32 to vector<16x1x128xf32>
      %c0_15 = arith.constant 0 : index
      %c0_16 = arith.constant 0 : index
      %c0_17 = arith.constant 0 : index
      %19 = vector.load %arg10[%c0_15, %c0_16, %c0_17] : memref<18x18x128xf32, #tpu.memory_space<vmem>>, vector<1x18x128xf32>
      tpu.vector_store %arg10[%c0_15, %c0_16, %c0_17], %17 {strides = array<i32>} : memref<18x18x128xf32, #tpu.memory_space<vmem>>, vector<1x18x128xf32>,
      %c17 = arith.constant 17 : index
      %c0_18 = arith.constant 0 : index
      %c0_19 = arith.constant 0 : index
      %20 = vector.load %arg10[%c17, %c0_18, %c0_19] : memref<18x18x128xf32, #tpu.memory_space<vmem>>, vector<1x18x128xf32>
      tpu.vector_store %arg10[%c17, %c0_18, %c0_19], %17 {strides = array<i32>} : memref<18x18x128xf32, #tpu.memory_space<vmem>>, vector<1x18x128xf32>,
      %c1 = arith.constant 1 : index
      %c0_20 = arith.constant 0 : index
      %c0_21 = arith.constant 0 : index
      %21 = vector.load %arg10[%c1, %c0_20, %c0_21] : memref<18x18x128xf32, #tpu.memory_space<vmem>>, vector<16x1x128xf32>
      tpu.vector_store %arg10[%c1, %c0_20, %c0_21], %18 {strides = array<i32>} : memref<18x18x128xf32, #tpu.memory_space<vmem>>, vector<16x1x128xf32>,
      %c1_22 = arith.constant 1 : index
      %c17_23 = arith.constant 17 : index
      %c0_24 = arith.constant 0 : index
      %22 = vector.load %arg10[%c1_22, %c17_23, %c0_24] : memref<18x18x128xf32, #tpu.memory_space<vmem>>, vector<16x1x128xf32>
      tpu.vector_store %arg10[%c1_22, %c17_23, %c0_24], %18 {strides = array<i32>} : memref<18x18x128xf32, #tpu.memory_space<vmem>>, vector<16x1x128xf32>,
      %c0_25 = arith.constant 0 : index
      %c0_26 = arith.constant 0 : index
      %23 = vector.load %arg4[%c0_25, %c0_26] : memref<1x128xf32, #tpu.memory_space<vmem>>, vector<1x128xf32>
      %c0_27 = arith.constant 0 : index
      %c0_28 = arith.constant 0 : index
      %24 = vector.load %arg5[%c0_27, %c0_28] : memref<1x128xf32, #tpu.memory_space<vmem>>, vector<1x128xf32>
      %c0_29 = arith.constant 0 : index
      %c0_30 = arith.constant 0 : index
      %c0_31 = arith.constant 0 : index
      %c0_32 = arith.constant 0 : index
      %25 = vector.load %arg2[%c0_29, %c0_30, %c0_31, %c0_32] : memref<2x16x16x128xbf16, #tpu.memory_space<vmem>>, vector<1x16x16x128xbf16>
      %26 = vector.shape_cast %25 : vector<1x16x16x128xbf16> to vector<16x16x128xbf16>
      %27 = arith.extf %26 : vector<16x16x128xbf16> to vector<16x16x128xf32>
      %28 = vector.shape_cast %23 : vector<1x128xf32> to vector<1x1x128xf32>
      %29 = vector.broadcast %28 : vector<1x1x128xf32> to vector<16x16x128xf32>
      %30 = arith.mulf %27, %29 : vector<16x16x128xf32>
      %31 = vector.shape_cast %24 : vector<1x128xf32> to vector<1x1x128xf32>
      %32 = vector.broadcast %31 : vector<1x1x128xf32> to vector<16x16x128xf32>
      %33 = arith.addf %30, %32 : vector<16x16x128xf32>
      %cst_33 = arith.constant 0.000000e+00 : f32
      %34 = vector.broadcast %cst_33 : f32 to vector<16x16x128xf32>
      %35 = arith.maximumf %33, %34 : vector<16x16x128xf32>
      %c1_34 = arith.constant 1 : index
      %c1_35 = arith.constant 1 : index
      %c0_36 = arith.constant 0 : index
      %36 = vector.load %arg10[%c1_34, %c1_35, %c0_36] : memref<18x18x128xf32, #tpu.memory_space<vmem>>, vector<16x16x128xf32>
      tpu.vector_store %arg10[%c1_34, %c1_35, %c0_36], %35 {strides = array<i32>} : memref<18x18x128xf32, #tpu.memory_space<vmem>>, vector<16x16x128xf32>,
      %c0_37 = arith.constant 0 : index
      %c0_38 = arith.constant 0 : index
      %c0_39 = arith.constant 0 : index
      %37 = tpu.strided_load %arg10[%c0_37, %c0_38, %c0_39] {strides = array<i32: 2, 2, 1>} : memref<18x18x128xf32, #tpu.memory_space<vmem>>, vector<8x8x128xf32>
      %38 = vector.shape_cast %37 : vector<8x8x128xf32> to vector<64x128xf32>
      %39 = arith.truncf %38 : vector<64x128xf32> to vector<64x128xbf16>
      %c0_40 = arith.constant 0 : index
      %c0_41 = arith.constant 0 : index
      %40 = vector.load %arg11[%c0_40, %c0_41] : memref<128x1152xbf16, #tpu.memory_space<vmem>>, vector<64x128xbf16>
      tpu.vector_store %arg11[%c0_40, %c0_41], %39 {strides = array<i32>} : memref<128x1152xbf16, #tpu.memory_space<vmem>>, vector<64x128xbf16>,
      %c0_42 = arith.constant 0 : index
      %c1_43 = arith.constant 1 : index
      %c0_44 = arith.constant 0 : index
      %41 = tpu.strided_load %arg10[%c0_42, %c1_43, %c0_44] {strides = array<i32: 2, 2, 1>} : memref<18x18x128xf32, #tpu.memory_space<vmem>>, vector<8x8x128xf32>
      %42 = vector.shape_cast %41 : vector<8x8x128xf32> to vector<64x128xf32>
      %43 = arith.truncf %42 : vector<64x128xf32> to vector<64x128xbf16>
      %c0_45 = arith.constant 0 : index
      %c128 = arith.constant 128 : index
      %44 = vector.load %arg11[%c0_45, %c128] : memref<128x1152xbf16, #tpu.memory_space<vmem>>, vector<64x128xbf16>
      tpu.vector_store %arg11[%c0_45, %c128], %43 {strides = array<i32>} : memref<128x1152xbf16, #tpu.memory_space<vmem>>, vector<64x128xbf16>,
      %c0_46 = arith.constant 0 : index
      %c2 = arith.constant 2 : index
      %c0_47 = arith.constant 0 : index
      %45 = tpu.strided_load %arg10[%c0_46, %c2, %c0_47] {strides = array<i32: 2, 2, 1>} : memref<18x18x128xf32, #tpu.memory_space<vmem>>, vector<8x8x128xf32>
      %46 = vector.shape_cast %45 : vector<8x8x128xf32> to vector<64x128xf32>
      %47 = arith.truncf %46 : vector<64x128xf32> to vector<64x128xbf16>
      %c0_48 = arith.constant 0 : index
      %c256 = arith.constant 256 : index
      %48 = vector.load %arg11[%c0_48, %c256] : memref<128x1152xbf16, #tpu.memory_space<vmem>>, vector<64x128xbf16>
      tpu.vector_store %arg11[%c0_48, %c256], %47 {strides = array<i32>} : memref<128x1152xbf16, #tpu.memory_space<vmem>>, vector<64x128xbf16>,
      %c1_49 = arith.constant 1 : index
      %c0_50 = arith.constant 0 : index
      %c0_51 = arith.constant 0 : index
      %49 = tpu.strided_load %arg10[%c1_49, %c0_50, %c0_51] {strides = array<i32: 2, 2, 1>} : memref<18x18x128xf32, #tpu.memory_space<vmem>>, vector<8x8x128xf32>
      %50 = vector.shape_cast %49 : vector<8x8x128xf32> to vector<64x128xf32>
      %51 = arith.truncf %50 : vector<64x128xf32> to vector<64x128xbf16>
      %c0_52 = arith.constant 0 : index
      %c384 = arith.constant 384 : index
      %52 = vector.load %arg11[%c0_52, %c384] : memref<128x1152xbf16, #tpu.memory_space<vmem>>, vector<64x128xbf16>
      tpu.vector_store %arg11[%c0_52, %c384], %51 {strides = array<i32>} : memref<128x1152xbf16, #tpu.memory_space<vmem>>, vector<64x128xbf16>,
      %c1_53 = arith.constant 1 : index
      %c1_54 = arith.constant 1 : index
      %c0_55 = arith.constant 0 : index
      %53 = tpu.strided_load %arg10[%c1_53, %c1_54, %c0_55] {strides = array<i32: 2, 2, 1>} : memref<18x18x128xf32, #tpu.memory_space<vmem>>, vector<8x8x128xf32>
      %54 = arith.truncf %53 : vector<8x8x128xf32> to vector<8x8x128xbf16>
      %c0_56 = arith.constant 0 : index
      %c0_57 = arith.constant 0 : index
      %c0_58 = arith.constant 0 : index
      %c0_59 = arith.constant 0 : index
      %55 = vector.load %arg9[%c0_56, %c0_57, %c0_58, %c0_59] : memref<2x8x8x128xbf16, #tpu.memory_space<vmem>>, vector<1x8x8x128xbf16>
      %56 = vector.shape_cast %55 : vector<1x8x8x128xbf16> to vector<8x8x128xbf16>
      %57 = vector.shape_cast %54 : vector<8x8x128xbf16> to vector<1x8x8x128xbf16>
      tpu.vector_store %arg9[%c0_56, %c0_57, %c0_58, %c0_59], %57 {strides = array<i32>} : memref<2x8x8x128xbf16, #tpu.memory_space<vmem>>, vector<1x8x8x128xbf16>,
      %58 = vector.shape_cast %53 : vector<8x8x128xf32> to vector<64x128xf32>
      %59 = arith.truncf %58 : vector<64x128xf32> to vector<64x128xbf16>
      %c0_60 = arith.constant 0 : index
      %c512 = arith.constant 512 : index
      %60 = vector.load %arg11[%c0_60, %c512] : memref<128x1152xbf16, #tpu.memory_space<vmem>>, vector<64x128xbf16>
      tpu.vector_store %arg11[%c0_60, %c512], %59 {strides = array<i32>} : memref<128x1152xbf16, #tpu.memory_space<vmem>>, vector<64x128xbf16>,
      %c1_61 = arith.constant 1 : index
      %c2_62 = arith.constant 2 : index
      %c0_63 = arith.constant 0 : index
      %61 = tpu.strided_load %arg10[%c1_61, %c2_62, %c0_63] {strides = array<i32: 2, 2, 1>} : memref<18x18x128xf32, #tpu.memory_space<vmem>>, vector<8x8x128xf32>
      %62 = vector.shape_cast %61 : vector<8x8x128xf32> to vector<64x128xf32>
      %63 = arith.truncf %62 : vector<64x128xf32> to vector<64x128xbf16>
      %c0_64 = arith.constant 0 : index
      %c640 = arith.constant 640 : index
      %64 = vector.load %arg11[%c0_64, %c640] : memref<128x1152xbf16, #tpu.memory_space<vmem>>, vector<64x128xbf16>
      tpu.vector_store %arg11[%c0_64, %c640], %63 {strides = array<i32>} : memref<128x1152xbf16, #tpu.memory_space<vmem>>, vector<64x128xbf16>,
      %c2_65 = arith.constant 2 : index
      %c0_66 = arith.constant 0 : index
      %c0_67 = arith.constant 0 : index
      %65 = tpu.strided_load %arg10[%c2_65, %c0_66, %c0_67] {strides = array<i32: 2, 2, 1>} : memref<18x18x128xf32, #tpu.memory_space<vmem>>, vector<8x8x128xf32>
      %66 = vector.shape_cast %65 : vector<8x8x128xf32> to vector<64x128xf32>
      %67 = arith.truncf %66 : vector<64x128xf32> to vector<64x128xbf16>
      %c0_68 = arith.constant 0 : index
      %c768 = arith.constant 768 : index
      %68 = vector.load %arg11[%c0_68, %c768] : memref<128x1152xbf16, #tpu.memory_space<vmem>>, vector<64x128xbf16>
      tpu.vector_store %arg11[%c0_68, %c768], %67 {strides = array<i32>} : memref<128x1152xbf16, #tpu.memory_space<vmem>>, vector<64x128xbf16>,
      %c2_69 = arith.constant 2 : index
      %c1_70 = arith.constant 1 : index
      %c0_71 = arith.constant 0 : index
      %69 = tpu.strided_load %arg10[%c2_69, %c1_70, %c0_71] {strides = array<i32: 2, 2, 1>} : memref<18x18x128xf32, #tpu.memory_space<vmem>>, vector<8x8x128xf32>
      %70 = vector.shape_cast %69 : vector<8x8x128xf32> to vector<64x128xf32>
      %71 = arith.truncf %70 : vector<64x128xf32> to vector<64x128xbf16>
      %c0_72 = arith.constant 0 : index
      %c896 = arith.constant 896 : index
      %72 = vector.load %arg11[%c0_72, %c896] : memref<128x1152xbf16, #tpu.memory_space<vmem>>, vector<64x128xbf16>
      tpu.vector_store %arg11[%c0_72, %c896], %71 {strides = array<i32>} : memref<128x1152xbf16, #tpu.memory_space<vmem>>, vector<64x128xbf16>,
      %c2_73 = arith.constant 2 : index
      %c2_74 = arith.constant 2 : index
      %c0_75 = arith.constant 0 : index
      %73 = tpu.strided_load %arg10[%c2_73, %c2_74, %c0_75] {strides = array<i32: 2, 2, 1>} : memref<18x18x128xf32, #tpu.memory_space<vmem>>, vector<8x8x128xf32>
      %74 = vector.shape_cast %73 : vector<8x8x128xf32> to vector<64x128xf32>
      %75 = arith.truncf %74 : vector<64x128xf32> to vector<64x128xbf16>
      %c0_76 = arith.constant 0 : index
      %c1024 = arith.constant 1024 : index
      %76 = vector.load %arg11[%c0_76, %c1024] : memref<128x1152xbf16, #tpu.memory_space<vmem>>, vector<64x128xbf16>
      tpu.vector_store %arg11[%c0_76, %c1024], %75 {strides = array<i32>} : memref<128x1152xbf16, #tpu.memory_space<vmem>>, vector<64x128xbf16>,
      %c1_77 = arith.constant 1 : index
      %c0_78 = arith.constant 0 : index
      %c0_79 = arith.constant 0 : index
      %c0_80 = arith.constant 0 : index
      %77 = vector.load %arg2[%c1_77, %c0_78, %c0_79, %c0_80] : memref<2x16x16x128xbf16, #tpu.memory_space<vmem>>, vector<1x16x16x128xbf16>
      %78 = vector.shape_cast %77 : vector<1x16x16x128xbf16> to vector<16x16x128xbf16>
      %79 = arith.extf %78 : vector<16x16x128xbf16> to vector<16x16x128xf32>
      %80 = vector.shape_cast %23 : vector<1x128xf32> to vector<1x1x128xf32>
      %81 = vector.broadcast %80 : vector<1x1x128xf32> to vector<16x16x128xf32>
      %82 = arith.mulf %79, %81 : vector<16x16x128xf32>
      %83 = vector.shape_cast %24 : vector<1x128xf32> to vector<1x1x128xf32>
      %84 = vector.broadcast %83 : vector<1x1x128xf32> to vector<16x16x128xf32>
      %85 = arith.addf %82, %84 : vector<16x16x128xf32>
      %cst_81 = arith.constant 0.000000e+00 : f32
      %86 = vector.broadcast %cst_81 : f32 to vector<16x16x128xf32>
      %87 = arith.maximumf %85, %86 : vector<16x16x128xf32>
      %c1_82 = arith.constant 1 : index
      %c1_83 = arith.constant 1 : index
      %c0_84 = arith.constant 0 : index
      %88 = vector.load %arg10[%c1_82, %c1_83, %c0_84] : memref<18x18x128xf32, #tpu.memory_space<vmem>>, vector<16x16x128xf32>
      tpu.vector_store %arg10[%c1_82, %c1_83, %c0_84], %87 {strides = array<i32>} : memref<18x18x128xf32, #tpu.memory_space<vmem>>, vector<16x16x128xf32>,
      %c0_85 = arith.constant 0 : index
      %c0_86 = arith.constant 0 : index
      %c0_87 = arith.constant 0 : index
      %89 = tpu.strided_load %arg10[%c0_85, %c0_86, %c0_87] {strides = array<i32: 2, 2, 1>} : memref<18x18x128xf32, #tpu.memory_space<vmem>>, vector<8x8x128xf32>
      %90 = vector.shape_cast %89 : vector<8x8x128xf32> to vector<64x128xf32>
      %91 = arith.truncf %90 : vector<64x128xf32> to vector<64x128xbf16>
      %c64 = arith.constant 64 : index
      %c0_88 = arith.constant 0 : index
      %92 = vector.load %arg11[%c64, %c0_88] : memref<128x1152xbf16, #tpu.memory_space<vmem>>, vector<64x128xbf16>
      tpu.vector_store %arg11[%c64, %c0_88], %91 {strides = array<i32>} : memref<128x1152xbf16, #tpu.memory_space<vmem>>, vector<64x128xbf16>,
      %c0_89 = arith.constant 0 : index
      %c1_90 = arith.constant 1 : index
      %c0_91 = arith.constant 0 : index
      %93 = tpu.strided_load %arg10[%c0_89, %c1_90, %c0_91] {strides = array<i32: 2, 2, 1>} : memref<18x18x128xf32, #tpu.memory_space<vmem>>, vector<8x8x128xf32>
      %94 = vector.shape_cast %93 : vector<8x8x128xf32> to vector<64x128xf32>
      %95 = arith.truncf %94 : vector<64x128xf32> to vector<64x128xbf16>
      %c64_92 = arith.constant 64 : index
      %c128_93 = arith.constant 128 : index
      %96 = vector.load %arg11[%c64_92, %c128_93] : memref<128x1152xbf16, #tpu.memory_space<vmem>>, vector<64x128xbf16>
      tpu.vector_store %arg11[%c64_92, %c128_93], %95 {strides = array<i32>} : memref<128x1152xbf16, #tpu.memory_space<vmem>>, vector<64x128xbf16>,
      %c0_94 = arith.constant 0 : index
      %c2_95 = arith.constant 2 : index
      %c0_96 = arith.constant 0 : index
      %97 = tpu.strided_load %arg10[%c0_94, %c2_95, %c0_96] {strides = array<i32: 2, 2, 1>} : memref<18x18x128xf32, #tpu.memory_space<vmem>>, vector<8x8x128xf32>
      %98 = vector.shape_cast %97 : vector<8x8x128xf32> to vector<64x128xf32>
      %99 = arith.truncf %98 : vector<64x128xf32> to vector<64x128xbf16>
      %c64_97 = arith.constant 64 : index
      %c256_98 = arith.constant 256 : index
      %100 = vector.load %arg11[%c64_97, %c256_98] : memref<128x1152xbf16, #tpu.memory_space<vmem>>, vector<64x128xbf16>
      tpu.vector_store %arg11[%c64_97, %c256_98], %99 {strides = array<i32>} : memref<128x1152xbf16, #tpu.memory_space<vmem>>, vector<64x128xbf16>,
      %c1_99 = arith.constant 1 : index
      %c0_100 = arith.constant 0 : index
      %c0_101 = arith.constant 0 : index
      %101 = tpu.strided_load %arg10[%c1_99, %c0_100, %c0_101] {strides = array<i32: 2, 2, 1>} : memref<18x18x128xf32, #tpu.memory_space<vmem>>, vector<8x8x128xf32>
      %102 = vector.shape_cast %101 : vector<8x8x128xf32> to vector<64x128xf32>
      %103 = arith.truncf %102 : vector<64x128xf32> to vector<64x128xbf16>
      %c64_102 = arith.constant 64 : index
      %c384_103 = arith.constant 384 : index
      %104 = vector.load %arg11[%c64_102, %c384_103] : memref<128x1152xbf16, #tpu.memory_space<vmem>>, vector<64x128xbf16>
      tpu.vector_store %arg11[%c64_102, %c384_103], %103 {strides = array<i32>} : memref<128x1152xbf16, #tpu.memory_space<vmem>>, vector<64x128xbf16>,
      %c1_104 = arith.constant 1 : index
      %c1_105 = arith.constant 1 : index
      %c0_106 = arith.constant 0 : index
      %105 = tpu.strided_load %arg10[%c1_104, %c1_105, %c0_106] {strides = array<i32: 2, 2, 1>} : memref<18x18x128xf32, #tpu.memory_space<vmem>>, vector<8x8x128xf32>
      %106 = arith.truncf %105 : vector<8x8x128xf32> to vector<8x8x128xbf16>
      %c1_107 = arith.constant 1 : index
      %c0_108 = arith.constant 0 : index
      %c0_109 = arith.constant 0 : index
      %c0_110 = arith.constant 0 : index
      %107 = vector.load %arg9[%c1_107, %c0_108, %c0_109, %c0_110] : memref<2x8x8x128xbf16, #tpu.memory_space<vmem>>, vector<1x8x8x128xbf16>
      %108 = vector.shape_cast %107 : vector<1x8x8x128xbf16> to vector<8x8x128xbf16>
      %109 = vector.shape_cast %106 : vector<8x8x128xbf16> to vector<1x8x8x128xbf16>
      tpu.vector_store %arg9[%c1_107, %c0_108, %c0_109, %c0_110], %109 {strides = array<i32>} : memref<2x8x8x128xbf16, #tpu.memory_space<vmem>>, vector<1x8x8x128xbf16>,
      %110 = vector.shape_cast %105 : vector<8x8x128xf32> to vector<64x128xf32>
      %111 = arith.truncf %110 : vector<64x128xf32> to vector<64x128xbf16>
      %c64_111 = arith.constant 64 : index
      %c512_112 = arith.constant 512 : index
      %112 = vector.load %arg11[%c64_111, %c512_112] : memref<128x1152xbf16, #tpu.memory_space<vmem>>, vector<64x128xbf16>
      tpu.vector_store %arg11[%c64_111, %c512_112], %111 {strides = array<i32>} : memref<128x1152xbf16, #tpu.memory_space<vmem>>, vector<64x128xbf16>,
      %c1_113 = arith.constant 1 : index
      %c2_114 = arith.constant 2 : index
      %c0_115 = arith.constant 0 : index
      %113 = tpu.strided_load %arg10[%c1_113, %c2_114, %c0_115] {strides = array<i32: 2, 2, 1>} : memref<18x18x128xf32, #tpu.memory_space<vmem>>, vector<8x8x128xf32>
      %114 = vector.shape_cast %113 : vector<8x8x128xf32> to vector<64x128xf32>
      %115 = arith.truncf %114 : vector<64x128xf32> to vector<64x128xbf16>
      %c64_116 = arith.constant 64 : index
      %c640_117 = arith.constant 640 : index
      %116 = vector.load %arg11[%c64_116, %c640_117] : memref<128x1152xbf16, #tpu.memory_space<vmem>>, vector<64x128xbf16>
      tpu.vector_store %arg11[%c64_116, %c640_117], %115 {strides = array<i32>} : memref<128x1152xbf16, #tpu.memory_space<vmem>>, vector<64x128xbf16>,
      %c2_118 = arith.constant 2 : index
      %c0_119 = arith.constant 0 : index
      %c0_120 = arith.constant 0 : index
      %117 = tpu.strided_load %arg10[%c2_118, %c0_119, %c0_120] {strides = array<i32: 2, 2, 1>} : memref<18x18x128xf32, #tpu.memory_space<vmem>>, vector<8x8x128xf32>
      %118 = vector.shape_cast %117 : vector<8x8x128xf32> to vector<64x128xf32>
      %119 = arith.truncf %118 : vector<64x128xf32> to vector<64x128xbf16>
      %c64_121 = arith.constant 64 : index
      %c768_122 = arith.constant 768 : index
      %120 = vector.load %arg11[%c64_121, %c768_122] : memref<128x1152xbf16, #tpu.memory_space<vmem>>, vector<64x128xbf16>
      tpu.vector_store %arg11[%c64_121, %c768_122], %119 {strides = array<i32>} : memref<128x1152xbf16, #tpu.memory_space<vmem>>, vector<64x128xbf16>,
      %c2_123 = arith.constant 2 : index
      %c1_124 = arith.constant 1 : index
      %c0_125 = arith.constant 0 : index
      %121 = tpu.strided_load %arg10[%c2_123, %c1_124, %c0_125] {strides = array<i32: 2, 2, 1>} : memref<18x18x128xf32, #tpu.memory_space<vmem>>, vector<8x8x128xf32>
      %122 = vector.shape_cast %121 : vector<8x8x128xf32> to vector<64x128xf32>
      %123 = arith.truncf %122 : vector<64x128xf32> to vector<64x128xbf16>
      %c64_126 = arith.constant 64 : index
      %c896_127 = arith.constant 896 : index
      %124 = vector.load %arg11[%c64_126, %c896_127] : memref<128x1152xbf16, #tpu.memory_space<vmem>>, vector<64x128xbf16>
      tpu.vector_store %arg11[%c64_126, %c896_127], %123 {strides = array<i32>} : memref<128x1152xbf16, #tpu.memory_space<vmem>>, vector<64x128xbf16>,
      %c2_128 = arith.constant 2 : index
      %c2_129 = arith.constant 2 : index
      %c0_130 = arith.constant 0 : index
      %125 = tpu.strided_load %arg10[%c2_128, %c2_129, %c0_130] {strides = array<i32: 2, 2, 1>} : memref<18x18x128xf32, #tpu.memory_space<vmem>>, vector<8x8x128xf32>
      %126 = vector.shape_cast %125 : vector<8x8x128xf32> to vector<64x128xf32>
      %127 = arith.truncf %126 : vector<64x128xf32> to vector<64x128xbf16>
      %c64_131 = arith.constant 64 : index
      %c1024_132 = arith.constant 1024 : index
      %128 = vector.load %arg11[%c64_131, %c1024_132] : memref<128x1152xbf16, #tpu.memory_space<vmem>>, vector<64x128xbf16>
      tpu.vector_store %arg11[%c64_131, %c1024_132], %127 {strides = array<i32>} : memref<128x1152xbf16, #tpu.memory_space<vmem>>, vector<64x128xbf16>,
    } else {
    }
    %c0 = arith.constant 0 : index
    %c0_1 = arith.constant 0 : index
    %3 = vector.load %arg11[%c0, %c0_1] : memref<128x1152xbf16, #tpu.memory_space<vmem>>, vector<128x1152xbf16>
    %c0_2 = arith.constant 0 : index
    %c0_3 = arith.constant 0 : index
    %4 = vector.load %arg3[%c0_2, %c0_3] : memref<1152x128xbf16, #tpu.memory_space<vmem>>, vector<1152x128xbf16>
    %cst = arith.constant dense<0.000000e+00> : vector<128x128xf32>
    %5 = tpu.matmul %3, %4, %cst {dimension_numbers = #tpu.dot_dimension_numbers<[1], [0], [0], [1], [0, 0, 1, 1], [], []>} : vector<128x1152xbf16>, vector<1152x128xbf16>, vector<128x128xf32> -> vector<128x128xf32>
    %c0_4 = arith.constant 0 : index
    %c0_5 = arith.constant 0 : index
    %6 = vector.load %arg6[%c0_4, %c0_5] : memref<1x128xf32, #tpu.memory_space<vmem>>, vector<1x128xf32>
    %7 = vector.broadcast %6 : vector<1x128xf32> to vector<128x128xf32>
    %8 = arith.mulf %5, %7 : vector<128x128xf32>
    %c0_6 = arith.constant 0 : index
    %c0_7 = arith.constant 0 : index
    %9 = vector.load %arg7[%c0_6, %c0_7] : memref<1x128xf32, #tpu.memory_space<vmem>>, vector<1x128xf32>
    %10 = vector.broadcast %9 : vector<1x128xf32> to vector<128x128xf32>
    %11 = arith.addf %8, %10 : vector<128x128xf32>
    %cst_8 = arith.constant 0.000000e+00 : f32
    %12 = vector.broadcast %cst_8 : f32 to vector<128x128xf32>
    %13 = arith.maximumf %11, %12 : vector<128x128xf32>
    %14 = vector.shape_cast %13 : vector<128x128xf32> to vector<2x8x8x128xf32>
    %15 = arith.truncf %14 : vector<2x8x8x128xf32> to vector<2x8x8x128xbf16>
    %c0_9 = arith.constant 0 : index
    %c0_10 = arith.constant 0 : index
    %c0_11 = arith.constant 0 : index
    %c0_12 = arith.constant 0 : index
    %16 = vector.load %arg8[%c0_9, %c0_10, %c0_11, %c0_12] : memref<2x8x8x128xbf16, #tpu.memory_space<vmem>>, vector<2x8x8x128xbf16>
    tpu.vector_store %arg8[%c0_9, %c0_10, %c0_11, %c0_12], %15 {strides = array<i32>} : memref<2x8x8x128xbf16, #tpu.memory_space<vmem>>, vector<2x8x8x128xbf16>,
    return
  }
  func.func @transform_0(%arg0: i32, %arg1: i32) -> (i32, i32, i32, i32) {
    %c0_i32 = arith.constant 0 : i32
    %c0_i32_0 = arith.constant 0 : i32
    %c0_i32_1 = arith.constant 0 : i32
    %c0_i32_2 = arith.constant 0 : i32
    return %arg0, %c0_i32, %c0_i32_0, %c0_i32_1 : i32, i32, i32, i32
  }
  func.func @transform_1(%arg0: i32, %arg1: i32) -> (i32, i32) {
    %c0_i32 = arith.constant 0 : i32
    %c0_i32_0 = arith.constant 0 : i32
    return %c0_i32, %arg1 : i32, i32
  }
  func.func @transform_2(%arg0: i32, %arg1: i32) -> (i32, i32) {
    %c0_i32 = arith.constant 0 : i32
    %c0_i32_0 = arith.constant 0 : i32
    %c0_i32_1 = arith.constant 0 : i32
    return %c0_i32, %c0_i32_0 : i32, i32
  }
  func.func @transform_3(%arg0: i32, %arg1: i32) -> (i32, i32) {
    %c0_i32 = arith.constant 0 : i32
    %c0_i32_0 = arith.constant 0 : i32
    %c0_i32_1 = arith.constant 0 : i32
    return %c0_i32, %c0_i32_0 : i32, i32
  }
  func.func @transform_4(%arg0: i32, %arg1: i32) -> (i32, i32) {
    %c0_i32 = arith.constant 0 : i32
    %c0_i32_0 = arith.constant 0 : i32
    return %c0_i32, %arg1 : i32, i32
  }
  func.func @transform_5(%arg0: i32, %arg1: i32) -> (i32, i32) {
    %c0_i32 = arith.constant 0 : i32
    %c0_i32_0 = arith.constant 0 : i32
    return %c0_i32, %arg1 : i32, i32
  }
  func.func @transform_6(%arg0: i32, %arg1: i32) -> (i32, i32, i32, i32) {
    %c0_i32 = arith.constant 0 : i32
    %c0_i32_0 = arith.constant 0 : i32
    %c0_i32_1 = arith.constant 0 : i32
    return %arg0, %c0_i32, %c0_i32_0, %arg1 : i32, i32, i32, i32
  }
  func.func @transform_7(%arg0: i32, %arg1: i32) -> (i32, i32, i32, i32) {
    %c0_i32 = arith.constant 0 : i32
    %c0_i32_0 = arith.constant 0 : i32
    %c0_i32_1 = arith.constant 0 : i32
    %c0_i32_2 = arith.constant 0 : i32
    return %arg0, %c0_i32, %c0_i32_0, %c0_i32_1 : i32, i32, i32, i32
  }
}

module attributes {stable_mosaic.version = 11 : i64} {
  func.func @_conv2_proj_kernel(%arg0: i32, %arg1: i32, %arg2: memref<2x8x8x128xbf16, #tpu.memory_space<vmem>>, %arg3: memref<2x8x8x128xbf16, #tpu.memory_space<vmem>>, %arg4: memref<1280x128xbf16, #tpu.memory_space<vmem>>, %arg5: memref<2x8x8x128xbf16, #tpu.memory_space<vmem>>, %arg6: memref<10x10x128xbf16, #tpu.memory_space<vmem>>, %arg7: memref<128x1280xbf16, #tpu.memory_space<vmem>>) attributes {dimension_semantics = [#tpu.dimension_semantics<parallel>, #tpu.dimension_semantics<arbitrary>], iteration_bounds = array<i64: 1, 1>, scalar_prefetch = 0 : i64, scratch_operands = 2 : i64, tpu.core_type = #tpu.core_type<tc>, window_params = [{transform_indices = @transform_0, window_bounds = array<i64: 2, 8, 8, 128>}, {transform_indices = @transform_1, window_bounds = array<i64: 2, 8, 8, 128>}, {transform_indices = @transform_2, window_bounds = array<i64: 1280, 128>}, {transform_indices = @transform_3, window_bounds = array<i64: 2, 8, 8, 128>}]} {
    %c0_i32 = arith.constant 0 : i32
    %0 = arith.cmpi eq, %arg1, %c0_i32 : i32
    %1 = arith.extui %0 : i1 to i32
    %c0_i32_0 = arith.constant 0 : i32
    %2 = arith.cmpi ne, %1, %c0_i32_0 : i32
    scf.if %2 {
      %cst_8 = arith.constant 0.000000e+00 : bf16
      %9 = vector.broadcast %cst_8 : bf16 to vector<1x10x128xbf16>
      %cst_9 = arith.constant 0.000000e+00 : bf16
      %10 = vector.broadcast %cst_9 : bf16 to vector<8x1x128xbf16>
      %c0_10 = arith.constant 0 : index
      %c0_11 = arith.constant 0 : index
      %c0_12 = arith.constant 0 : index
      %11 = vector.load %arg6[%c0_10, %c0_11, %c0_12] : memref<10x10x128xbf16, #tpu.memory_space<vmem>>, vector<1x10x128xbf16>
      tpu.vector_store %arg6[%c0_10, %c0_11, %c0_12], %9 {strides = array<i32>} : memref<10x10x128xbf16, #tpu.memory_space<vmem>>, vector<1x10x128xbf16>,
      %c9 = arith.constant 9 : index
      %c0_13 = arith.constant 0 : index
      %c0_14 = arith.constant 0 : index
      %12 = vector.load %arg6[%c9, %c0_13, %c0_14] : memref<10x10x128xbf16, #tpu.memory_space<vmem>>, vector<1x10x128xbf16>
      tpu.vector_store %arg6[%c9, %c0_13, %c0_14], %9 {strides = array<i32>} : memref<10x10x128xbf16, #tpu.memory_space<vmem>>, vector<1x10x128xbf16>,
      %c1 = arith.constant 1 : index
      %c0_15 = arith.constant 0 : index
      %c0_16 = arith.constant 0 : index
      %13 = vector.load %arg6[%c1, %c0_15, %c0_16] : memref<10x10x128xbf16, #tpu.memory_space<vmem>>, vector<8x1x128xbf16>
      tpu.vector_store %arg6[%c1, %c0_15, %c0_16], %10 {strides = array<i32>} : memref<10x10x128xbf16, #tpu.memory_space<vmem>>, vector<8x1x128xbf16>,
      %c1_17 = arith.constant 1 : index
      %c9_18 = arith.constant 9 : index
      %c0_19 = arith.constant 0 : index
      %14 = vector.load %arg6[%c1_17, %c9_18, %c0_19] : memref<10x10x128xbf16, #tpu.memory_space<vmem>>, vector<8x1x128xbf16>
      tpu.vector_store %arg6[%c1_17, %c9_18, %c0_19], %10 {strides = array<i32>} : memref<10x10x128xbf16, #tpu.memory_space<vmem>>, vector<8x1x128xbf16>,
      %c0_20 = arith.constant 0 : index
      %c0_21 = arith.constant 0 : index
      %c0_22 = arith.constant 0 : index
      %c0_23 = arith.constant 0 : index
      %15 = vector.load %arg2[%c0_20, %c0_21, %c0_22, %c0_23] : memref<2x8x8x128xbf16, #tpu.memory_space<vmem>>, vector<1x8x8x128xbf16>
      %16 = vector.shape_cast %15 : vector<1x8x8x128xbf16> to vector<8x8x128xbf16>
      %c1_24 = arith.constant 1 : index
      %c1_25 = arith.constant 1 : index
      %c0_26 = arith.constant 0 : index
      %17 = vector.load %arg6[%c1_24, %c1_25, %c0_26] : memref<10x10x128xbf16, #tpu.memory_space<vmem>>, vector<8x8x128xbf16>
      tpu.vector_store %arg6[%c1_24, %c1_25, %c0_26], %16 {strides = array<i32>} : memref<10x10x128xbf16, #tpu.memory_space<vmem>>, vector<8x8x128xbf16>,
      %c0_27 = arith.constant 0 : index
      %c0_28 = arith.constant 0 : index
      %c0_29 = arith.constant 0 : index
      %18 = vector.load %arg6[%c0_27, %c0_28, %c0_29] : memref<10x10x128xbf16, #tpu.memory_space<vmem>>, vector<8x8x128xbf16>
      %19 = vector.shape_cast %18 : vector<8x8x128xbf16> to vector<64x128xbf16>
      %c0_30 = arith.constant 0 : index
      %c0_31 = arith.constant 0 : index
      %20 = vector.load %arg7[%c0_30, %c0_31] : memref<128x1280xbf16, #tpu.memory_space<vmem>>, vector<64x128xbf16>
      tpu.vector_store %arg7[%c0_30, %c0_31], %19 {strides = array<i32>} : memref<128x1280xbf16, #tpu.memory_space<vmem>>, vector<64x128xbf16>,
      %c0_32 = arith.constant 0 : index
      %c1_33 = arith.constant 1 : index
      %c0_34 = arith.constant 0 : index
      %21 = vector.load %arg6[%c0_32, %c1_33, %c0_34] : memref<10x10x128xbf16, #tpu.memory_space<vmem>>, vector<8x8x128xbf16>
      %22 = vector.shape_cast %21 : vector<8x8x128xbf16> to vector<64x128xbf16>
      %c0_35 = arith.constant 0 : index
      %c128 = arith.constant 128 : index
      %23 = vector.load %arg7[%c0_35, %c128] : memref<128x1280xbf16, #tpu.memory_space<vmem>>, vector<64x128xbf16>
      tpu.vector_store %arg7[%c0_35, %c128], %22 {strides = array<i32>} : memref<128x1280xbf16, #tpu.memory_space<vmem>>, vector<64x128xbf16>,
      %c0_36 = arith.constant 0 : index
      %c2 = arith.constant 2 : index
      %c0_37 = arith.constant 0 : index
      %24 = vector.load %arg6[%c0_36, %c2, %c0_37] : memref<10x10x128xbf16, #tpu.memory_space<vmem>>, vector<8x8x128xbf16>
      %25 = vector.shape_cast %24 : vector<8x8x128xbf16> to vector<64x128xbf16>
      %c0_38 = arith.constant 0 : index
      %c256 = arith.constant 256 : index
      %26 = vector.load %arg7[%c0_38, %c256] : memref<128x1280xbf16, #tpu.memory_space<vmem>>, vector<64x128xbf16>
      tpu.vector_store %arg7[%c0_38, %c256], %25 {strides = array<i32>} : memref<128x1280xbf16, #tpu.memory_space<vmem>>, vector<64x128xbf16>,
      %c1_39 = arith.constant 1 : index
      %c0_40 = arith.constant 0 : index
      %c0_41 = arith.constant 0 : index
      %27 = vector.load %arg6[%c1_39, %c0_40, %c0_41] : memref<10x10x128xbf16, #tpu.memory_space<vmem>>, vector<8x8x128xbf16>
      %28 = vector.shape_cast %27 : vector<8x8x128xbf16> to vector<64x128xbf16>
      %c0_42 = arith.constant 0 : index
      %c384 = arith.constant 384 : index
      %29 = vector.load %arg7[%c0_42, %c384] : memref<128x1280xbf16, #tpu.memory_space<vmem>>, vector<64x128xbf16>
      tpu.vector_store %arg7[%c0_42, %c384], %28 {strides = array<i32>} : memref<128x1280xbf16, #tpu.memory_space<vmem>>, vector<64x128xbf16>,
      %c1_43 = arith.constant 1 : index
      %c1_44 = arith.constant 1 : index
      %c0_45 = arith.constant 0 : index
      %30 = vector.load %arg6[%c1_43, %c1_44, %c0_45] : memref<10x10x128xbf16, #tpu.memory_space<vmem>>, vector<8x8x128xbf16>
      %31 = vector.shape_cast %30 : vector<8x8x128xbf16> to vector<64x128xbf16>
      %c0_46 = arith.constant 0 : index
      %c512 = arith.constant 512 : index
      %32 = vector.load %arg7[%c0_46, %c512] : memref<128x1280xbf16, #tpu.memory_space<vmem>>, vector<64x128xbf16>
      tpu.vector_store %arg7[%c0_46, %c512], %31 {strides = array<i32>} : memref<128x1280xbf16, #tpu.memory_space<vmem>>, vector<64x128xbf16>,
      %c1_47 = arith.constant 1 : index
      %c2_48 = arith.constant 2 : index
      %c0_49 = arith.constant 0 : index
      %33 = vector.load %arg6[%c1_47, %c2_48, %c0_49] : memref<10x10x128xbf16, #tpu.memory_space<vmem>>, vector<8x8x128xbf16>
      %34 = vector.shape_cast %33 : vector<8x8x128xbf16> to vector<64x128xbf16>
      %c0_50 = arith.constant 0 : index
      %c640 = arith.constant 640 : index
      %35 = vector.load %arg7[%c0_50, %c640] : memref<128x1280xbf16, #tpu.memory_space<vmem>>, vector<64x128xbf16>
      tpu.vector_store %arg7[%c0_50, %c640], %34 {strides = array<i32>} : memref<128x1280xbf16, #tpu.memory_space<vmem>>, vector<64x128xbf16>,
      %c2_51 = arith.constant 2 : index
      %c0_52 = arith.constant 0 : index
      %c0_53 = arith.constant 0 : index
      %36 = vector.load %arg6[%c2_51, %c0_52, %c0_53] : memref<10x10x128xbf16, #tpu.memory_space<vmem>>, vector<8x8x128xbf16>
      %37 = vector.shape_cast %36 : vector<8x8x128xbf16> to vector<64x128xbf16>
      %c0_54 = arith.constant 0 : index
      %c768 = arith.constant 768 : index
      %38 = vector.load %arg7[%c0_54, %c768] : memref<128x1280xbf16, #tpu.memory_space<vmem>>, vector<64x128xbf16>
      tpu.vector_store %arg7[%c0_54, %c768], %37 {strides = array<i32>} : memref<128x1280xbf16, #tpu.memory_space<vmem>>, vector<64x128xbf16>,
      %c2_55 = arith.constant 2 : index
      %c1_56 = arith.constant 1 : index
      %c0_57 = arith.constant 0 : index
      %39 = vector.load %arg6[%c2_55, %c1_56, %c0_57] : memref<10x10x128xbf16, #tpu.memory_space<vmem>>, vector<8x8x128xbf16>
      %40 = vector.shape_cast %39 : vector<8x8x128xbf16> to vector<64x128xbf16>
      %c0_58 = arith.constant 0 : index
      %c896 = arith.constant 896 : index
      %41 = vector.load %arg7[%c0_58, %c896] : memref<128x1280xbf16, #tpu.memory_space<vmem>>, vector<64x128xbf16>
      tpu.vector_store %arg7[%c0_58, %c896], %40 {strides = array<i32>} : memref<128x1280xbf16, #tpu.memory_space<vmem>>, vector<64x128xbf16>,
      %c2_59 = arith.constant 2 : index
      %c2_60 = arith.constant 2 : index
      %c0_61 = arith.constant 0 : index
      %42 = vector.load %arg6[%c2_59, %c2_60, %c0_61] : memref<10x10x128xbf16, #tpu.memory_space<vmem>>, vector<8x8x128xbf16>
      %43 = vector.shape_cast %42 : vector<8x8x128xbf16> to vector<64x128xbf16>
      %c0_62 = arith.constant 0 : index
      %c1024 = arith.constant 1024 : index
      %44 = vector.load %arg7[%c0_62, %c1024] : memref<128x1280xbf16, #tpu.memory_space<vmem>>, vector<64x128xbf16>
      tpu.vector_store %arg7[%c0_62, %c1024], %43 {strides = array<i32>} : memref<128x1280xbf16, #tpu.memory_space<vmem>>, vector<64x128xbf16>,
      %c0_63 = arith.constant 0 : index
      %c0_64 = arith.constant 0 : index
      %c0_65 = arith.constant 0 : index
      %c0_66 = arith.constant 0 : index
      %45 = vector.load %arg3[%c0_63, %c0_64, %c0_65, %c0_66] : memref<2x8x8x128xbf16, #tpu.memory_space<vmem>>, vector<1x8x8x128xbf16>
      %46 = vector.shape_cast %45 : vector<1x8x8x128xbf16> to vector<8x8x128xbf16>
      %47 = vector.shape_cast %46 : vector<8x8x128xbf16> to vector<64x128xbf16>
      %c0_67 = arith.constant 0 : index
      %c1152 = arith.constant 1152 : index
      %48 = vector.load %arg7[%c0_67, %c1152] : memref<128x1280xbf16, #tpu.memory_space<vmem>>, vector<64x128xbf16>
      tpu.vector_store %arg7[%c0_67, %c1152], %47 {strides = array<i32>} : memref<128x1280xbf16, #tpu.memory_space<vmem>>, vector<64x128xbf16>,
      %c1_68 = arith.constant 1 : index
      %c0_69 = arith.constant 0 : index
      %c0_70 = arith.constant 0 : index
      %c0_71 = arith.constant 0 : index
      %49 = vector.load %arg2[%c1_68, %c0_69, %c0_70, %c0_71] : memref<2x8x8x128xbf16, #tpu.memory_space<vmem>>, vector<1x8x8x128xbf16>
      %50 = vector.shape_cast %49 : vector<1x8x8x128xbf16> to vector<8x8x128xbf16>
      %c1_72 = arith.constant 1 : index
      %c1_73 = arith.constant 1 : index
      %c0_74 = arith.constant 0 : index
      %51 = vector.load %arg6[%c1_72, %c1_73, %c0_74] : memref<10x10x128xbf16, #tpu.memory_space<vmem>>, vector<8x8x128xbf16>
      tpu.vector_store %arg6[%c1_72, %c1_73, %c0_74], %50 {strides = array<i32>} : memref<10x10x128xbf16, #tpu.memory_space<vmem>>, vector<8x8x128xbf16>,
      %c0_75 = arith.constant 0 : index
      %c0_76 = arith.constant 0 : index
      %c0_77 = arith.constant 0 : index
      %52 = vector.load %arg6[%c0_75, %c0_76, %c0_77] : memref<10x10x128xbf16, #tpu.memory_space<vmem>>, vector<8x8x128xbf16>
      %53 = vector.shape_cast %52 : vector<8x8x128xbf16> to vector<64x128xbf16>
      %c64 = arith.constant 64 : index
      %c0_78 = arith.constant 0 : index
      %54 = vector.load %arg7[%c64, %c0_78] : memref<128x1280xbf16, #tpu.memory_space<vmem>>, vector<64x128xbf16>
      tpu.vector_store %arg7[%c64, %c0_78], %53 {strides = array<i32>} : memref<128x1280xbf16, #tpu.memory_space<vmem>>, vector<64x128xbf16>,
      %c0_79 = arith.constant 0 : index
      %c1_80 = arith.constant 1 : index
      %c0_81 = arith.constant 0 : index
      %55 = vector.load %arg6[%c0_79, %c1_80, %c0_81] : memref<10x10x128xbf16, #tpu.memory_space<vmem>>, vector<8x8x128xbf16>
      %56 = vector.shape_cast %55 : vector<8x8x128xbf16> to vector<64x128xbf16>
      %c64_82 = arith.constant 64 : index
      %c128_83 = arith.constant 128 : index
      %57 = vector.load %arg7[%c64_82, %c128_83] : memref<128x1280xbf16, #tpu.memory_space<vmem>>, vector<64x128xbf16>
      tpu.vector_store %arg7[%c64_82, %c128_83], %56 {strides = array<i32>} : memref<128x1280xbf16, #tpu.memory_space<vmem>>, vector<64x128xbf16>,
      %c0_84 = arith.constant 0 : index
      %c2_85 = arith.constant 2 : index
      %c0_86 = arith.constant 0 : index
      %58 = vector.load %arg6[%c0_84, %c2_85, %c0_86] : memref<10x10x128xbf16, #tpu.memory_space<vmem>>, vector<8x8x128xbf16>
      %59 = vector.shape_cast %58 : vector<8x8x128xbf16> to vector<64x128xbf16>
      %c64_87 = arith.constant 64 : index
      %c256_88 = arith.constant 256 : index
      %60 = vector.load %arg7[%c64_87, %c256_88] : memref<128x1280xbf16, #tpu.memory_space<vmem>>, vector<64x128xbf16>
      tpu.vector_store %arg7[%c64_87, %c256_88], %59 {strides = array<i32>} : memref<128x1280xbf16, #tpu.memory_space<vmem>>, vector<64x128xbf16>,
      %c1_89 = arith.constant 1 : index
      %c0_90 = arith.constant 0 : index
      %c0_91 = arith.constant 0 : index
      %61 = vector.load %arg6[%c1_89, %c0_90, %c0_91] : memref<10x10x128xbf16, #tpu.memory_space<vmem>>, vector<8x8x128xbf16>
      %62 = vector.shape_cast %61 : vector<8x8x128xbf16> to vector<64x128xbf16>
      %c64_92 = arith.constant 64 : index
      %c384_93 = arith.constant 384 : index
      %63 = vector.load %arg7[%c64_92, %c384_93] : memref<128x1280xbf16, #tpu.memory_space<vmem>>, vector<64x128xbf16>
      tpu.vector_store %arg7[%c64_92, %c384_93], %62 {strides = array<i32>} : memref<128x1280xbf16, #tpu.memory_space<vmem>>, vector<64x128xbf16>,
      %c1_94 = arith.constant 1 : index
      %c1_95 = arith.constant 1 : index
      %c0_96 = arith.constant 0 : index
      %64 = vector.load %arg6[%c1_94, %c1_95, %c0_96] : memref<10x10x128xbf16, #tpu.memory_space<vmem>>, vector<8x8x128xbf16>
      %65 = vector.shape_cast %64 : vector<8x8x128xbf16> to vector<64x128xbf16>
      %c64_97 = arith.constant 64 : index
      %c512_98 = arith.constant 512 : index
      %66 = vector.load %arg7[%c64_97, %c512_98] : memref<128x1280xbf16, #tpu.memory_space<vmem>>, vector<64x128xbf16>
      tpu.vector_store %arg7[%c64_97, %c512_98], %65 {strides = array<i32>} : memref<128x1280xbf16, #tpu.memory_space<vmem>>, vector<64x128xbf16>,
      %c1_99 = arith.constant 1 : index
      %c2_100 = arith.constant 2 : index
      %c0_101 = arith.constant 0 : index
      %67 = vector.load %arg6[%c1_99, %c2_100, %c0_101] : memref<10x10x128xbf16, #tpu.memory_space<vmem>>, vector<8x8x128xbf16>
      %68 = vector.shape_cast %67 : vector<8x8x128xbf16> to vector<64x128xbf16>
      %c64_102 = arith.constant 64 : index
      %c640_103 = arith.constant 640 : index
      %69 = vector.load %arg7[%c64_102, %c640_103] : memref<128x1280xbf16, #tpu.memory_space<vmem>>, vector<64x128xbf16>
      tpu.vector_store %arg7[%c64_102, %c640_103], %68 {strides = array<i32>} : memref<128x1280xbf16, #tpu.memory_space<vmem>>, vector<64x128xbf16>,
      %c2_104 = arith.constant 2 : index
      %c0_105 = arith.constant 0 : index
      %c0_106 = arith.constant 0 : index
      %70 = vector.load %arg6[%c2_104, %c0_105, %c0_106] : memref<10x10x128xbf16, #tpu.memory_space<vmem>>, vector<8x8x128xbf16>
      %71 = vector.shape_cast %70 : vector<8x8x128xbf16> to vector<64x128xbf16>
      %c64_107 = arith.constant 64 : index
      %c768_108 = arith.constant 768 : index
      %72 = vector.load %arg7[%c64_107, %c768_108] : memref<128x1280xbf16, #tpu.memory_space<vmem>>, vector<64x128xbf16>
      tpu.vector_store %arg7[%c64_107, %c768_108], %71 {strides = array<i32>} : memref<128x1280xbf16, #tpu.memory_space<vmem>>, vector<64x128xbf16>,
      %c2_109 = arith.constant 2 : index
      %c1_110 = arith.constant 1 : index
      %c0_111 = arith.constant 0 : index
      %73 = vector.load %arg6[%c2_109, %c1_110, %c0_111] : memref<10x10x128xbf16, #tpu.memory_space<vmem>>, vector<8x8x128xbf16>
      %74 = vector.shape_cast %73 : vector<8x8x128xbf16> to vector<64x128xbf16>
      %c64_112 = arith.constant 64 : index
      %c896_113 = arith.constant 896 : index
      %75 = vector.load %arg7[%c64_112, %c896_113] : memref<128x1280xbf16, #tpu.memory_space<vmem>>, vector<64x128xbf16>
      tpu.vector_store %arg7[%c64_112, %c896_113], %74 {strides = array<i32>} : memref<128x1280xbf16, #tpu.memory_space<vmem>>, vector<64x128xbf16>,
      %c2_114 = arith.constant 2 : index
      %c2_115 = arith.constant 2 : index
      %c0_116 = arith.constant 0 : index
      %76 = vector.load %arg6[%c2_114, %c2_115, %c0_116] : memref<10x10x128xbf16, #tpu.memory_space<vmem>>, vector<8x8x128xbf16>
      %77 = vector.shape_cast %76 : vector<8x8x128xbf16> to vector<64x128xbf16>
      %c64_117 = arith.constant 64 : index
      %c1024_118 = arith.constant 1024 : index
      %78 = vector.load %arg7[%c64_117, %c1024_118] : memref<128x1280xbf16, #tpu.memory_space<vmem>>, vector<64x128xbf16>
      tpu.vector_store %arg7[%c64_117, %c1024_118], %77 {strides = array<i32>} : memref<128x1280xbf16, #tpu.memory_space<vmem>>, vector<64x128xbf16>,
      %c1_119 = arith.constant 1 : index
      %c0_120 = arith.constant 0 : index
      %c0_121 = arith.constant 0 : index
      %c0_122 = arith.constant 0 : index
      %79 = vector.load %arg3[%c1_119, %c0_120, %c0_121, %c0_122] : memref<2x8x8x128xbf16, #tpu.memory_space<vmem>>, vector<1x8x8x128xbf16>
      %80 = vector.shape_cast %79 : vector<1x8x8x128xbf16> to vector<8x8x128xbf16>
      %81 = vector.shape_cast %80 : vector<8x8x128xbf16> to vector<64x128xbf16>
      %c64_123 = arith.constant 64 : index
      %c1152_124 = arith.constant 1152 : index
      %82 = vector.load %arg7[%c64_123, %c1152_124] : memref<128x1280xbf16, #tpu.memory_space<vmem>>, vector<64x128xbf16>
      tpu.vector_store %arg7[%c64_123, %c1152_124], %81 {strides = array<i32>} : memref<128x1280xbf16, #tpu.memory_space<vmem>>, vector<64x128xbf16>,
    } else {
    }
    %c0 = arith.constant 0 : index
    %c0_1 = arith.constant 0 : index
    %3 = vector.load %arg7[%c0, %c0_1] : memref<128x1280xbf16, #tpu.memory_space<vmem>>, vector<128x1280xbf16>
    %c0_2 = arith.constant 0 : index
    %c0_3 = arith.constant 0 : index
    %4 = vector.load %arg4[%c0_2, %c0_3] : memref<1280x128xbf16, #tpu.memory_space<vmem>>, vector<1280x128xbf16>
    %cst = arith.constant dense<0.000000e+00> : vector<128x128xf32>
    %5 = tpu.matmul %3, %4, %cst {dimension_numbers = #tpu.dot_dimension_numbers<[1], [0], [0], [1], [0, 0, 1, 1], [], []>} : vector<128x1280xbf16>, vector<1280x128xbf16>, vector<128x128xf32> -> vector<128x128xf32>
    %6 = vector.shape_cast %5 : vector<128x128xf32> to vector<2x8x8x128xf32>
    %7 = arith.truncf %6 : vector<2x8x8x128xf32> to vector<2x8x8x128xbf16>
    %c0_4 = arith.constant 0 : index
    %c0_5 = arith.constant 0 : index
    %c0_6 = arith.constant 0 : index
    %c0_7 = arith.constant 0 : index
    %8 = vector.load %arg5[%c0_4, %c0_5, %c0_6, %c0_7] : memref<2x8x8x128xbf16, #tpu.memory_space<vmem>>, vector<2x8x8x128xbf16>
    tpu.vector_store %arg5[%c0_4, %c0_5, %c0_6, %c0_7], %7 {strides = array<i32>} : memref<2x8x8x128xbf16, #tpu.memory_space<vmem>>, vector<2x8x8x128xbf16>,
    return
  }
  func.func @transform_0(%arg0: i32, %arg1: i32) -> (i32, i32, i32, i32) {
    %c0_i32 = arith.constant 0 : i32
    %c0_i32_0 = arith.constant 0 : i32
    %c0_i32_1 = arith.constant 0 : i32
    %c0_i32_2 = arith.constant 0 : i32
    return %arg0, %c0_i32, %c0_i32_0, %c0_i32_1 : i32, i32, i32, i32
  }
  func.func @transform_1(%arg0: i32, %arg1: i32) -> (i32, i32, i32, i32) {
    %c0_i32 = arith.constant 0 : i32
    %c0_i32_0 = arith.constant 0 : i32
    %c0_i32_1 = arith.constant 0 : i32
    %c0_i32_2 = arith.constant 0 : i32
    return %arg0, %c0_i32, %c0_i32_0, %c0_i32_1 : i32, i32, i32, i32
  }
  func.func @transform_2(%arg0: i32, %arg1: i32) -> (i32, i32) {
    %c0_i32 = arith.constant 0 : i32
    %c0_i32_0 = arith.constant 0 : i32
    return %c0_i32, %arg1 : i32, i32
  }
  func.func @transform_3(%arg0: i32, %arg1: i32) -> (i32, i32, i32, i32) {
    %c0_i32 = arith.constant 0 : i32
    %c0_i32_0 = arith.constant 0 : i32
    %c0_i32_1 = arith.constant 0 : i32
    return %arg0, %c0_i32, %c0_i32_0, %arg1 : i32, i32, i32, i32
  }
}

</mosaic_0001>

<bundles_post_ra>
// kernel: basic_block_forward.2
= control target key start
LH: loop header
LB: loop body
LE: loop exit
PB: predicated region body
PF: predicated region fallthrough
CT: control target
= control target key end

     0   :  { %v2905_v1 = vmov 0.0   ;;  %s3815_s1 = inlined_call_operand.vmem [shape: bf16[1152,128], index: 1, kind: input, shape index: {}]   ;;  %s3816_s0 = inlined_call_operand.vmem [shape: bf16[2,16,16,128], index: 0, kind: input, shape index: {}]   ;;  %s3817_s2 = inlined_call_operand.vmem [shape: f32[1,128], index: 2, kind: input, shape index: {}]   ;;  %s3818_s3 = inlined_call_operand.vmem [shape: f32[1,128], index: 3, kind: input, shape index: {}]   ;;  %s3819_s7 = inlined_call_operand.vmem [shape: bf16[2,8,8,128], index: 7, kind: output, shape index: {1}]   ;;  %s3820_s4 = inlined_call_operand.vmem [shape: f32[1,128], index: 4, kind: input, shape index: {}]   ;;  %s3821_s5 = inlined_call_operand.vmem [shape: f32[1,128], index: 5, kind: input, shape index: {}]   ;;  %s3822_s6 = inlined_call_operand.vmem [shape: bf16[2,8,8,128], index: 6, kind: output, shape index: {0}]  }
   0x1   :  { %v2831_v0 = vld [vmem:[%s3815_s1 + $0x40] sm:$0xff]   ;;  %30 = vst [vmem:[#allocation2] sm:$0xff] %v2905_v1  ;;  %31 = vst [vmem:[#allocation2 + $0x8] sm:$0xff] %v2905_v1  ;;  %v2835_v5 = vld [vmem:[%s3815_s1 + $0x48] sm:$0xff]  }
   0x2   :  { %32 = vst [vmem:[#allocation2 + $0x10] sm:$0x3] %v2905_v1  ;;  %38 = vst [vmem:[#allocation2 + $0x18] sm:$0x1] %v2905_v1  ;;  %v2832_v2 = vld [vmem:[%s3815_s1 + $0xc0] sm:$0xff]   ;;  %2510 = vmatprep.subr.bf16.mxu0 %v2831_v0  ;;  %v2836_v6 = vld [vmem:[%s3815_s1 + $0xc8] sm:$0xff]  }
   0x3   :  { %39 = vst [vmem:[#allocation2 + $0x30] sm:$0x1] %v2905_v1  ;;  %40 = vst [vmem:[#allocation2 + $0x48] sm:$0x1] %v2905_v1  ;;  %v2833_v3 = vld [vmem:[%s3815_s1] sm:$0xff]   ;;  %2574 = vmatprep.subr.bf16.mxu1 %v2832_v2  ;;  %v2837_v7 = vld [vmem:[%s3815_s1 + $0x8] sm:$0xff]  }
   0x4   :  { %41 = vst [vmem:[#allocation2 + $0x60] sm:$0x1] %v2905_v1  ;;  %42 = vst [vmem:[#allocation2 + $0x78] sm:$0x1] %v2905_v1  ;;  %v2834_v4 = vld [vmem:[%s3815_s1 + $0x80] sm:$0xff]   ;;  %2511 = vmatpush3.bf16.msra.mxu0 %v2833_v3  ;;  %v2838_v8 = vld [vmem:[%s3815_s1 + $0x88] sm:$0xff]  }
   0x5   :  { %43 = vst [vmem:[#allocation2 + $0x90] sm:$0x1] %v2905_v1  ;;  %44 = vst [vmem:[#allocation2 + $0xa8] sm:$0x1] %v2905_v1  ;;  %2575 = vmatpush3.bf16.msra.mxu1 %v2834_v4  ;;  %2512 = vmatprep.subr.bf16.mxu0 %v2835_v5  ;;  %v2839_v9 = vld [vmem:[%s3815_s1 + $0x50] sm:$0xff]   ;;  %v2843_v13 = vld [vmem:[%s3815_s1 + $0x58] sm:$0xff]  }
   0x6   :  { %45 = vst [vmem:[#allocation2 + $0xc0] sm:$0x1] %v2905_v1  ;;  %46 = vst [vmem:[#allocation2 + $0xd8] sm:$0x1] %v2905_v1  ;;  %2576 = vmatprep.subr.bf16.mxu1 %v2836_v6  ;;  %v2840_v10 = vld [vmem:[%s3815_s1 + $0xd0] sm:$0xff]   ;;  %v2844_v14 = vld [vmem:[%s3815_s1 + $0xd8] sm:$0xff]  }
   0x7   :  { %47 = vst [vmem:[#allocation2 + $0xf0] sm:$0x1] %v2905_v1  ;;  %48 = vst [vmem:[#allocation2 + $0x108] sm:$0x1] %v2905_v1  ;;  %v2841_v11 = vld [vmem:[%s3815_s1 + $0x10] sm:$0xff]   ;;  %v2845_v15 = vld [vmem:[%s3815_s1 + $0x18] sm:$0xff]  }
   0x8   :  { %49 = vst [vmem:[#allocation2 + $0x120] sm:$0x1] %v2905_v1  ;;  %50 = vst [vmem:[#allocation2 + $0x138] sm:$0x1] %v2905_v1  ;;  %2513 = vmatpush3.bf16.msra.mxu0 %v2837_v7  ;;  %v2842_v12 = vld [vmem:[%s3815_s1 + $0x90] sm:$0xff]   ;;  %v2846_v16 = vld [vmem:[%s3815_s1 + $0x98] sm:$0xff]  }
   0x9   :  { %51 = vst [vmem:[#allocation2 + $0x150] sm:$0x1] %v2905_v1  ;;  %52 = vst [vmem:[#allocation2 + $0x168] sm:$0x1] %v2905_v1  ;;  %2577 = vmatpush3.bf16.msra.mxu1 %v2838_v8  ;;  %2514 = vmatprep.subr.bf16.mxu0 %v2839_v9  ;;  %v2847_v17 = vld [vmem:[%s3815_s1 + $0x60] sm:$0xff]   ;;  %v2851_v21 = vld [vmem:[%s3815_s1 + $0x68] sm:$0xff]  }
   0xa   :  { %53 = vst [vmem:[#allocation2 + $0x180] sm:$0x1] %v2905_v1  ;;  %2578 = vmatprep.subr.bf16.mxu1 %v2840_v10  ;;  %v2848_v18 = vld [vmem:[%s3815_s1 + $0xe0] sm:$0xff]   ;;  %v2852_v22 = vld [vmem:[%s3815_s1 + $0xe8] sm:$0xff]   ;;  %v2855_v25 = vld [vmem:[%s3815_s1 + $0x70] sm:$0xff]  }
   0xb   :  { %v2849_v19 = vld [vmem:[%s3815_s1 + $0x20] sm:$0xff]   ;;  %v2853_v23 = vld [vmem:[%s3815_s1 + $0x28] sm:$0xff]   ;;  %v2856_v26 = vld [vmem:[%s3815_s1 + $0xf0] sm:$0xff]  }
   0xc   :  { %2515 = vmatpush3.bf16.msra.mxu0 %v2841_v11  ;;  %v2850_v20 = vld [vmem:[%s3815_s1 + $0xa0] sm:$0xff]   ;;  %v2854_v24 = vld [vmem:[%s3815_s1 + $0xa8] sm:$0xff]   ;;  %v2857_v27 = vld [vmem:[%s3815_s1 + $0x30] sm:$0xff]  }
   0xd   :  { %2579 = vmatpush3.bf16.msra.mxu1 %v2842_v12  ;;  %2516 = vmatprep.subr.bf16.mxu0 %v2843_v13  ;;  %v2858_v28 = vld [vmem:[%s3815_s1 + $0xb0] sm:$0xff]   ;;  %v2859_v29 = vld [vmem:[%s3815_s1 + $0x78] sm:$0xff]   ;;  %v3045_v33 = vld [vmem:[%s3817_s2] ss:$0 sm:$0xff] }
   0xe   :  { %2580 = vmatprep.subr.bf16.mxu1 %v2844_v14  ;;  %v2860_v30 = vld [vmem:[%s3815_s1 + $0xf8] sm:$0xff]   ;;  %v2465_v34 = vld [vmem:[%s3816_s0 + $0x8] sm:$0xff]   ;;  %v2258_v37 = vld [vmem:[%s3816_s0] sm:$0xff]  }
   0xf   :  { %v2861_v31 = vld [vmem:[%s3815_s1 + $0x38] sm:$0xff]   ;;  %v2263_v35 = vunpack.c.l.bf16 %v2465_v34  ;;  %v2264_v36 = vunpack.c.h.bf16 %v2465_v34  ;;  %v2466_v38 = vld [vmem:[%s3816_s0 + $0x10] sm:$0xff]   ;;  %v3059_v39 = vld [vmem:[%s3818_s3] ss:$0 sm:$0xff]  ;;  %v2259_v40 = vunpack.c.l.bf16 %v2258_v37  ;;  %v2260_v41 = vunpack.c.h.bf16 %v2258_v37 }
  0x10   :  { %2517 = vmatpush3.bf16.msra.mxu0 %v2845_v15  ;;  %v2862_v32 = vld [vmem:[%s3815_s1 + $0xb8] sm:$0xff]   ;;  %v2267_v42 = vunpack.c.l.bf16 %v2466_v38  ;;  %v2268_v43 = vunpack.c.h.bf16 %v2466_v38  ;;  %v2483_v44 = vld [vmem:[%s3816_s0 + $0x80] sm:$0xff]   ;;  %v2485_v45 = vld [vmem:[%s3816_s0 + $0x90] sm:$0xff]  }
  0x11   :  { %2581 = vmatpush3.bf16.msra.mxu1 %v2846_v16  ;;  %2518 = vmatprep.subr.bf16.mxu0 %v2847_v17  ;;  %v144_v46 = vmul.f32 %v2263_v35, %v3045_v33  ;;  %v145_v47 = vmul.f32 %v2264_v36, %v3045_v33  ;;  %v2343_v48 = vunpack.c.l.bf16 %v2483_v44  ;;  %v2344_v49 = vunpack.c.h.bf16 %v2483_v44  ;;  %v2863_v54 = vld [vmem:[%s3815_s1 + $0x140] sm:$0xff]   ;;  %v2484_v4 = vld [vmem:[%s3816_s0 + $0x88] sm:$0xff]   ;;  %v2467_v5 = vld [vmem:[%s3816_s0 + $0x18] sm:$0xff]  }
  0x12   :  { %2582 = vmatprep.subr.bf16.mxu1 %v2848_v18  ;;  %v142_v50 = vmul.f32 %v2259_v40, %v3045_v33  ;;  %v143_v51 = vmul.f32 %v2260_v41, %v3045_v33  ;;  %v146_v52 = vmul.f32 %v2267_v42, %v3045_v33  ;;  %v147_v53 = vmul.f32 %v2268_v43, %v3045_v33  ;;  %v2864_v59 = vld [vmem:[%s3815_s1 + $0x1c0] sm:$0xff]   ;;  %v2469_v14 = vld [vmem:[%s3816_s0 + $0x28] sm:$0xff]   ;;  %v2470_v35 = vld [vmem:[%s3816_s0 + $0x30] sm:$0xff]  }
  0x13   :  { %v182_v55 = vadd.f32 %v3059_v39, %v144_v46  ;;  %v183_v56 = vadd.f32 %v3059_v39, %v145_v47  ;;  %v2351_v57 = vunpack.c.l.bf16 %v2485_v45  ;;  %v2352_v58 = vunpack.c.h.bf16 %v2485_v45  ;;  %v324_v36 = vld [vmem:[#allocation2 + $0x2] ss:$2 sm:$0xff] }
  0x14   :  { %2519 = vmatpush3.bf16.msra.mxu0 %v2849_v19  ;;  %v180_v60 = vadd.f32 %v3059_v39, %v142_v50  ;;  %v181_v61 = vadd.f32 %v3059_v39, %v143_v51  ;;  %v184_v62 = vadd.f32 %v3059_v39, %v146_v52  ;;  %v185_v63 = vadd.f32 %v3059_v39, %v147_v53  ;;  %v2865_v42 = vld [vmem:[%s3815_s1 + $0x100] sm:$0xff]  }
  0x15   :  { %2583 = vmatpush3.bf16.msra.mxu1 %v2850_v20  ;;  %2520 = vmatprep.subr.bf16.mxu0 %v2851_v21  ;;  %v214_v0 = vmax.f32 %v182_v55, 0.0  ;;  %v215_v1 = vmax.f32 %v183_v56, 0.0  ;;  %v571_v2 = vmul.f32 %v2343_v48, %v3045_v33  ;;  %v572_v3 = vmul.f32 %v2344_v49, %v3045_v33  ;;  %v3134_v47 = vld [vmem:[%s3816_s0 + $0xa0] sm:$0xff]   ;;  %v3139_v48 = vld [vmem:[%s3816_s0 + $0xb0] sm:$0xff]  }
  0x16   :  { %2584 = vmatprep.subr.bf16.mxu1 %v2852_v22  ;;  %v212_v6 = vmax.f32 %v180_v60, 0.0  ;;  %v213_v7 = vmax.f32 %v181_v61, 0.0  ;;  %v216_v8 = vmax.f32 %v184_v62, 0.0  ;;  %v217_v9 = vmax.f32 %v185_v63, 0.0  ;;  %v2866_v52 = vld [vmem:[%s3815_s1 + $0x180] sm:$0xff]  }
  0x17   :  { %246 = vst [vmem:[#allocation2 + $0x31] sm:$0xff] %v214_v0  ;;  %247 = vst [vmem:[#allocation2 + $0x39] sm:$0xff] %v215_v1  ;;  %v575_v10 = vmul.f32 %v2351_v57, %v3045_v33  ;;  %v576_v11 = vmul.f32 %v2352_v58, %v3045_v33  ;;  %v3096_v12 = vadd.f32 %v3059_v39, %v571_v2  ;;  %v2347_v15 = vunpack.c.l.bf16 %v2484_v4  ;;  %v2867_v57 = vld [vmem:[%s3815_s1 + $0x148] sm:$0xff]  }
  0x18   :  { %2521 = vmatpush3.bf16.msra.mxu0 %v2853_v23  ;;  %v3099_v13 = vadd.f32 %v3059_v39, %v572_v3  ;;  %244 = vst [vmem:[#allocation2 + $0x19] sm:$0xff] %v212_v6  ;;  %245 = vst [vmem:[#allocation2 + $0x21] sm:$0xff] %v213_v7  ;;  %v2348_v16 = vunpack.c.h.bf16 %v2484_v4  ;;  %v2271_v17 = vunpack.c.l.bf16 %v2467_v5  ;;  %v2272_v18 = vunpack.c.h.bf16 %v2467_v5  ;;  %v2468_v23 = vld [vmem:[%s3816_s0 + $0x20] sm:$0xff]   ;;  %v2868_v1 = vld [vmem:[%s3815_s1 + $0x1c8] sm:$0xff]  }
  0x19   :  { %2585 = vmatpush3.bf16.msra.mxu1 %v2854_v24  ;;  %2522 = vmatprep.subr.bf16.mxu0 %v2855_v25  ;;  %248 = vst [vmem:[#allocation2 + $0x49] sm:$0xff] %v216_v8  ;;  %249 = vst [vmem:[#allocation2 + $0x51] sm:$0xff] %v217_v9  ;;  %v607_v19 = vadd.f32 %v3059_v39, %v575_v10  ;;  %v608_v20 = vadd.f32 %v3059_v39, %v576_v11  ;;  %v635_v21 = vmax.f32 %v3096_v12, 0.0  ;;  %v300_v24 = vld [vmem:[#allocation2 + $0x1] ss:$2 sm:$0xff] }
  0x1a   :  { %2586 = vmatprep.subr.bf16.mxu1 %v2856_v26  ;;  %v636_v22 = vmax.f32 %v3099_v13, 0.0  ;;  %v276_v25 = vld [vmem:[#allocation2] ss:$2 sm:$0xff]  ;;  %v573_v26 = vmul.f32 %v2347_v15, %v3045_v33  ;;  %v149_v34 = vmul.f32 %v2272_v18, %v3045_v33  ;;  %v2275_v45 = vunpack.c.l.bf16 %v2468_v23 }
  0x1b   :  { %v2276_v46 = vunpack.c.h.bf16 %v2468_v23  ;;  %v2283_v55 = vunpack.c.l.bf16 %v2470_v35  ;;  %v2284_v56 = vunpack.c.h.bf16 %v2470_v35  ;;  %v2359_v13 = vunpack.c.l.bf16 %v3134_v47 }
  0x1c   :  { %2523 = vmatpush3.bf16.msra.mxu0 %v2857_v27  ;;  %v574_v27 = vmul.f32 %v2348_v16, %v3045_v33  ;;  %v3119_v37 = vadd.f32 %v3059_v39, %v573_v26  ;;  %v187_v44 = vadd.f32 %v3059_v39, %v149_v34  ;;  %v150_v0 = vmul.f32 %v2275_v45, %v3045_v33  ;;  %v2869_v26 = vld [vmem:[%s3815_s1 + $0x108] sm:$0xff]  }
  0x1d   :  { %2587 = vmatpush3.bf16.msra.mxu1 %v2858_v28  ;;  %2524 = vmatprep.subr.bf16.mxu0 %v2859_v29  ;;  %v2279_v28 = vunpack.c.l.bf16 %v2469_v14  ;;  %v2280_v29 = vunpack.c.h.bf16 %v2469_v14  ;;  %v151_v6 = vmul.f32 %v2276_v46, %v3045_v33  ;;  %v154_v7 = vmul.f32 %v2283_v55, %v3045_v33  ;;  %v2874_v55 = vld [vmem:[%s3815_s1 + $0x190] sm:$0xff]  }
  0x1e   :  { %2588 = vmatprep.subr.bf16.mxu1 %v2860_v30  ;;  %v639_v30 = vmax.f32 %v607_v19, 0.0  ;;  %v3122_v38 = vadd.f32 %v3059_v39, %v574_v27  ;;  %v302_v49 = vld [vmem:[#allocation2 + $0x31] ss:$2 sm:$0xff]  ;;  %v278_v50 = vld [vmem:[#allocation2 + $0x30] ss:$2 sm:$0xff]  ;;  %v155_v8 = vmul.f32 %v2284_v56, %v3045_v33  ;;  %v188_v12 = vadd.f32 %v3059_v39, %v150_v0  ;;  %v2870_v27 = vld [vmem:[%s3815_s1 + $0x188] sm:$0xff]  }
  0x1f   :  { %v152_v40 = vmul.f32 %v2279_v28, %v3045_v33  ;;  %v153_v41 = vmul.f32 %v2280_v29, %v3045_v33  ;;  %v326_v51 = vld [vmem:[#allocation2 + $0x32] ss:$2 sm:$0xff]  ;;  %v315_v58 = vpack.c.bf16 %v302_v49, %v300_v24  ;;  %v3149_v61 = vld [vmem:[#allocation2 + $0x19] ss:$2 sm:$0xff]  ;;  %v291_v62 = vpack.c.bf16 %v278_v50, %v276_v25 }
  0x20   :  { %2525 = vmatpush3.bf16.msra.mxu0 %v2861_v31  ;;  %v640_v31 = vmax.f32 %v608_v20, 0.0  ;;  %v349_v60 = vld [vmem:[#allocation2 + $0x48] ss:$2 sm:$0xff]  ;;  %v339_v63 = vpack.c.bf16 %v326_v51, %v324_v36  ;;  %v3155_v3 = vld [vmem:[#allocation2 + $0x49] ss:$2 sm:$0xff]  ;;  %v2360_v14 = vunpack.c.h.bf16 %v3134_v47  ;;  %v2367_v15 = vunpack.c.l.bf16 %v3139_v48  ;;  %v2486_v20 = vld [vmem:[%s3816_s0 + $0x98] sm:$0xff]  }
  0x21   :  { %2589 = vmatpush3.bf16.msra.mxu1 %v2862_v32  ;;  %2638 = vmatprep.subr.bf16.mxu0 %v2863_v54  ;;  %v148_v32 = vmul.f32 %v2271_v17, %v3045_v33  ;;  %v190_v53 = vadd.f32 %v3059_v39, %v152_v40  ;;  %v191_v54 = vadd.f32 %v3059_v39, %v153_v41  ;;  %v3157_v4 = vld [vmem:[#allocation2 + $0x1a] ss:$2 sm:$0xff]  ;;  %v3159_v5 = vld [vmem:[#allocation2 + $0x4a] ss:$2 sm:$0xff]  ;;  %v3166_v10 = vld [vmem:[#allocation2 + $0x31] ss:$2 sm:$0xff]  ;;  %v2356_v47 = vunpack.c.h.bf16 %v2486_v20 }
  0x22   :  { %2702 = vmatprep.subr.bf16.mxu1 %v2864_v59  ;;  %v347_v59 = vld [vmem:[#allocation2 + $0x18] ss:$2 sm:$0xff]  ;;  %1540 = vmatprep.mubr.bf16.mxu0 %v315_v58  ;;  %671 = vst [vmem:[#allocation2 + $0x49] sm:$0xff] %v639_v30  ;;  %672 = vst [vmem:[#allocation2 + $0x51] sm:$0xff] %v640_v31  ;;  %v637_v16 = vmax.f32 %v3119_v37, 0.0  ;;  %v638_v17 = vmax.f32 %v3122_v38, 0.0  ;;  %v189_v24 = vadd.f32 %v3059_v39, %v151_v6  ;;  %v2368_v30 = vunpack.c.h.bf16 %v3139_v48 }
  0x23   :  { %v186_v43 = vadd.f32 %v3059_v39, %v148_v32  ;;  %v362_v2 = vpack.c.bf16 %v349_v60, %v347_v59  ;;  %667 = vst [vmem:[#allocation2 + $0x19] sm:$0xff] %v635_v21  ;;  %668 = vst [vmem:[#allocation2 + $0x21] sm:$0xff] %v636_v22  ;;  %v3164_v9 = vld [vmem:[#allocation2 + $0x30] ss:$2 sm:$0xff]  ;;  %1541 = vmatmul.mubr.bf16.vlgmr.msra.gmra.mrb[0].mxu0 %v291_v62  ;;  %v219_v19 = vmax.f32 %v187_v44, 0.0  ;;  %v2488_v21 = vld [vmem:[%s3816_s0 + $0xa8] sm:$0xff]  }
  0x24   :  { %v3168_v11 = vld [vmem:[#allocation2 + $0x32] ss:$2 sm:$0xff]  ;;  %2639 = vmatpush3.bf16.msra.mxu0 %v2865_v42  ;;  %v222_v22 = vmax.f32 %v190_v53, 0.0  ;;  %v223_v23 = vmax.f32 %v191_v54, 0.0  ;;  %v192_v25 = vadd.f32 %v3059_v39, %v154_v7  ;;  %v193_v28 = vadd.f32 %v3059_v39, %v155_v8  ;;  %v2473_v54 = vld [vmem:[%s3816_s0 + $0x48] sm:$0xff]  }
  0x25   :  { %1637 = vmatprep.mubr.bf16.mxu1 %v362_v2  ;;  %v218_v18 = vmax.f32 %v186_v43, 0.0  ;;  %669 = vst [vmem:[#allocation2 + $0x31] sm:$0xff] %v637_v16  ;;  %670 = vst [vmem:[#allocation2 + $0x39] sm:$0xff] %v638_v17  ;;  %v220_v29 = vmax.f32 %v188_v12, 0.0  ;;  %v579_v31 = vmul.f32 %v2359_v13, %v3045_v33  ;;  %2640 = vmatprep.subr.bf16.mxu0 %v2867_v57  ;;  %v2871_v32 = vld [vmem:[%s3815_s1 + $0x150] sm:$0xff]   ;;  %v221_v34 = vmax.f32 %v189_v24, 0.0 }
  0x26   :  { %1638 = vmatmul.mubr.bf16.vlgmr.msra.gmra.mrb[0].mxu1 %v339_v63  ;;  %251 = vst [vmem:[#allocation2 + $0x69] sm:$0xff] %v219_v19  ;;  %254 = vst [vmem:[#allocation2 + $0x91] sm:$0xff] %v222_v22  ;;  %v224_v35 = vmax.f32 %v192_v25, 0.0  ;;  %v580_v36 = vmul.f32 %v2360_v14, %v3045_v33  ;;  %v583_v37 = vmul.f32 %v2367_v15, %v3045_v33  ;;  %v2872_v38 = vld [vmem:[%s3815_s1 + $0x1d0] sm:$0xff]   ;;  %v225_v40 = vmax.f32 %v193_v28, 0.0  ;;  %v2471_v44 = vld [vmem:[%s3816_s0 + $0x38] sm:$0xff]  }
  0x27   :  { %2703 = vmatpush3.bf16.msra.mxu1 %v2866_v52  ;;  %250 = vst [vmem:[#allocation2 + $0x61] sm:$0xff] %v218_v18  ;;  %255 = vst [vmem:[#allocation2 + $0x99] sm:$0xff] %v223_v23  ;;  %v584_v41 = vmul.f32 %v2368_v30, %v3045_v33  ;;  %v3203_v42 = vadd.f32 %v3059_v39, %v579_v31  ;;  %v2355_v43 = vunpack.c.l.bf16 %v2486_v20  ;;  %v2363_v48 = vunpack.c.l.bf16 %v2488_v21  ;;  %v2873_v49 = vld [vmem:[%s3815_s1 + $0x110] sm:$0xff]   ;;  %v2472_v60 = vld [vmem:[%s3816_s0 + $0x40] sm:$0xff]  }
  0x28   :  { %2704 = vmatprep.subr.bf16.mxu1 %v2868_v1  ;;  %252 = vst [vmem:[#allocation2 + $0x79] sm:$0xff] %v220_v29  ;;  %253 = vst [vmem:[#allocation2 + $0x81] sm:$0xff] %v221_v34  ;;  %v612_v45 = vadd.f32 %v3059_v39, %v580_v36  ;;  %v3210_v46 = vadd.f32 %v3059_v39, %v583_v37  ;;  %2641 = vmatpush3.bf16.msra.mxu0 %v2869_v26  ;;  %v2364_v52 = vunpack.c.h.bf16 %v2488_v21  ;;  %v3240_v2 = vld [vmem:[%s3816_s0 + $0x50] sm:$0xff]  }
  0x29   :  { %256 = vst [vmem:[#allocation2 + $0xa9] sm:$0xff] %v224_v35  ;;  %257 = vst [vmem:[#allocation2 + $0xb1] sm:$0xff] %v225_v40  ;;  %v3216_v50 = vadd.f32 %v3059_v39, %v584_v41  ;;  %v643_v51 = vmax.f32 %v3203_v42, 0.0  ;;  %v577_v53 = vmul.f32 %v2355_v43, %v3045_v33  ;;  %2642 = vmatprep.subr.bf16.mxu0 %v2871_v32  ;;  %v2287_v1 = vunpack.c.l.bf16 %v2471_v44 }
  0x2a   :  { %v644_v56 = vmax.f32 %v612_v45, 0.0  ;;  %v647_v57 = vmax.f32 %v3210_v46, 0.0  ;;  %v578_v58 = vmul.f32 %v2356_v47, %v3045_v33  ;;  %v581_v59 = vmul.f32 %v2363_v48, %v3045_v33  ;;  %v2491_v46 = vld [vmem:[%s3816_s0 + $0xc0] sm:$0xff]   ;;  %v2493_v47 = vld [vmem:[%s3816_s0 + $0xd0] sm:$0xff]  }
  0x2b   :  { %2705 = vmatpush3.bf16.msra.mxu1 %v2870_v27  ;;  %v648_v62 = vmax.f32 %v3216_v50, 0.0  ;;  %v582_v63 = vmul.f32 %v2364_v52, %v3045_v33  ;;  %v3235_v0 = vadd.f32 %v3059_v39, %v577_v53  ;;  %v2288_v14 = vunpack.c.h.bf16 %v2471_v44 }
  0x2c   :  { %2706 = vmatprep.subr.bf16.mxu1 %v2872_v38  ;;  %v610_v12 = vadd.f32 %v3059_v39, %v578_v58  ;;  %v613_v13 = vadd.f32 %v3059_v39, %v581_v59  ;;  %v2295_v15 = vunpack.c.l.bf16 %v2473_v54  ;;  %2643 = vmatpush3.bf16.msra.mxu0 %v2873_v49  ;;  %v2296_v20 = vunpack.c.h.bf16 %v2473_v54 }
  0x2d   :  { %v614_v19 = vadd.f32 %v3059_v39, %v582_v63  ;;  %v156_v21 = vmul.f32 %v2287_v1, %v3045_v33  ;;  %v2291_v22 = vunpack.c.l.bf16 %v2472_v60  ;;  %v157_v26 = vmul.f32 %v2288_v14, %v3045_v33 }
  0x2e   :  { %v304_v6 = vld [vmem:[#allocation2 + $0x61] ss:$2 sm:$0xff]  ;;  %v280_v7 = vld [vmem:[#allocation2 + $0x60] ss:$2 sm:$0xff]  ;;  %v306_v16 = vld [vmem:[#allocation2 + $0x91] ss:$2 sm:$0xff]  ;;  %v160_v34 = vmul.f32 %v2295_v15, %v3045_v33  ;;  %v161_v35 = vmul.f32 %v2296_v20, %v3045_v33  ;;  %v2292_v37 = vunpack.c.h.bf16 %v2472_v60  ;;  %v2299_v43 = vunpack.c.l.bf16 %v3240_v2 }
  0x2f   :  { %v3242_v8 = vld [vmem:[#allocation2 + $0x62] ss:$2 sm:$0xff]  ;;  %v330_v18 = vld [vmem:[#allocation2 + $0x92] ss:$2 sm:$0xff]  ;;  %2707 = vmatpush3.bf16.msra.mxu1 %v2874_v55  ;;  %v316_v23 = vpack.c.bf16 %v306_v16, %v304_v6  ;;  %v3250_v28 = vld [vmem:[#allocation2 + $0x79] ss:$2 sm:$0xff]  ;;  %v194_v36 = vadd.f32 %v3059_v39, %v156_v21  ;;  %v195_v42 = vadd.f32 %v3059_v39, %v157_v26  ;;  %v2300_v44 = vunpack.c.h.bf16 %v3240_v2 }
  0x30   :  { %v282_v17 = vld [vmem:[#allocation2 + $0x90] ss:$2 sm:$0xff]  ;;  %v340_v25 = vpack.c.bf16 %v330_v18, %v3242_v8  ;;  %v3254_v30 = vld [vmem:[#allocation2 + $0x60] ss:$2 sm:$0xff]  ;;  %v3258_v32 = vld [vmem:[#allocation2 + $0x61] ss:$2 sm:$0xff]  ;;  %v158_v45 = vmul.f32 %v2291_v22, %v3045_v33  ;;  %v198_v52 = vadd.f32 %v3059_v39, %v160_v34  ;;  %v199_v53 = vadd.f32 %v3059_v39, %v161_v35 }
  0x31   :  { %v292_v24 = vpack.c.bf16 %v282_v17, %v280_v7  ;;  %v351_v27 = vld [vmem:[#allocation2 + $0x78] ss:$2 sm:$0xff]  ;;  %1548 = vmatprep.mubr.bf16.mxu0 %v316_v23  ;;  %v353_v38 = vld [vmem:[#allocation2 + $0xa8] ss:$2 sm:$0xff]  ;;  %v3263_v40 = vld [vmem:[#allocation2 + $0xa9] ss:$2 sm:$0xff]  ;;  %v159_v54 = vmul.f32 %v2292_v37, %v3045_v33  ;;  %v162_v6 = vmul.f32 %v2299_v43, %v3045_v33  ;;  %v163_v7 = vmul.f32 %v2300_v44, %v3045_v33 }
  0x32   :  { %v3252_v29 = vld [vmem:[#allocation2 + $0x7a] ss:$2 sm:$0xff]  ;;  %v3265_v41 = vld [vmem:[#allocation2 + $0xaa] ss:$2 sm:$0xff]  ;;  %v363_v48 = vpack.c.bf16 %v353_v38, %v351_v27  ;;  %v3277_v49 = vld [vmem:[#allocation2 + $0x91] ss:$2 sm:$0xff]  ;;  %v196_v8 = vadd.f32 %v3059_v39, %v158_v45  ;;  %v2376_v14 = vunpack.c.h.bf16 %v2491_v46  ;;  %v2383_v15 = vunpack.c.l.bf16 %v2493_v47 }
  0x33   :  { %v3256_v31 = vld [vmem:[#allocation2 + $0x90] ss:$2 sm:$0xff]  ;;  %675 = vst [vmem:[#allocation2 + $0x79] sm:$0xff] %v643_v51  ;;  %676 = vst [vmem:[#allocation2 + $0x81] sm:$0xff] %v644_v56  ;;  %1549 = vmatmul.mubr.bf16.gmra.mrb[4].mxu0 %v292_v24  ;;  %v641_v55 = vmax.f32 %v3235_v0, 0.0  ;;  %v642_v56 = vmax.f32 %v610_v12, 0.0  ;;  %v197_v12 = vadd.f32 %v3059_v39, %v159_v54  ;;  %v2384_v16 = vunpack.c.h.bf16 %v2493_v47 }
  0x34   :  { %679 = vst [vmem:[#allocation2 + $0xa9] sm:$0xff] %v647_v57  ;;  %680 = vst [vmem:[#allocation2 + $0xb1] sm:$0xff] %v648_v62  ;;  %v3279_v50 = vld [vmem:[#allocation2 + $0x62] ss:$2 sm:$0xff]  ;;  %v3281_v51 = vld [vmem:[#allocation2 + $0x92] ss:$2 sm:$0xff]  ;;  %1645 = vmatprep.mubr.bf16.mxu1 %v363_v48  ;;  %v200_v18 = vadd.f32 %v3059_v39, %v162_v6  ;;  %v591_v26 = vmul.f32 %v2383_v15, %v3045_v33 }
  0x35   :  { %v645_v58 = vmax.f32 %v613_v13, 0.0  ;;  %v646_v59 = vmax.f32 %v614_v19, 0.0  ;;  %v2875_v57 = vld [vmem:[%s3815_s1 + $0x158] sm:$0xff]   ;;  %v226_v62 = vmax.f32 %v194_v36, 0.0  ;;  %v227_v63 = vmax.f32 %v195_v42, 0.0  ;;  %673 = vst [vmem:[#allocation2 + $0x61] sm:$0xff] %v641_v55  ;;  %1646 = vmatmul.mubr.bf16.gmra.mrb[4].mxu1 %v340_v25 }
  0x36   :  { %v2876_v60 = vld [vmem:[%s3815_s1 + $0x1d8] sm:$0xff]   ;;  %v230_v1 = vmax.f32 %v198_v52, 0.0  ;;  %v231_v2 = vmax.f32 %v199_v53, 0.0  ;;  %674 = vst [vmem:[#allocation2 + $0x69] sm:$0xff] %v642_v56  ;;  %v2375_v13 = vunpack.c.l.bf16 %v2491_v46  ;;  %2644 = vmatprep.subr.bf16.mxu0 %v2875_v57  ;;  %v201_v19 = vadd.f32 %v3059_v39, %v163_v7  ;;  %v2879_v23 = vld [vmem:[%s3815_s1 + $0x160] sm:$0xff]   ;;  %v2492_v34 = vld [vmem:[%s3816_s0 + $0xc8] sm:$0xff]  }
  0x37   :  { %v2490_v0 = vld [vmem:[%s3816_s0 + $0xb8] sm:$0xff]   ;;  %677 = vst [vmem:[#allocation2 + $0x91] sm:$0xff] %v645_v58  ;;  %678 = vst [vmem:[#allocation2 + $0x99] sm:$0xff] %v646_v59  ;;  %2708 = vmatprep.subr.bf16.mxu1 %v2876_v60  ;;  %v228_v20 = vmax.f32 %v196_v8, 0.0  ;;  %v229_v21 = vmax.f32 %v197_v12, 0.0  ;;  %v588_v25 = vmul.f32 %v2376_v14, %v3045_v33  ;;  %v592_v27 = vmul.f32 %v2384_v16, %v3045_v33  ;;  %v2477_v47 = vld [vmem:[%s3816_s0 + $0x68] sm:$0xff]  }
  0x38   :  { %258 = vst [vmem:[#allocation2 + $0xc1] sm:$0xff] %v226_v62  ;;  %259 = vst [vmem:[#allocation2 + $0xc9] sm:$0xff] %v227_v63  ;;  %v2877_v17 = vld [vmem:[%s3815_s1 + $0x118] sm:$0xff]   ;;  %v587_v24 = vmul.f32 %v2375_v13, %v3045_v33  ;;  %v232_v35 = vmax.f32 %v200_v18, 0.0  ;;  %v233_v36 = vmax.f32 %v201_v19, 0.0  ;;  %v2371_v37 = vunpack.c.l.bf16 %v2490_v0  ;;  %v3339_v57 = vld [vmem:[%s3816_s0 + $0x60] sm:$0xff]  }
  0x39   :  { %262 = vst [vmem:[#allocation2 + $0xf1] sm:$0xff] %v230_v1  ;;  %263 = vst [vmem:[#allocation2 + $0xf9] sm:$0xff] %v231_v2  ;;  %v2878_v22 = vld [vmem:[%s3815_s1 + $0x198] sm:$0xff]   ;;  %2645 = vmatpush3.bf16.msra.mxu0 %v2877_v17  ;;  %v2372_v38 = vunpack.c.h.bf16 %v2490_v0  ;;  %v620_v43 = vadd.f32 %v3059_v39, %v588_v25  ;;  %v3321_v44 = vadd.f32 %v3059_v39, %v591_v26  ;;  %v2379_v48 = vunpack.c.l.bf16 %v2492_v34  ;;  %v3344_v60 = vld [vmem:[%s3816_s0 + $0x70] sm:$0xff]  }
  0x3a   :  { %260 = vst [vmem:[#allocation2 + $0xd9] sm:$0xff] %v228_v20  ;;  %261 = vst [vmem:[#allocation2 + $0xe1] sm:$0xff] %v229_v21  ;;  %2709 = vmatpush3.bf16.msra.mxu1 %v2878_v22  ;;  %2646 = vmatprep.subr.bf16.mxu0 %v2879_v23  ;;  %v619_v42 = vadd.f32 %v3059_v39, %v587_v24  ;;  %v3324_v45 = vadd.f32 %v3059_v39, %v592_v27  ;;  %v2475_v46 = vld [vmem:[%s3816_s0 + $0x58] sm:$0xff]   ;;  %v2380_v52 = vunpack.c.h.bf16 %v2492_v34  ;;  %v2880_v62 = vld [vmem:[%s3815_s1 + $0x1e0] sm:$0xff]  }
  0x3b   :  { %264 = vst [vmem:[#allocation2 + $0x109] sm:$0xff] %v232_v35  ;;  %265 = vst [vmem:[#allocation2 + $0x111] sm:$0xff] %v233_v36  ;;  %v585_v53 = vmul.f32 %v2371_v37, %v3045_v33  ;;  %v586_v54 = vmul.f32 %v2372_v38, %v3045_v33  ;;  %v652_v56 = vmax.f32 %v620_v43, 0.0  ;;  %v655_v58 = vmax.f32 %v3321_v44, 0.0  ;;  %v2881_v63 = vld [vmem:[%s3815_s1 + $0x120] sm:$0xff]   ;;  %2710 = vmatprep.subr.bf16.mxu1 %v2880_v62 }
  0x3c   :  { %v651_v55 = vmax.f32 %v619_v42, 0.0  ;;  %v656_v59 = vmax.f32 %v3324_v45, 0.0  ;;  %v589_v6 = vmul.f32 %v2379_v48, %v3045_v33  ;;  %v590_v7 = vmul.f32 %v2380_v52, %v3045_v33 }
  0x3d   :  { %v617_v8 = vadd.f32 %v3059_v39, %v585_v53  ;;  %v618_v12 = vadd.f32 %v3059_v39, %v586_v54  ;;  %v2303_v17 = vunpack.c.l.bf16 %v2475_v46  ;;  %v2304_v18 = vunpack.c.h.bf16 %v2475_v46  ;;  %2647 = vmatpush3.bf16.msra.mxu0 %v2881_v63  ;;  %v2495_v53 = vld [vmem:[%s3816_s0 + $0xe0] sm:$0xff]  }
  0x3e   :  { %v2311_v19 = vunpack.c.l.bf16 %v2477_v47  ;;  %v621_v22 = vadd.f32 %v3059_v39, %v589_v6  ;;  %v622_v23 = vadd.f32 %v3059_v39, %v590_v7  ;;  %v2312_v36 = vunpack.c.h.bf16 %v2477_v47 }
  0x3f   :  { %v308_v1 = vld [vmem:[#allocation2 + $0xc1] ss:$2 sm:$0xff]  ;;  %v284_v0 = vld [vmem:[#allocation2 + $0xc0] ss:$2 sm:$0xff]  ;;  %v164_v37 = vmul.f32 %v2303_v17, %v3045_v33  ;;  %v165_v38 = vmul.f32 %v2304_v18, %v3045_v33  ;;  %v2307_v46 = vunpack.c.l.bf16 %v3339_v57  ;;  %v2308_v48 = vunpack.c.h.bf16 %v3339_v57 }
  0x40   :  { %v310_v2 = vld [vmem:[#allocation2 + $0xf1] ss:$2 sm:$0xff]  ;;  %v286_v14 = vld [vmem:[#allocation2 + $0xf0] ss:$2 sm:$0xff]  ;;  %v3368_v27 = vld [vmem:[#allocation2 + $0xc0] ss:$2 sm:$0xff]  ;;  %v168_v42 = vmul.f32 %v2311_v19, %v3045_v33  ;;  %v2315_v47 = vunpack.c.l.bf16 %v3344_v60  ;;  %v2316_v52 = vunpack.c.h.bf16 %v3344_v60  ;;  %v169_v62 = vmul.f32 %v2312_v36, %v3045_v33 }
  0x41   :  { %v317_v13 = vpack.c.bf16 %v310_v2, %v308_v1  ;;  %v3356_v15 = vld [vmem:[#allocation2 + $0xc2] ss:$2 sm:$0xff]  ;;  %v3358_v16 = vld [vmem:[#allocation2 + $0xf2] ss:$2 sm:$0xff]  ;;  %v293_v20 = vpack.c.bf16 %v286_v14, %v284_v0  ;;  %v3364_v25 = vld [vmem:[#allocation2 + $0xd9] ss:$2 sm:$0xff]  ;;  %v202_v63 = vadd.f32 %v3059_v39, %v164_v37  ;;  %v203_v1 = vadd.f32 %v3059_v39, %v165_v38 }
  0x42   :  { %v341_v21 = vpack.c.bf16 %v3358_v16, %v3356_v15  ;;  %v355_v24 = vld [vmem:[#allocation2 + $0xd8] ss:$2 sm:$0xff]  ;;  %v3372_v35 = vld [vmem:[#allocation2 + $0xc1] ss:$2 sm:$0xff]  ;;  %v3377_v43 = vld [vmem:[#allocation2 + $0xf1] ss:$2 sm:$0xff]  ;;  %v206_v57 = vadd.f32 %v3059_v39, %v168_v42  ;;  %v207_v15 = vadd.f32 %v3059_v39, %v169_v62 }
  0x43   :  { %1556 = vmatprep.mubr.bf16.mxu0 %v317_v13  ;;  %v3366_v26 = vld [vmem:[#allocation2 + $0xda] ss:$2 sm:$0xff]  ;;  %v2497_v60 = vld [vmem:[%s3816_s0 + $0xf0] sm:$0xff]   ;;  %v649_v0 = vmax.f32 %v617_v8, 0.0  ;;  %v650_v6 = vmax.f32 %v618_v12, 0.0  ;;  %v653_v7 = vmax.f32 %v621_v22, 0.0  ;;  %v167_v8 = vmul.f32 %v2308_v48, %v3045_v33 }
  0x44   :  { %v3370_v34 = vld [vmem:[#allocation2 + $0xf0] ss:$2 sm:$0xff]  ;;  %683 = vst [vmem:[#allocation2 + $0xd9] sm:$0xff] %v651_v55  ;;  %684 = vst [vmem:[#allocation2 + $0xe1] sm:$0xff] %v652_v56  ;;  %1557 = vmatmul.mubr.bf16.gmra.mrb[8].mxu0 %v293_v20  ;;  %v3390_v55 = vld [vmem:[#allocation2 + $0x109] ss:$2 sm:$0xff]  ;;  %v170_v12 = vmul.f32 %v2315_v47, %v3045_v33  ;;  %v171_v22 = vmul.f32 %v2316_v52, %v3045_v33  ;;  %v2400_v48 = vunpack.c.h.bf16 %v2497_v60 }
  0x45   :  { %v3379_v44 = vld [vmem:[#allocation2 + $0xc2] ss:$2 sm:$0xff]  ;;  %v3381_v45 = vld [vmem:[#allocation2 + $0xf2] ss:$2 sm:$0xff]  ;;  %v654_v14 = vmax.f32 %v622_v23, 0.0  ;;  %v234_v16 = vmax.f32 %v202_v63, 0.0  ;;  %v2391_v23 = vunpack.c.l.bf16 %v2495_v53  ;;  %v205_v38 = vadd.f32 %v3059_v39, %v167_v8 }
  0x46   :  { %v357_v54 = vld [vmem:[#allocation2 + $0x108] ss:$2 sm:$0xff]  ;;  %v2882_v13 = vld [vmem:[%s3815_s1 + $0x1a0] sm:$0xff]   ;;  %v235_v17 = vmax.f32 %v203_v1, 0.0  ;;  %681 = vst [vmem:[#allocation2 + $0xc1] sm:$0xff] %v649_v0  ;;  %682 = vst [vmem:[#allocation2 + $0xc9] sm:$0xff] %v650_v6  ;;  %v208_v42 = vadd.f32 %v3059_v39, %v170_v12  ;;  %v600_v0 = vmul.f32 %v2400_v48, %v3045_v33 }
  0x47   :  { %v3392_v56 = vld [vmem:[#allocation2 + $0x10a] ss:$2 sm:$0xff]  ;;  %v364_v2 = vpack.c.bf16 %v357_v54, %v355_v24  ;;  %685 = vst [vmem:[#allocation2 + $0xf1] sm:$0xff] %v653_v7  ;;  %2711 = vmatpush3.bf16.msra.mxu1 %v2882_v13  ;;  %686 = vst [vmem:[#allocation2 + $0xf9] sm:$0xff] %v654_v14  ;;  %v239_v20 = vmax.f32 %v207_v15, 0.0  ;;  %v2392_v24 = vunpack.c.h.bf16 %v2495_v53  ;;  %v595_v47 = vmul.f32 %v2391_v23, %v3045_v33 }
  0x48   :  { %687 = vst [vmem:[#allocation2 + $0x109] sm:$0xff] %v655_v58  ;;  %688 = vst [vmem:[#allocation2 + $0x111] sm:$0xff] %v656_v59  ;;  %v2883_v18 = vld [vmem:[%s3815_s1 + $0x168] sm:$0xff]   ;;  %v238_v58 = vmax.f32 %v206_v57, 0.0  ;;  %v166_v59 = vmul.f32 %v2307_v46, %v3045_v33  ;;  %v209_v46 = vadd.f32 %v3059_v39, %v171_v22  ;;  %v2494_v53 = vld [vmem:[%s3816_s0 + $0xd8] sm:$0xff]   ;;  %v237_v63 = vmax.f32 %v205_v38, 0.0 }
  0x49   :  { %1653 = vmatprep.mubr.bf16.mxu1 %v364_v2  ;;  %v2884_v19 = vld [vmem:[%s3815_s1 + $0x1e8] sm:$0xff]   ;;  %266 = vst [vmem:[#allocation2 + $0x121] sm:$0xff] %v234_v16  ;;  %267 = vst [vmem:[#allocation2 + $0x129] sm:$0xff] %v235_v17  ;;  %2648 = vmatprep.subr.bf16.mxu0 %v2883_v18  ;;  %v596_v52 = vmul.f32 %v2392_v24, %v3045_v33  ;;  %v240_v1 = vmax.f32 %v208_v42, 0.0  ;;  %v627_v6 = vadd.f32 %v3059_v39, %v595_v47  ;;  %v2887_v14 = vld [vmem:[%s3815_s1 + $0x170] sm:$0xff]  }
  0x4a   :  { %1654 = vmatmul.mubr.bf16.gmra.mrb[8].mxu1 %v341_v21  ;;  %v2885_v36 = vld [vmem:[%s3815_s1 + $0x128] sm:$0xff]   ;;  %270 = vst [vmem:[#allocation2 + $0x151] sm:$0xff] %v238_v58  ;;  %v204_v37 = vadd.f32 %v3059_v39, %v166_v59  ;;  %v2399_v21 = vunpack.c.l.bf16 %v2497_v60  ;;  %2712 = vmatprep.subr.bf16.mxu1 %v2884_v19  ;;  %271 = vst [vmem:[#allocation2 + $0x159] sm:$0xff] %v239_v20  ;;  %v241_v2 = vmax.f32 %v209_v46, 0.0  ;;  %v2387_v16 = vunpack.c.l.bf16 %v2494_v53  ;;  %v716_v8 = vld [vmem:[#allocation2 + $0x31] ss:$2 sm:$0xff] }
  0x4b   :  { %v2496_v54 = vld [vmem:[%s3816_s0 + $0xe8] sm:$0xff]   ;;  %2649 = vmatpush3.bf16.msra.mxu0 %v2885_v36  ;;  %v628_v7 = vadd.f32 %v3059_v39, %v596_v52  ;;  %269 = vst [vmem:[#allocation2 + $0x141] sm:$0xff] %v237_v63  ;;  %272 = vst [vmem:[#allocation2 + $0x169] sm:$0xff] %v240_v1  ;;  %v2388_v17 = vunpack.c.h.bf16 %v2494_v53  ;;  %v632_v58 = vadd.f32 %v3059_v39, %v600_v0  ;;  %v659_v19 = vmax.f32 %v627_v6, 0.0  ;;  %v2888_v36 = vld [vmem:[%s3815_s1 + $0x1f0] sm:$0xff]  }
  0x4c   :  { %v236_v62 = vmax.f32 %v204_v37, 0.0  ;;  %v599_v57 = vmul.f32 %v2399_v21, %v3045_v33  ;;  %v2886_v60 = vld [vmem:[%s3815_s1 + $0x1a8] sm:$0xff]   ;;  %v2395_v18 = vunpack.c.l.bf16 %v2496_v54  ;;  %273 = vst [vmem:[#allocation2 + $0x171] sm:$0xff] %v241_v2  ;;  %v2396_v59 = vunpack.c.h.bf16 %v2496_v54  ;;  %2650 = vmatprep.subr.bf16.mxu0 %v2887_v14  ;;  %v2889_v48 = vld [vmem:[%s3815_s1 + $0x130] sm:$0xff]   ;;  %v747_v1 = vld [vmem:[#allocation2 + $0x18] ss:$2 sm:$0xff] }
  0x4d   :  { %v3437_v13 = vld [vmem:[#allocation2 + $0x1] ss:$2 sm:$0xff]  ;;  %2713 = vmatpush3.bf16.msra.mxu1 %v2886_v60  ;;  %v593_v22 = vmul.f32 %v2387_v16, %v3045_v33  ;;  %v594_v23 = vmul.f32 %v2388_v17, %v3045_v33  ;;  %v660_v37 = vmax.f32 %v628_v7, 0.0  ;;  %v664_v42 = vmax.f32 %v632_v58, 0.0  ;;  %v748_v7 = vld [vmem:[#allocation2 + $0x48] ss:$2 sm:$0xff] }
  0x4e   :  { %268 = vst [vmem:[#allocation2 + $0x139] sm:$0xff] %v236_v62  ;;  %v3443_v15 = vadd.f32 %v3059_v39, %v599_v57  ;;  %v597_v24 = vmul.f32 %v2395_v18, %v3045_v33  ;;  %v598_v46 = vmul.f32 %v2396_v59, %v3045_v33  ;;  %v723_v63 = vpack.c.bf16 %v716_v8, %v3437_v13 }
  0x4f   :  { %v625_v54 = vadd.f32 %v3059_v39, %v593_v22  ;;  %v626_v62 = vadd.f32 %v3059_v39, %v594_v23  ;;  %2714 = vmatprep.subr.bf16.mxu1 %v2888_v36  ;;  %2651 = vmatpush3.bf16.msra.mxu0 %v2889_v48  ;;  %v3487_v36 = vpack.c.bf16 %v3155_v3, %v3149_v61 }
  0x50   :  { %v312_v12 = vld [vmem:[#allocation2 + $0x121] ss:$2 sm:$0xff]  ;;  %v288_v20 = vld [vmem:[#allocation2 + $0x120] ss:$2 sm:$0xff]  ;;  %v663_v38 = vmax.f32 %v3443_v15, 0.0  ;;  %v629_v0 = vadd.f32 %v3059_v39, %v597_v24  ;;  %v630_v6 = vadd.f32 %v3059_v39, %v598_v46  ;;  %v426_v39 = vpack.c.bf16 %v3159_v5, %v3157_v4 }
  0x51   :  { %v3453_v21 = vld [vmem:[#allocation2 + $0x122] ss:$2 sm:$0xff]  ;;  %v314_v47 = vld [vmem:[#allocation2 + $0x151] ss:$2 sm:$0xff]  ;;  %v338_v53 = vld [vmem:[#allocation2 + $0x152] ss:$2 sm:$0xff]  ;;  %v474_v24 = vpack.c.bf16 %v3258_v32, %v3166_v10  ;;  %v427_v46 = vpack.c.bf16 %v3265_v41, %v3252_v29  ;;  %2325 = vst [vmem:[%s3819_s7] sm:$0xff] %v3487_v36   ;;  %v3499_v61 = vpack.c.bf16 %v3263_v40, %v3250_v28  ;;  %v475_v5 = vpack.c.bf16 %v3372_v35, %v3277_v49 }
  0x52   :  { %v290_v52 = vld [vmem:[#allocation2 + $0x150] ss:$2 sm:$0xff]  ;;  %v318_v57 = vpack.c.bf16 %v314_v47, %v312_v12  ;;  %v3462_v2 = vld [vmem:[#allocation2 + $0x120] ss:$2 sm:$0xff]  ;;  %v3464_v33 = vld [vmem:[#allocation2 + $0x121] ss:$2 sm:$0xff]  ;;  %v342_v12 = vpack.c.bf16 %v338_v53, %v3453_v21  ;;  %v450_v21 = vpack.c.bf16 %v3254_v30, %v3164_v9  ;;  %v755_v47 = vpack.c.bf16 %v748_v7, %v747_v1 }
  0x53   :  { %v294_v60 = vpack.c.bf16 %v290_v52, %v288_v20  ;;  %v3468_v14 = vld [vmem:[#allocation2 + $0x150] ss:$2 sm:$0xff]  ;;  %v3470_v15 = vld [vmem:[#allocation2 + $0x151] ss:$2 sm:$0xff]  ;;  %v657_v17 = vmax.f32 %v625_v54, 0.0  ;;  %v658_v18 = vmax.f32 %v626_v62, 0.0  ;;  %v428_v32 = vpack.c.bf16 %v3392_v56, %v3366_v26 }
  0x54   :  { %v3472_v16 = vld [vmem:[#allocation2 + $0x122] ss:$2 sm:$0xff]  ;;  %v3474_v13 = vld [vmem:[#allocation2 + $0x152] ss:$2 sm:$0xff]  ;;  %1564 = vmatprep.mubr.bf16.mxu0 %v318_v57  ;;  %v385_v22 = vld [vmem:[#allocation2 + $0x169] ss:$2 sm:$0xff]  ;;  %v476_v9 = vpack.c.bf16 %v3464_v33, %v3377_v43  ;;  %v3823_v41 = vpack.c.bf16 %v3368_v27, %v3256_v31  ;;  %v452_v35 = vpack.c.bf16 %v3462_v2, %v3370_v34 }
  0x55   :  { %v359_v58 = vld [vmem:[#allocation2 + $0x138] ss:$2 sm:$0xff]  ;;  %v383_v59 = vld [vmem:[#allocation2 + $0x139] ss:$2 sm:$0xff]  ;;  %v361_v20 = vld [vmem:[#allocation2 + $0x168] ss:$2 sm:$0xff]  ;;  %1565 = vmatmul.mubr.bf16.gmra.mrb[12].mxu0 %v294_v60 }
  0x56   :  { %v3476_v8 = vld [vmem:[#allocation2 + $0x13a] ss:$2 sm:$0xff]  ;;  %v3481_v23 = vld [vmem:[#allocation2 + $0x16a] ss:$2 sm:$0xff]  ;;  %689 = vst [vmem:[#allocation2 + $0x121] sm:$0xff] %v657_v17  ;;  %690 = vst [vmem:[#allocation2 + $0x129] sm:$0xff] %v658_v18  ;;  %v365_v48 = vpack.c.bf16 %v361_v20, %v359_v58  ;;  %1572 = vmatprep.mubr.bf16.mxu0 %v723_v63  ;;  %v3505_v63 = vpack.c.bf16 %v3390_v55, %v3364_v25  ;;  %v3511_v28 = vpack.c.bf16 %v385_v22, %v383_v59 }
  0x57   :  { %691 = vst [vmem:[#allocation2 + $0x139] sm:$0xff] %v659_v19  ;;  %692 = vst [vmem:[#allocation2 + $0x141] sm:$0xff] %v660_v37  ;;  %v661_v19 = vmax.f32 %v629_v0, 0.0  ;;  %v662_v37 = vmax.f32 %v630_v6, 0.0  ;;  %v699_v52 = vld [vmem:[#allocation2] ss:$2 sm:$0xff]  ;;  %v429_v49 = vpack.c.bf16 %v3481_v23, %v3476_v8 }
  0x58   :  { %695 = vst [vmem:[#allocation2 + $0x169] sm:$0xff] %v663_v38  ;;  %696 = vst [vmem:[#allocation2 + $0x171] sm:$0xff] %v664_v42  ;;  %v700_v53 = vld [vmem:[#allocation2 + $0x30] ss:$2 sm:$0xff]  ;;  %v717_v54 = vld [vmem:[#allocation2 + $0x61] ss:$2 sm:$0xff]  ;;  %1661 = vmatprep.mubr.bf16.mxu1 %v365_v48 }
  0x59   :  { %v718_v62 = vld [vmem:[#allocation2 + $0x91] ss:$2 sm:$0xff]  ;;  %693 = vst [vmem:[#allocation2 + $0x151] sm:$0xff] %v661_v19  ;;  %694 = vst [vmem:[#allocation2 + $0x159] sm:$0xff] %v662_v37  ;;  %v731_v38 = vld [vmem:[#allocation2 + $0x2] ss:$2 sm:$0xff]  ;;  %1662 = vmatmul.mubr.bf16.gmra.mrb[12].mxu1 %v342_v12  ;;  %v707_v1 = vpack.c.bf16 %v700_v53, %v699_v52 }
  0x5a   :  { %v732_v42 = vld [vmem:[#allocation2 + $0x32] ss:$2 sm:$0xff]  ;;  %2480 = vst [vmem:[%s3819_s7 + $0x8] sm:$0xff] %v3499_v61   ;;  %1669 = vmatprep.mubr.bf16.mxu1 %v755_v47  ;;  %v724_v40 = vpack.c.bf16 %v718_v62, %v717_v54  ;;  %2481 = vst [vmem:[%s3819_s7 + $0x10] sm:$0xff] %v3505_v63   ;;  %v719_v12 = vld [vmem:[#allocation2 + $0xc1] ss:$2 sm:$0xff] }
  0x5b   :  { %v749_v57 = vld [vmem:[#allocation2 + $0x78] ss:$2 sm:$0xff]  ;;  %v750_v60 = vld [vmem:[#allocation2 + $0xa8] ss:$2 sm:$0xff]  ;;  %2482 = vst [vmem:[%s3819_s7 + $0x18] sm:$0xff] %v3511_v28   ;;  %v739_v7 = vpack.c.bf16 %v732_v42, %v731_v38 }
  0x5c   :  { %v2890_v6 = vld [vmem:[%s3815_s1 + $0x1b0] sm:$0xff]   ;;  %v701_v17 = vld [vmem:[#allocation2 + $0x60] ss:$2 sm:$0xff]  ;;  %v756_v58 = vpack.c.bf16 %v750_v60, %v749_v57  ;;  %v2891_v59 = vld [vmem:[%s3815_s1 + $0x178] sm:$0xff]  }
  0x5d   :  { %1573 = vmatmul.mubr.bf16.gmra.mrb[16].mxu0 %v707_v1  ;;  %v702_v18 = vld [vmem:[#allocation2 + $0x90] ss:$2 sm:$0xff]  ;;  %2715 = vmatpush3.bf16.msra.mxu1 %v2890_v6  ;;  %v720_v20 = vld [vmem:[#allocation2 + $0xf1] ss:$2 sm:$0xff]  ;;  %v3545_v38 = vld [vmem:[%s3815_s1 + $0x200] sm:$0xff]  }
  0x5e   :  { %1580 = vmatprep.mubr.bf16.mxu0 %v724_v40  ;;  %v733_v22 = vld [vmem:[#allocation2 + $0x62] ss:$2 sm:$0xff]  ;;  %v734_v48 = vld [vmem:[#allocation2 + $0x92] ss:$2 sm:$0xff]  ;;  %2652 = vmatprep.subr.bf16.mxu0 %v2891_v59  ;;  %v708_v37 = vpack.c.bf16 %v702_v18, %v701_v17  ;;  %v725_v54 = vpack.c.bf16 %v720_v20, %v719_v12  ;;  %v721_v57 = vld [vmem:[#allocation2 + $0x121] ss:$2 sm:$0xff] }
  0x5f   :  { %v2892_v19 = vld [vmem:[%s3815_s1 + $0x1f8] sm:$0xff]   ;;  %v752_v52 = vld [vmem:[#allocation2 + $0x108] ss:$2 sm:$0xff]  ;;  %v740_v60 = vpack.c.bf16 %v734_v48, %v733_v22  ;;  %v2903_v20 = vld [vmem:[%s3817_s2] ss:$0 sm:$0xff] }
  0x60   :  { %v751_v47 = vld [vmem:[#allocation2 + $0xd8] ss:$2 sm:$0xff]  ;;  %2716 = vmatprep.subr.bf16.mxu1 %v2892_v19  ;;  %v722_v40 = vld [vmem:[#allocation2 + $0x151] ss:$2 sm:$0xff]  ;;  %v2896_v4 = vld [vmem:[%s3815_s1 + $0x208] sm:$0xff]  }
  0x61   :  { %1670 = vmatmul.mubr.bf16.gmra.mrb[16].mxu1 %v739_v7  ;;  %v2893_v53 = vld [vmem:[%s3815_s1 + $0x138] sm:$0xff]   ;;  %v703_v42 = vld [vmem:[#allocation2 + $0xc0] ss:$2 sm:$0xff]  ;;  %v757_v7 = vpack.c.bf16 %v752_v52, %v751_v47  ;;  %v726_v52 = vpack.c.bf16 %v722_v40, %v721_v57  ;;  %v766_v40 = vld [vmem:[#allocation2 + $0xa9] ss:$2 sm:$0xff] }
  0x62   :  { %1677 = vmatprep.mubr.bf16.mxu1 %v756_v58  ;;  %v2894_v62 = vld [vmem:[%s3815_s1 + $0x1b8] sm:$0xff]   ;;  %2653 = vmatpush3.bf16.msra.mxu0 %v2893_v53  ;;  %v735_v47 = vld [vmem:[#allocation2 + $0xc2] ss:$2 sm:$0xff] }
  0x63   :  { %v704_v1 = vld [vmem:[#allocation2 + $0xf0] ss:$2 sm:$0xff]  ;;  %2717 = vmatpush3.bf16.msra.mxu1 %v2894_v62  ;;  %2782 = vmatprep.subr.bf16.mxu0 %v3545_v38  ;;  %v763_v19 = vld [vmem:[#allocation2 + $0x19] ss:$2 sm:$0xff]  ;;  %v705_v57 = vld [vmem:[#allocation2 + $0x120] ss:$2 sm:$0xff] }
  0x64   :  { %v2479_v6 = vld [vmem:[%s3816_s0 + $0x78] sm:$0xff]   ;;  %2814 = vmatprep.subr.bf16.mxu1 %v3545_v38  ;;  %v2897_v10 = vld [vmem:[%s3815_s1 + $0x210] sm:$0xff]   ;;  %v2899_v30 = vld [vmem:[%s3815_s1 + $0x220] sm:$0xff]  }
  0x65   :  { %1581 = vmatmul.mubr.bf16.gmra.mrb[20].mxu0 %v708_v37  ;;  %v2319_v17 = vunpack.c.l.bf16 %v2479_v6  ;;  %v2320_v18 = vunpack.c.h.bf16 %v2479_v6  ;;  %v2498_v58 = vld [vmem:[%s3816_s0 + $0xf8] sm:$0xff]   ;;  %v709_v37 = vpack.c.bf16 %v704_v1, %v703_v42  ;;  %v2904_v6 = vld [vmem:[%s3818_s3] ss:$0 sm:$0xff]  ;;  %v2900_v26 = vld [vmem:[%s3815_s1 + $0x228] sm:$0xff]  }
  0x66   :  { %1588 = vmatprep.mubr.bf16.mxu0 %v725_v54  ;;  %v2403_v59 = vunpack.c.l.bf16 %v2498_v58  ;;  %v2404_v12 = vunpack.c.h.bf16 %v2498_v58  ;;  %v764_v54 = vld [vmem:[#allocation2 + $0x49] ss:$2 sm:$0xff]  ;;  %v736_v62 = vld [vmem:[#allocation2 + $0xf2] ss:$2 sm:$0xff]  ;;  %v765_v42 = vld [vmem:[#allocation2 + $0x79] ss:$2 sm:$0xff] }
  0x67   :  { %v172_v22 = vmul.f32 %v2903_v20, %v2319_v17  ;;  %v173_v48 = vmul.f32 %v2903_v20, %v2320_v18  ;;  %v3561_v25 = vpack.c.bf16 %v764_v54, %v763_v19  ;;  %v753_v17 = vld [vmem:[#allocation2 + $0x138] ss:$2 sm:$0xff]  ;;  %v754_v18 = vld [vmem:[#allocation2 + $0x168] ss:$2 sm:$0xff]  ;;  %v741_v1 = vpack.c.bf16 %v736_v62, %v735_v47  ;;  %v768_v47 = vld [vmem:[#allocation2 + $0x109] ss:$2 sm:$0xff] }
  0x68   :  { %v601_v53 = vmul.f32 %v2903_v20, %v2403_v59  ;;  %v602_v55 = vmul.f32 %v2903_v20, %v2404_v12  ;;  %v706_v59 = vld [vmem:[#allocation2 + $0x150] ss:$2 sm:$0xff]  ;;  %v828_v8 = vld [vmem:[#allocation2 + $0x31] ss:$2 sm:$0xff] }
  0x69   :  { %1678 = vmatmul.mubr.bf16.gmra.mrb[20].mxu1 %v740_v60  ;;  %v210_v58 = vadd.f32 %v2904_v6, %v172_v22  ;;  %v211_v0 = vadd.f32 %v2904_v6, %v173_v48  ;;  %2499 = vst [vmem:[%s3819_s7 + $0x20] sm:$0xff] %v3561_v25   ;;  %v3567_v22 = vpack.c.bf16 %v766_v40, %v765_v42  ;;  %v737_v19 = vld [vmem:[#allocation2 + $0x122] ss:$2 sm:$0xff]  ;;  %v2898_v29 = vld [vmem:[%s3815_s1 + $0x218] sm:$0xff]  }
  0x6a   :  { %1685 = vmatprep.mubr.bf16.mxu1 %v757_v7  ;;  %v758_v7 = vpack.c.bf16 %v754_v18, %v753_v17  ;;  %v633_v12 = vadd.f32 %v2904_v6, %v601_v53  ;;  %v634_v20 = vadd.f32 %v2904_v6, %v602_v55  ;;  %v710_v48 = vpack.c.bf16 %v706_v59, %v705_v57  ;;  %v769_v55 = vld [vmem:[#allocation2 + $0x139] ss:$2 sm:$0xff]  ;;  %v770_v53 = vld [vmem:[#allocation2 + $0x169] ss:$2 sm:$0xff]  ;;  %v796_v27 = vld [vmem:[#allocation2 + $0x1a] ss:$2 sm:$0xff] }
  0x6b   :  { %v242_v3 = vmax.f32 %v210_v58, 0.0  ;;  %v243_v60 = vmax.f32 %v211_v0, 0.0  ;;  %2500 = vst [vmem:[%s3819_s7 + $0x28] sm:$0xff] %v3567_v22   ;;  %v767_v0 = vld [vmem:[#allocation2 + $0xd9] ss:$2 sm:$0xff]  ;;  %v3583_v18 = vpack.c.bf16 %v770_v53, %v769_v55  ;;  %v2901_v56 = vld [vmem:[%s3815_s1 + $0x230] sm:$0xff]  }
  0x6c   :  { %v666_v54 = vmax.f32 %v634_v20, 0.0  ;;  %v797_v43 = vld [vmem:[#allocation2 + $0x4a] ss:$2 sm:$0xff]  ;;  %v798_v23 = vld [vmem:[#allocation2 + $0x7a] ss:$2 sm:$0xff] }
  0x6d   :  { %1589 = vmatmul.mubr.bf16.gmra.mrb[24].mxu0 %v709_v37  ;;  %274 = vst [vmem:[#allocation2 + $0x181] sm:$0xff] %v242_v3  ;;  %275 = vst [vmem:[#allocation2 + $0x189] sm:$0xff] %v243_v60  ;;  %v738_v37 = vld [vmem:[#allocation2 + $0x152] ss:$2 sm:$0xff]  ;;  %v3573_v3 = vpack.c.bf16 %v768_v47, %v767_v0  ;;  %v804_v33 = vpack.c.bf16 %v797_v43, %v796_v27  ;;  %v833_v59 = vld [vmem:[#allocation2 + $0x121] ss:$2 sm:$0xff] }
  0x6e   :  { %1596 = vmatprep.mubr.bf16.mxu0 %v726_v52  ;;  %v665_v52 = vmax.f32 %v633_v12, 0.0  ;;  %v742_v62 = vpack.c.bf16 %v738_v37, %v737_v19  ;;  %2502 = vst [vmem:[%s3819_s7 + $0x38] sm:$0xff] %v3583_v18   ;;  %v2902_v34 = vld [vmem:[%s3815_s1 + $0x238] sm:$0xff]   ;;  %v815_v57 = vld [vmem:[#allocation2 + $0xc0] ss:$2 sm:$0xff] }
  0x6f   :  { %2501 = vst [vmem:[%s3819_s7 + $0x30] sm:$0xff] %v3573_v3   ;;  %v801_v42 = vld [vmem:[#allocation2 + $0x10a] ss:$2 sm:$0xff]  ;;  %v802_v0 = vld [vmem:[#allocation2 + $0x13a] ss:$2 sm:$0xff] }
  0x70   :  { %v817_v19 = vld [vmem:[#allocation2 + $0x120] ss:$2 sm:$0xff]  ;;  %v834_v47 = vld [vmem:[#allocation2 + $0x151] ss:$2 sm:$0xff] }
  0x71   :  { %1686 = vmatmul.mubr.bf16.gmra.mrb[24].mxu1 %v741_v1  ;;  %v814_v1 = vld [vmem:[#allocation2 + $0x90] ss:$2 sm:$0xff] }
  0x72   :  { %1693 = vmatprep.mubr.bf16.mxu1 %v758_v7  ;;  %v832_v7 = vld [vmem:[#allocation2 + $0xf1] ss:$2 sm:$0xff]  ;;  %v821_v12 = vpack.c.bf16 %v815_v57, %v814_v1 }
  0x73   :  { %v838_v20 = vpack.c.bf16 %v833_v59, %v832_v7 }
  0x74   :  { %v473_v6 = vld [vmem:[#allocation2 + $0x181] ss:$2 sm:$0xff]  ;;  %v3579_v58 = vld [vmem:[#allocation2 + $0x180] ss:$2 sm:$0xff] }
  0x75   :  { %1597 = vmatmul.mubr.bf16.gmra.mrb[28].mxu0 %v710_v48  ;;  %v3581_v17 = vld [vmem:[#allocation2 + $0x182] ss:$2 sm:$0xff]  ;;  %v477_v31 = vpack.c.bf16 %v473_v6, %v3470_v15  ;;  %v453_v2 = vpack.c.bf16 %v3579_v58, %v3468_v14 }
  0x76   :  { %1734 = vmatprep.mubr.bf16.mxu0 %v426_v39  ;;  %697 = vst [vmem:[#allocation2 + $0x181] sm:$0xff] %v665_v52  ;;  %698 = vst [vmem:[#allocation2 + $0x189] sm:$0xff] %v666_v54  ;;  %v501_v60 = vpack.c.bf16 %v3581_v17, %v3474_v13  ;;  %v829_v39 = vld [vmem:[#allocation2 + $0x61] ss:$2 sm:$0xff]  ;;  %v816_v48 = vld [vmem:[#allocation2 + $0xf0] ss:$2 sm:$0xff] }
  0x77   :  { %v836_v15 = vpack.c.bf16 %v829_v39, %v828_v8  ;;  %v822_v54 = vpack.c.bf16 %v817_v19, %v816_v48  ;;  %v845_v6 = vld [vmem:[#allocation2 + $0x62] ss:$2 sm:$0xff] }
  0x79   :  { %1694 = vmatmul.mubr.bf16.gmra.mrb[28].mxu1 %v742_v62  ;;  %v844_v62 = vld [vmem:[#allocation2 + $0x32] ss:$2 sm:$0xff] }
  0x7a   :  { %1831 = vmatprep.mubr.bf16.mxu1 %v474_v24  ;;  %v799_v24 = vld [vmem:[#allocation2 + $0xaa] ss:$2 sm:$0xff] }
  0x7d   :  { %1735 = vmatmul.mubr.bf16.vlgmr.msra.gmra.mrb[32].mxu0 %v3487_v36  ;;  %v812_v36 = vld [vmem:[#allocation2 + $0x30] ss:$2 sm:$0xff]  ;;  %v835_v52 = vld [vmem:[#allocation2 + $0x181] ss:$2 sm:$0xff]  ;;  %v819_v53 = vld [vmem:[#allocation2 + $0x180] ss:$2 sm:$0xff] }
  0x7e   :  { %2783 = vmatpush3.bf16.msra.mxu0 %v3545_v38  ;;  %1742 = vmatprep.mubr.bf16.mxu0 %v427_v46  ;;  %v805_v46 = vpack.c.bf16 %v799_v24, %v798_v23  ;;  %v839_v55 = vpack.c.bf16 %v835_v52, %v834_v47 }
  0x7f   :  { %2784 = vmatprep.subr.bf16.mxu0 %v2896_v4 }
  0x81   :  { %1832 = vmatmul.mubr.bf16.vlgmr.msra.gmra.mrb[32].mxu1 %v450_v21  ;;  %v813_v21 = vld [vmem:[#allocation2 + $0x60] ss:$2 sm:$0xff] }
  0x82   :  { %2822 = vmatpush3.bf16.msra.mxu1 %v3545_v38  ;;  %1839 = vmatprep.mubr.bf16.mxu1 %v475_v5  ;;  %v820_v14 = vpack.c.bf16 %v813_v21, %v812_v36  ;;  %v800_v38 = vld [vmem:[#allocation2 + $0xda] ss:$2 sm:$0xff]  ;;  %v852_v5 = vpack.c.bf16 %v845_v6, %v844_v62 }
  0x83   :  { %2815 = vmatprep.subr.bf16.mxu1 %v2896_v4  ;;  %2785 = vmatpush3.bf16.msra.mxu0 %v2896_v4  ;;  %v806_v40 = vpack.c.bf16 %v801_v42, %v800_v38 }
  0x84   :  { %2786 = vmatprep.subr.bf16.mxu0 %v2897_v10 }
  0x85   :  { %1743 = vmatmul.mubr.bf16.gmra.mrb[36].mxu0 %v3499_v61  ;;  %v830_v61 = vld [vmem:[#allocation2 + $0x91] ss:$2 sm:$0xff] }
  0x86   :  { %2823 = vmatpush3.bf16.msra.mxu1 %v2896_v4  ;;  %1750 = vmatprep.mubr.bf16.mxu0 %v428_v32  ;;  %v3824_v4 = vpack.c.bf16 %v3279_v50, %v3168_v11  ;;  %v848_v32 = vld [vmem:[#allocation2 + $0xf2] ss:$2 sm:$0xff]  ;;  %v851_v50 = vld [vmem:[#allocation2 + $0x182] ss:$2 sm:$0xff] }
  0x87   :  { %2816 = vmatprep.subr.bf16.mxu1 %v2897_v10  ;;  %2787 = vmatpush3.bf16.msra.mxu0 %v2897_v10  ;;  %v850_v11 = vld [vmem:[#allocation2 + $0x152] ss:$2 sm:$0xff] }
  0x88   :  { %2788 = vmatprep.subr.bf16.mxu0 %v2898_v29 }
  0x89   :  { %1840 = vmatmul.mubr.bf16.gmra.mrb[36].mxu1 %v3823_v41 }
  0x8a   :  { %1847 = vmatprep.mubr.bf16.mxu1 %v476_v9  ;;  %2824 = vmatpush3.bf16.msra.mxu1 %v2897_v10  ;;  %v847_v10 = vld [vmem:[#allocation2 + $0xc2] ss:$2 sm:$0xff]  ;;  %v3825_v9 = vpack.c.bf16 %v3379_v44, %v3281_v51 }
  0x8b   :  { %2817 = vmatprep.subr.bf16.mxu1 %v2898_v29  ;;  %2789 = vmatpush3.bf16.msra.mxu0 %v2898_v29 }
  0x8c   :  { %2790 = vmatprep.subr.bf16.mxu0 %v2899_v30 }
  0x8d   :  { %1751 = vmatmul.mubr.bf16.gmra.mrb[40].mxu0 %v3505_v63  ;;  %v831_v63 = vld [vmem:[#allocation2 + $0xc1] ss:$2 sm:$0xff] }
  0x8e   :  { %1758 = vmatprep.mubr.bf16.mxu0 %v429_v49  ;;  %2825 = vmatpush3.bf16.msra.mxu1 %v2898_v29  ;;  %v849_v29 = vld [vmem:[#allocation2 + $0x122] ss:$2 sm:$0xff]  ;;  %v855_v49 = vpack.c.bf16 %v851_v50, %v850_v11 }
  0x8f   :  { %2818 = vmatprep.subr.bf16.mxu1 %v2899_v30  ;;  %2791 = vmatpush3.bf16.msra.mxu0 %v2899_v30  ;;  %v854_v41 = vpack.c.bf16 %v849_v29, %v848_v32 }
  0x90   :  { %2792 = vmatprep.subr.bf16.mxu0 %v2900_v26 }
  0x91   :  { %1848 = vmatmul.mubr.bf16.gmra.mrb[40].mxu1 %v452_v35 }
  0x92   :  { %1855 = vmatprep.mubr.bf16.mxu1 %v477_v31  ;;  %2826 = vmatpush3.bf16.msra.mxu1 %v2899_v30 }
  0x93   :  { %2819 = vmatprep.subr.bf16.mxu1 %v2900_v26  ;;  %2793 = vmatpush3.bf16.msra.mxu0 %v2900_v26 }
  0x94   :  { %2794 = vmatprep.subr.bf16.mxu0 %v2901_v56 }
  0x95   :  { %1759 = vmatmul.mubr.bf16.gmra.mrb[44].mxu0 %v3511_v28  ;;  %v837_v28 = vpack.c.bf16 %v831_v63, %v830_v61 }
  0x96   :  { %1766 = vmatprep.mubr.bf16.mxu0 %v804_v33  ;;  %2827 = vmatpush3.bf16.msra.mxu1 %v2900_v26 }
  0x97   :  { %2820 = vmatprep.subr.bf16.mxu1 %v2901_v56  ;;  %2795 = vmatpush3.bf16.msra.mxu0 %v2901_v56 }
  0x98   :  { %2796 = vmatprep.subr.bf16.mxu0 %v2902_v34 }
  0x99   :  { %1856 = vmatmul.mubr.bf16.gmra.mrb[44].mxu1 %v453_v2 }
  0x9a   :  { %1863 = vmatprep.mubr.bf16.mxu1 %v836_v15  ;;  %2828 = vmatpush3.bf16.msra.mxu1 %v2901_v56 }
  0x9b   :  { %2821 = vmatprep.subr.bf16.mxu1 %v2902_v34  ;;  %2797 = vmatpush3.bf16.msra.mxu0 %v2902_v34 }
  0x9d   :  { %1767 = vmatmul.mubr.bf16.gmra.mrb[48].mxu0 %v3561_v25  ;;  %v803_v25 = vld [vmem:[#allocation2 + $0x16a] ss:$2 sm:$0xff] }
  0x9e   :  { %1774 = vmatprep.mubr.bf16.mxu0 %v805_v46  ;;  %2829 = vmatpush3.bf16.msra.mxu1 %v2902_v34  ;;  %v807_v37 = vpack.c.bf16 %v803_v25, %v802_v0 }
  0xa1   :  { %1864 = vmatmul.mubr.bf16.gmra.mrb[48].mxu1 %v820_v14 }
  0xa2   :  { %1871 = vmatprep.mubr.bf16.mxu1 %v837_v28 }
  0xa5   :  { %1775 = vmatmul.mubr.bf16.gmra.mrb[52].mxu0 %v3567_v22  ;;  %v818_v22 = vld [vmem:[#allocation2 + $0x150] ss:$2 sm:$0xff] }
  0xa6   :  { %1782 = vmatprep.mubr.bf16.mxu0 %v806_v40  ;;  %v823_v58 = vpack.c.bf16 %v819_v53, %v818_v22 }
  0xa9   :  { %1872 = vmatmul.mubr.bf16.gmra.mrb[52].mxu1 %v821_v12 }
  0xaa   :  { %1879 = vmatprep.mubr.bf16.mxu1 %v838_v20 }
  0xad   :  { %1783 = vmatmul.mubr.bf16.gmra.mrb[56].mxu0 %v3573_v3  ;;  %v846_v3 = vld [vmem:[#allocation2 + $0x92] ss:$2 sm:$0xff] }
  0xae   :  { %1790 = vmatprep.mubr.bf16.mxu0 %v807_v37  ;;  %v853_v30 = vpack.c.bf16 %v847_v10, %v846_v3 }
  0xb1   :  { %1880 = vmatmul.mubr.bf16.gmra.mrb[56].mxu1 %v822_v54 }
  0xb2   :  { %1887 = vmatprep.mubr.bf16.mxu1 %v839_v55 }
  0xb5   :  { %1791 = vmatmul.mubr.bf16.gmra.mrb[60].mxu0 %v3583_v18  ;;  %v3826_v18 = vpack.c.bf16 %v3472_v16, %v3381_v45 }
  0xb6   :  { %2798 = vmatprep.mubr.bf16.mxu0 %v3824_v4 }
  0xb9   :  { %1888 = vmatmul.mubr.bf16.gmra.mrb[60].mxu1 %v823_v58 }
  0xba   :  { %2806 = vmatprep.mubr.bf16.mxu1 %v852_v5 }
  0xbd   :  { %2799 = vmatmul.mubr.bf16.vlgmr.msra.gmra.mrb[64].mxu0 %v3825_v9 }
  0xbe   :  { %2802 = vmatprep.mubr.bf16.mxu0 %v3826_v18 }
  0xc1   :  { %2807 = vmatmul.mubr.bf16.vlgmr.msra.gmra.mrb[64].mxu1 %v853_v30 }
  0xc2   :  { %2810 = vmatprep.mubr.bf16.mxu1 %v854_v41 }
  0xc5   :  { %2803 = vmatmul.mubr.bf16.gmra.mrb[68].mxu0 %v501_v60 }
  0xc9   :  { %2811 = vmatmul.mubr.bf16.gmra.mrb[68].mxu1 %v855_v49 }
  0xf6   :  { %v2526_v26 = vpop.f32.mrb[0].mxu0 }
  0xf7   :  { %v2527_v51 = vpop.f32.mrb[1].mxu0 }
  0xf8   :  { %v2528_v44 = vadd.f32 %v2527_v51, %v2526_v26  ;;  %v2529_v27 = vpop.f32.mrb[2].mxu0 }
  0xf9   :  { %v2590_v35 = vpop.f32.mrb[0].mxu1  ;;  %v2530_v16 = vpop.f32.mrb[3].mxu0 }
  0xfa   :  { %v2591_v31 = vpop.f32.mrb[1].mxu1  ;;  %v2531_v56 = vadd.f32 %v2530_v16, %v2529_v27 }
  0xfb   :  { %v2592_v43 = vadd.f32 %v2591_v31, %v2590_v35  ;;  %v2593_v45 = vpop.f32.mrb[2].mxu1 }
  0xfc   :  { %v2594_v33 = vpop.f32.mrb[3].mxu1 }
  0xfd   :  { %v3662_v8 = vadd.f32 %v2592_v43, %v2528_v44  ;;  %v2595_v39 = vadd.f32 %v2594_v33, %v2593_v45 }
  0xff   :  { %v3664_v34 = vadd.f32 %v2595_v39, %v2531_v56 }
 0x106   :  { %v2532_v13 = vpop.f32.mrb[4].mxu0 }
 0x107   :  { %v2533_v17 = vpop.f32.mrb[5].mxu0 }
 0x108   :  { %v2534_v60 = vadd.f32 %v2533_v17, %v2532_v13  ;;  %v2535_v2 = vpop.f32.mrb[6].mxu0  ;;  %v2596_v15 = vpop.f32.mrb[4].mxu1 }
 0x109   :  { %v2536_v23 = vpop.f32.mrb[7].mxu0  ;;  %v2597_v24 = vpop.f32.mrb[5].mxu1 }
 0x10a   :  { %v2537_v36 = vadd.f32 %v2536_v23, %v2535_v2  ;;  %v2598_v21 = vadd.f32 %v2597_v24, %v2596_v15  ;;  %v2599_v46 = vpop.f32.mrb[6].mxu1 }
 0x10b   :  { %v2600_v61 = vpop.f32.mrb[7].mxu1 }
 0x10c   :  { %v3666_v63 = vadd.f32 %v2598_v21, %v2534_v60  ;;  %v2601_v14 = vadd.f32 %v2600_v61, %v2599_v46 }
 0x10e   :  { %v3668_v28 = vadd.f32 %v2601_v14, %v2537_v36 }
 0x117   :  { %v2538_v38 = vpop.f32.mrb[8].mxu0 }
 0x118   :  { %v2539_v42 = vpop.f32.mrb[9].mxu0 }
 0x119   :  { %v2540_v1 = vadd.f32 %v2539_v42, %v2538_v38  ;;  %v2541_v57 = vpop.f32.mrb[10].mxu0 }
 0x11a   :  { %v2542_v40 = vpop.f32.mrb[11].mxu0 }
 0x11b   :  { %v2543_v7 = vadd.f32 %v2542_v40, %v2541_v57 }
 0x11d   :  { %v2602_v59 = vpop.f32.mrb[8].mxu1 }
 0x11e   :  { %v2603_v12 = vpop.f32.mrb[9].mxu1 }
 0x11f   :  { %v2604_v20 = vadd.f32 %v2603_v12, %v2602_v59  ;;  %v2605_v0 = vpop.f32.mrb[10].mxu1 }
 0x120   :  { %v2606_v25 = vpop.f32.mrb[11].mxu1 }
 0x121   :  { %v3670_v48 = vadd.f32 %v2604_v20, %v2540_v1  ;;  %v2607_v19 = vadd.f32 %v2606_v25, %v2605_v0 }
 0x123   :  { %v3672_v37 = vadd.f32 %v2607_v19, %v2543_v7 }
 0x128   :  { %v2544_v47 = vpop.f32.mrb[12].mxu0 }
 0x129   :  { %v2545_v52 = vpop.f32.mrb[13].mxu0 }
 0x12a   :  { %v2546_v54 = vadd.f32 %v2545_v52, %v2544_v47  ;;  %v2547_v55 = vpop.f32.mrb[14].mxu0 }
 0x12b   :  { %v2548_v22 = vpop.f32.mrb[15].mxu0 }
 0x12c   :  { %v2608_v53 = vpop.f32.mrb[12].mxu1  ;;  %v2549_v62 = vadd.f32 %v2548_v22, %v2547_v55 }
 0x12d   :  { %v2609_v6 = vpop.f32.mrb[13].mxu1 }
 0x12e   :  { %v2610_v58 = vadd.f32 %v2609_v6, %v2608_v53  ;;  %v2611_v4 = vpop.f32.mrb[14].mxu1 }
 0x12f   :  { %v2612_v5 = vpop.f32.mrb[15].mxu1 }
 0x130   :  { %v3674_v3 = vadd.f32 %v2610_v58, %v2546_v54  ;;  %v2613_v10 = vadd.f32 %v2612_v5, %v2611_v4  ;;  %v2550_v32 = vpop.f32.mrb[16].mxu0 }
 0x131   :  { %v2551_v29 = vpop.f32.mrb[17].mxu0 }
 0x132   :  { %v3676_v9 = vadd.f32 %v2613_v10, %v2549_v62  ;;  %v2552_v30 = vadd.f32 %v2551_v29, %v2550_v32  ;;  %v2553_v18 = vpop.f32.mrb[18].mxu0 }
 0x133   :  { %v2554_v41 = vpop.f32.mrb[19].mxu0 }
 0x134   :  { %v2614_v11 = vpop.f32.mrb[16].mxu1  ;;  %v2555_v50 = vadd.f32 %v2554_v41, %v2553_v18 }
 0x135   :  { %v2615_v49 = vpop.f32.mrb[17].mxu1 }
 0x136   :  { %v2616_v26 = vadd.f32 %v2615_v49, %v2614_v11  ;;  %v2617_v35 = vpop.f32.mrb[18].mxu1 }
 0x137   :  { %v2618_v51 = vpop.f32.mrb[19].mxu1 }
 0x138   :  { %v3678_v44 = vadd.f32 %v2616_v26, %v2552_v30  ;;  %v2619_v31 = vadd.f32 %v2618_v51, %v2617_v35  ;;  %v2556_v27 = vpop.f32.mrb[20].mxu0 }
 0x139   :  { %v2557_v43 = vpop.f32.mrb[21].mxu0 }
 0x13a   :  { %v3680_v45 = vadd.f32 %v2619_v31, %v2555_v50  ;;  %v2558_v16 = vadd.f32 %v2557_v43, %v2556_v27  ;;  %v2559_v56 = vpop.f32.mrb[22].mxu0 }
 0x13b   :  { %v2560_v33 = vpop.f32.mrb[23].mxu0 }
 0x13c   :  { %v2620_v39 = vpop.f32.mrb[20].mxu1  ;;  %v2561_v13 = vadd.f32 %v2560_v33, %v2559_v56 }
 0x13d   :  { %v2621_v17 = vpop.f32.mrb[21].mxu1 }
 0x13e   :  { %v2622_v60 = vadd.f32 %v2621_v17, %v2620_v39  ;;  %v2623_v2 = vpop.f32.mrb[22].mxu1 }
 0x13f   :  { %v2624_v15 = vpop.f32.mrb[23].mxu1 }
 0x140   :  { %v3682_v23 = vadd.f32 %v2622_v60, %v2558_v16  ;;  %v2625_v24 = vadd.f32 %v2624_v15, %v2623_v2  ;;  %v2562_v36 = vpop.f32.mrb[24].mxu0 }
 0x141   :  { %v2563_v21 = vpop.f32.mrb[25].mxu0 }
 0x142   :  { %v3684_v46 = vadd.f32 %v2625_v24, %v2561_v13  ;;  %v2564_v61 = vadd.f32 %v2563_v21, %v2562_v36  ;;  %v2565_v14 = vpop.f32.mrb[26].mxu0 }
 0x143   :  { %v2566_v38 = vpop.f32.mrb[27].mxu0 }
 0x144   :  { %v2626_v42 = vpop.f32.mrb[24].mxu1  ;;  %v2567_v1 = vadd.f32 %v2566_v38, %v2565_v14 }
 0x145   :  { %v2627_v57 = vpop.f32.mrb[25].mxu1 }
 0x146   :  { %v2628_v40 = vadd.f32 %v2627_v57, %v2626_v42  ;;  %v2629_v7 = vpop.f32.mrb[26].mxu1 }
 0x147   :  { %v2630_v59 = vpop.f32.mrb[27].mxu1 }
 0x148   :  { %v3686_v12 = vadd.f32 %v2628_v40, %v2564_v61  ;;  %v2631_v20 = vadd.f32 %v2630_v59, %v2629_v7  ;;  %v2568_v0 = vpop.f32.mrb[28].mxu0 }
 0x149   :  { %v2569_v25 = vpop.f32.mrb[29].mxu0 }
 0x14a   :  { %v3688_v19 = vadd.f32 %v2631_v20, %v2567_v1  ;;  %v2570_v47 = vadd.f32 %v2569_v25, %v2568_v0  ;;  %v2571_v52 = vpop.f32.mrb[30].mxu0 }
 0x14b   :  { %v2572_v54 = vpop.f32.mrb[31].mxu0 }
 0x14c   :  { %v2632_v55 = vpop.f32.mrb[28].mxu1  ;;  %v2573_v22 = vadd.f32 %v2572_v54, %v2571_v52 }
 0x14d   :  { %v2633_v53 = vpop.f32.mrb[29].mxu1 }
 0x14e   :  { %v2634_v62 = vadd.f32 %v2633_v53, %v2632_v55  ;;  %v2635_v6 = vpop.f32.mrb[30].mxu1 }
 0x14f   :  { %v2636_v58 = vpop.f32.mrb[31].mxu1 }
 0x150   :  { %v3690_v4 = vadd.f32 %v2634_v62, %v2570_v47  ;;  %v2637_v5 = vadd.f32 %v2636_v58, %v2635_v6  ;;  %v2654_v10 = vpop.f32.mrb[32].mxu0 }
 0x151   :  { %v2655_v32 = vpop.f32.mrb[33].mxu0 }
 0x152   :  { %v3692_v29 = vadd.f32 %v2637_v5, %v2573_v22  ;;  %v2656_v30 = vadd.f32 %v2655_v32, %v2654_v10  ;;  %v2657_v18 = vpop.f32.mrb[34].mxu0 }
 0x153   :  { %v2658_v41 = vpop.f32.mrb[35].mxu0 }
 0x154   :  { %v2718_v11 = vpop.f32.mrb[32].mxu1  ;;  %v1737_v50 = vadd.f32 %v2656_v30, %v3662_v8  ;;  %v2659_v49 = vadd.f32 %v2658_v41, %v2657_v18 }
 0x155   :  { %v2719_v26 = vpop.f32.mrb[33].mxu1 }
 0x156   :  { %v2720_v35 = vadd.f32 %v2719_v26, %v2718_v11  ;;  %v2721_v51 = vpop.f32.mrb[34].mxu1  ;;  %v1740_v31 = vadd.f32 %v2659_v49, %v3664_v34 }
 0x157   :  { %v2722_v27 = vpop.f32.mrb[35].mxu1 }
 0x158   :  { %v2723_v43 = vadd.f32 %v2722_v27, %v2721_v51  ;;  %v2660_v16 = vpop.f32.mrb[36].mxu0  ;;  %v3696_v56 = vadd.f32 %v2720_v35, %v1737_v50 }
 0x159   :  { %v2661_v33 = vpop.f32.mrb[37].mxu0 }
 0x15a   :  { %v2662_v39 = vadd.f32 %v2661_v33, %v2660_v16  ;;  %v2663_v13 = vpop.f32.mrb[38].mxu0  ;;  %v3698_v17 = vadd.f32 %v2723_v43, %v1740_v31 }
 0x15b   :  { %v2664_v60 = vpop.f32.mrb[39].mxu0 }
 0x15c   :  { %v2724_v2 = vpop.f32.mrb[36].mxu1  ;;  %v1745_v8 = vadd.f32 %v2662_v39, %v3666_v63  ;;  %v2665_v15 = vadd.f32 %v2664_v60, %v2663_v13 }
 0x15d   :  { %v2725_v24 = vpop.f32.mrb[37].mxu1 }
 0x15e   :  { %v2726_v36 = vadd.f32 %v2725_v24, %v2724_v2  ;;  %v2727_v21 = vpop.f32.mrb[38].mxu1  ;;  %v1748_v34 = vadd.f32 %v2665_v15, %v3668_v28 }
 0x15f   :  { %v2728_v61 = vpop.f32.mrb[39].mxu1 }
 0x160   :  { %v2729_v14 = vadd.f32 %v2728_v61, %v2727_v21  ;;  %v2666_v38 = vpop.f32.mrb[40].mxu0  ;;  %v3702_v42 = vadd.f32 %v2726_v36, %v1745_v8 }
 0x161   :  { %v2667_v1 = vpop.f32.mrb[41].mxu0 }
 0x162   :  { %v2668_v57 = vadd.f32 %v2667_v1, %v2666_v38  ;;  %v2669_v40 = vpop.f32.mrb[42].mxu0  ;;  %v3704_v7 = vadd.f32 %v2729_v14, %v1748_v34 }
 0x163   :  { %v2670_v59 = vpop.f32.mrb[43].mxu0 }
 0x164   :  { %v2730_v20 = vpop.f32.mrb[40].mxu1  ;;  %v1753_v63 = vadd.f32 %v2668_v57, %v3670_v48  ;;  %v2671_v0 = vadd.f32 %v2670_v59, %v2669_v40 }
 0x165   :  { %v2731_v25 = vpop.f32.mrb[41].mxu1 }
 0x166   :  { %v2732_v47 = vadd.f32 %v2731_v25, %v2730_v20  ;;  %v2733_v52 = vpop.f32.mrb[42].mxu1  ;;  %v1756_v28 = vadd.f32 %v2671_v0, %v3672_v37 }
 0x167   :  { %v2734_v54 = vpop.f32.mrb[43].mxu1 }
 0x168   :  { %v2735_v55 = vadd.f32 %v2734_v54, %v2733_v52  ;;  %v2672_v22 = vpop.f32.mrb[44].mxu0  ;;  %v3708_v53 = vadd.f32 %v2732_v47, %v1753_v63 }
 0x169   :  { %v2673_v62 = vpop.f32.mrb[45].mxu0 }
 0x16a   :  { %v2674_v6 = vadd.f32 %v2673_v62, %v2672_v22  ;;  %v2675_v58 = vpop.f32.mrb[46].mxu0  ;;  %v3710_v5 = vadd.f32 %v2735_v55, %v1756_v28 }
 0x16b   :  { %v2676_v10 = vpop.f32.mrb[47].mxu0 }
 0x16c   :  { %v2736_v32 = vpop.f32.mrb[44].mxu1  ;;  %v1761_v48 = vadd.f32 %v2674_v6, %v3674_v3  ;;  %v2677_v30 = vadd.f32 %v2676_v10, %v2675_v58 }
 0x16d   :  { %v2737_v18 = vpop.f32.mrb[45].mxu1 }
 0x16e   :  { %v2738_v41 = vadd.f32 %v2737_v18, %v2736_v32  ;;  %v2739_v11 = vpop.f32.mrb[46].mxu1  ;;  %v1764_v37 = vadd.f32 %v2677_v30, %v3676_v9 }
 0x16f   :  { %v2740_v50 = vpop.f32.mrb[47].mxu1 }
 0x170   :  { %v2741_v49 = vadd.f32 %v2740_v50, %v2739_v11  ;;  %v2678_v26 = vpop.f32.mrb[48].mxu0  ;;  %v3714_v35 = vadd.f32 %v2738_v41, %v1761_v48 }
 0x171   :  { %v2679_v51 = vpop.f32.mrb[49].mxu0 }
 0x172   :  { %v2680_v31 = vadd.f32 %v2679_v51, %v2678_v26  ;;  %v2681_v27 = vpop.f32.mrb[50].mxu0  ;;  %v3716_v43 = vadd.f32 %v2741_v49, %v1764_v37 }
 0x173   :  { %v2682_v16 = vpop.f32.mrb[51].mxu0 }
 0x174   :  { %v2742_v33 = vpop.f32.mrb[48].mxu1  ;;  %v1769_v3 = vadd.f32 %v2680_v31, %v3678_v44  ;;  %v2683_v39 = vadd.f32 %v2682_v16, %v2681_v27 }
 0x175   :  { %v2743_v13 = vpop.f32.mrb[49].mxu1 }
 0x176   :  { %v2744_v60 = vadd.f32 %v2743_v13, %v2742_v33  ;;  %v2745_v2 = vpop.f32.mrb[50].mxu1  ;;  %v1772_v9 = vadd.f32 %v2683_v39, %v3680_v45 }
 0x177   :  { %v2746_v8 = vpop.f32.mrb[51].mxu1 }
 0x178   :  { %v2747_v15 = vadd.f32 %v2746_v8, %v2745_v2  ;;  %v2684_v24 = vpop.f32.mrb[52].mxu0  ;;  %v3720_v36 = vadd.f32 %v2744_v60, %v1769_v3  ;;  %v3737_v60 = vld [vmem:[%s3820_s4] ss:$0 sm:$0xff] }
 0x179   :  { %v2685_v21 = vpop.f32.mrb[53].mxu0 }
 0x17a   :  { %v2686_v34 = vadd.f32 %v2685_v21, %v2684_v24  ;;  %v2687_v61 = vpop.f32.mrb[54].mxu0  ;;  %v3722_v14 = vadd.f32 %v2747_v15, %v1772_v9 }
 0x17b   :  { %v2688_v38 = vpop.f32.mrb[55].mxu0 }
 0x17c   :  { %v2748_v1 = vpop.f32.mrb[52].mxu1  ;;  %v1777_v44 = vadd.f32 %v2686_v34, %v3682_v23  ;;  %v2689_v57 = vadd.f32 %v2688_v38, %v2687_v61 }
 0x17d   :  { %v2749_v40 = vpop.f32.mrb[53].mxu1 }
 0x17e   :  { %v2750_v59 = vadd.f32 %v2749_v40, %v2748_v1  ;;  %v2751_v20 = vpop.f32.mrb[54].mxu1  ;;  %v1780_v45 = vadd.f32 %v2689_v57, %v3684_v46 }
 0x17f   :  { %v2752_v63 = vpop.f32.mrb[55].mxu1 }
 0x180   :  { %v2753_v0 = vadd.f32 %v2752_v63, %v2751_v20  ;;  %v2690_v25 = vpop.f32.mrb[56].mxu0  ;;  %v1874_v47 = vadd.f32 %v2750_v59, %v1777_v44 }
 0x181   :  { %v2691_v52 = vpop.f32.mrb[57].mxu0 }
 0x182   :  { %v2692_v28 = vadd.f32 %v2691_v52, %v2690_v25  ;;  %v2693_v54 = vpop.f32.mrb[58].mxu0  ;;  %v1877_v55 = vadd.f32 %v2753_v0, %v1780_v45 }
 0x183   :  { %v2694_v22 = vpop.f32.mrb[59].mxu0 }
 0x184   :  { %v2754_v62 = vpop.f32.mrb[56].mxu1  ;;  %v1785_v6 = vadd.f32 %v2692_v28, %v3686_v12  ;;  %v2695_v58 = vadd.f32 %v2694_v22, %v2693_v54 }
 0x185   :  { %v2755_v23 = vpop.f32.mrb[57].mxu1 }
 0x186   :  { %v2756_v10 = vadd.f32 %v2755_v23, %v2754_v62  ;;  %v2757_v32 = vpop.f32.mrb[58].mxu1  ;;  %v1788_v48 = vadd.f32 %v2695_v58, %v3688_v19 }
 0x187   :  { %v2758_v30 = vpop.f32.mrb[59].mxu1 }
 0x188   :  { %v2759_v46 = vadd.f32 %v2758_v30, %v2757_v32  ;;  %v2696_v18 = vpop.f32.mrb[60].mxu0  ;;  %v3728_v41 = vadd.f32 %v2756_v10, %v1785_v6 }
 0x189   :  { %v2697_v11 = vpop.f32.mrb[61].mxu0 }
 0x18a   :  { %v2698_v37 = vadd.f32 %v2697_v11, %v2696_v18  ;;  %v2699_v50 = vpop.f32.mrb[62].mxu0  ;;  %v3730_v49 = vadd.f32 %v2759_v46, %v1788_v48 }
 0x18b   :  { %v2700_v26 = vpop.f32.mrb[63].mxu0 }
 0x18c   :  { %v2760_v51 = vpop.f32.mrb[60].mxu1  ;;  %v1793_v12 = vadd.f32 %v2698_v37, %v3690_v4  ;;  %v2701_v31 = vadd.f32 %v2700_v26, %v2699_v50  ;;  %v3743_v4 = vld [vmem:[%s3821_s5] ss:$0 sm:$0xff] }
 0x18d   :  { %v2761_v27 = vpop.f32.mrb[61].mxu1 }
 0x18e   :  { %v2762_v16 = vadd.f32 %v2761_v27, %v2760_v51  ;;  %v2763_v33 = vpop.f32.mrb[62].mxu1  ;;  %v1796_v19 = vadd.f32 %v2701_v31, %v3692_v29 }
 0x18f   :  { %v2764_v3 = vpop.f32.mrb[63].mxu1 }
 0x190   :  { %v2765_v39 = vadd.f32 %v2764_v3, %v2763_v33  ;;  %v2800_v13 = vpop.f32.mrb[64].mxu0  ;;  %v1890_v2 = vadd.f32 %v2762_v16, %v1793_v12 }
 0x191   :  { %v1939_v9 = vadd.f32 %v2800_v13, %v3702_v42  ;;  %v1930_v8 = vpop.f32.mrb[65].mxu0 }
 0x192   :  { %v1931_v15 = vadd.f32 %v1930_v8, %v3696_v56  ;;  %v2801_v29 = vpop.f32.mrb[66].mxu0  ;;  %v3746_v24 = vadd.f32 %v2765_v39, %v1796_v19 }
 0x193   :  { %v2002_v21 = vmul.f32 %v3737_v60, %v1939_v9  ;;  %v1942_v34 = vadd.f32 %v2801_v29, %v3704_v7  ;;  %v1933_v61 = vpop.f32.mrb[67].mxu0 }
 0x194   :  { %v2808_v38 = vpop.f32.mrb[64].mxu1  ;;  %v2000_v1 = vmul.f32 %v3737_v60, %v1931_v15  ;;  %v1934_v42 = vadd.f32 %v1933_v61, %v3698_v17 }
 0x195   :  { %v2025_v44 = vadd.f32 %v3743_v4, %v2002_v21  ;;  %v1971_v57 = vadd.f32 %v2808_v38, %v1874_v47  ;;  %v1962_v40 = vpop.f32.mrb[65].mxu1  ;;  %v2003_v59 = vmul.f32 %v3737_v60, %v1942_v34 }
 0x196   :  { %v2023_v56 = vadd.f32 %v3743_v4, %v2000_v1  ;;  %v1963_v20 = vadd.f32 %v1962_v40, %v3720_v36  ;;  %v2809_v45 = vpop.f32.mrb[66].mxu1  ;;  %v2001_v63 = vmul.f32 %v3737_v60, %v1934_v42 }
 0x197   :  { %v2041_v7 = vmax.f32 %v2025_v44, 0.0  ;;  %v2010_v0 = vmul.f32 %v3737_v60, %v1971_v57  ;;  %v2026_v25 = vadd.f32 %v3743_v4, %v2003_v59  ;;  %v1974_v52 = vadd.f32 %v2809_v45, %v1877_v55  ;;  %v1965_v17 = vpop.f32.mrb[67].mxu1 }
 0x198   :  { %v2039_v28 = vmax.f32 %v2023_v56, 0.0  ;;  %v2008_v47 = vmul.f32 %v3737_v60, %v1963_v20  ;;  %v2024_v54 = vadd.f32 %v3743_v4, %v2001_v63  ;;  %v1966_v22 = vadd.f32 %v1965_v17, %v3722_v14  ;;  %v2804_v62 = vpop.f32.mrb[68].mxu0 }
 0x199   :  { %v2033_v36 = vadd.f32 %v3743_v4, %v2010_v0  ;;  %v2042_v6 = vmax.f32 %v2026_v25, 0.0  ;;  %v2011_v58 = vmul.f32 %v3737_v60, %v1974_v52  ;;  %v1955_v23 = vadd.f32 %v2804_v62, %v3714_v35  ;;  %v1946_v10 = vpop.f32.mrb[69].mxu0 }
 0x19a   :  { %v2031_v32 = vadd.f32 %v3743_v4, %v2008_v47  ;;  %v2040_v55 = vmax.f32 %v2024_v54, 0.0  ;;  %v2009_v48 = vmul.f32 %v3737_v60, %v1966_v22  ;;  %v1947_v30 = vadd.f32 %v1946_v10, %v3708_v53  ;;  %v2805_v46 = vpop.f32.mrb[70].mxu0 }
 0x19b   :  { %v2433_v18 = vpack.c.bf16 %v2042_v6, %v2041_v7  ;;  %v2034_v14 = vadd.f32 %v3743_v4, %v2011_v58  ;;  %v2006_v11 = vmul.f32 %v3737_v60, %v1955_v23  ;;  %v1949_v37 = vpop.f32.mrb[71].mxu0  ;;  %v2049_v50 = vmax.f32 %v2033_v36, 0.0 }
 0x19c   :  { %v2047_v26 = vmax.f32 %v2031_v32, 0.0  ;;  %v2428_v51 = vpack.c.bf16 %v2040_v55, %v2039_v28  ;;  %v2032_v35 = vadd.f32 %v3743_v4, %v2009_v48  ;;  %v2812_v12 = vpop.f32.mrb[68].mxu1  ;;  %v2004_v53 = vmul.f32 %v3737_v60, %v1947_v30 }
 0x19d   :  { %2503 = vst [vmem:[%s3822_s6 + $0x8] sm:$0xff] %v2433_v18   ;;  %v2050_v31 = vmax.f32 %v2034_v14, 0.0  ;;  %v1987_v27 = vadd.f32 %v2812_v12, %v1890_v2  ;;  %v1978_v16 = vpop.f32.mrb[69].mxu1  ;;  %v1958_v33 = vadd.f32 %v2805_v46, %v3716_v43  ;;  %v2029_v3 = vadd.f32 %v3743_v4, %v2006_v11 }
 0x19e   :  { %2429 = vst [vmem:[%s3822_s6] sm:$0xff] %v2428_v51   ;;  %v2048_v19 = vmax.f32 %v2032_v35, 0.0  ;;  %v1979_v39 = vadd.f32 %v1978_v16, %v3728_v41  ;;  %v2813_v13 = vpop.f32.mrb[70].mxu1  ;;  %v1950_v9 = vadd.f32 %v1949_v37, %v3710_v5  ;;  %v2027_v41 = vadd.f32 %v3743_v4, %v2004_v53 }
 0x19f   :  { %v2453_v8 = vpack.c.bf16 %v2050_v31, %v2049_v50  ;;  %v2014_v2 = vmul.f32 %v3737_v60, %v1987_v27  ;;  %v2007_v15 = vmul.f32 %v3737_v60, %v1958_v33  ;;  %v1981_v29 = vpop.f32.mrb[71].mxu1  ;;  %v1990_v34 = vadd.f32 %v2813_v13, %v3746_v24 }
 0x1a0   :  { %v2448_v21 = vpack.c.bf16 %v2048_v19, %v2047_v26  ;;  %v2012_v43 = vmul.f32 %v3737_v60, %v1979_v39  ;;  %v2005_v5 = vmul.f32 %v3737_v60, %v1950_v9  ;;  %v1982_v38 = vadd.f32 %v1981_v29, %v3730_v49 }
 0x1a1   :  { %2507 = vst [vmem:[%s3822_s6 + $0x28] sm:$0xff] %v2453_v8   ;;  %v2030_v61 = vadd.f32 %v3743_v4, %v2007_v15  ;;  %v2045_v1 = vmax.f32 %v2029_v3, 0.0  ;;  %v2037_v42 = vadd.f32 %v3743_v4, %v2014_v2  ;;  %v2015_v24 = vmul.f32 %v3737_v60, %v1990_v34 }
 0x1a2   :  { %2506 = vst [vmem:[%s3822_s6 + $0x20] sm:$0xff] %v2448_v21   ;;  %v2035_v44 = vadd.f32 %v3743_v4, %v2012_v43  ;;  %v2028_v40 = vadd.f32 %v3743_v4, %v2005_v5  ;;  %v2013_v59 = vmul.f32 %v3737_v60, %v1982_v38  ;;  %v2043_v20 = vmax.f32 %v2027_v41, 0.0 }
 0x1a3   :  { %v2046_v57 = vmax.f32 %v2030_v61, 0.0  ;;  %v2038_v56 = vadd.f32 %v3743_v4, %v2015_v24  ;;  %v2053_v7 = vmax.f32 %v2037_v42, 0.0 }
 0x1a4   :  { %v2044_v45 = vmax.f32 %v2028_v40, 0.0  ;;  %v2036_v63 = vadd.f32 %v3743_v4, %v2013_v59  ;;  %v2051_v25 = vmax.f32 %v2035_v44, 0.0 }
 0x1a5   :  { %v2443_v49 = vpack.c.bf16 %v2046_v57, %v2045_v1  ;;  %v2054_v0 = vmax.f32 %v2038_v56, 0.0 }
 0x1a6   :  { %v2438_v52 = vpack.c.bf16 %v2044_v45, %v2043_v20  ;;  %v2052_v17 = vmax.f32 %v2036_v63, 0.0 }
 0x1a7   :  { %2505 = vst [vmem:[%s3822_s6 + $0x18] sm:$0xff] %v2443_v49   ;;  %v2463_v28 = vpack.c.bf16 %v2054_v0, %v2053_v7 }
 0x1a8   :  { %2504 = vst [vmem:[%s3822_s6 + $0x10] sm:$0xff] %v2438_v52   ;;  %v2458_v60 = vpack.c.bf16 %v2052_v17, %v2051_v25 }
 0x1a9   :  { %2509 = vst [vmem:[%s3822_s6 + $0x38] sm:$0xff] %v2463_v28  }
 0x1aa   :  { %2508 = vst [vmem:[%s3822_s6 + $0x30] sm:$0xff] %v2458_v60  }

// kernel: basic_block_forward.3
= control target key start
LH: loop header
LB: loop body
LE: loop exit
PB: predicated region body
PF: predicated region fallthrough
CT: control target
= control target key end

     0   :  { %v3994_v1 = vmov 0   ;;  %vm26_vm0 = vsmask.f32 256  ;;  %vm25_vm1 = vcmask 1040384   ;;  %v28_v10 = vld [vmem:[#allocation2 + $0x8] sm:$0x1]  ;;  %s5180_s2 = inlined_call_operand.vmem [shape: bf16[1280,128], index: 2, kind: input, shape index: {}]   ;;  %s5181_s0 = inlined_call_operand.vmem [shape: bf16[2,8,8,128], index: 0, kind: input, shape index: {}]   ;;  %s5182_s1 = inlined_call_operand.vmem [shape: bf16[2,8,8,128], index: 1, kind: input, shape index: {}]   ;;  %s5183_s3 = inlined_call_operand.vmem [shape: bf16[2,8,8,128], index: 3, kind: output, shape index: {}]  }
   0x1   :  { %v3890_v0 = vld [vmem:[%s5180_s2 + $0x40] sm:$0xff]   ;;  %19 = vst [vmem:[#allocation2] sm:$0xf] %v3994_v1  ;;  %20 = vst [vmem:[#allocation2 + $0x4] sm:$0x1] %v3994_v1  ;;  %v3892_v3 = vld [vmem:[%s5180_s2 + $0x48] sm:$0xff]  }
   0x2   :  { %22 = vst [vmem:[#allocation2 + $0x48] sm:$0xf] %v3994_v1  ;;  %23 = vst [vmem:[#allocation2 + $0x4c] sm:$0x1] %v3994_v1  ;;  %v3891_v2 = vld [vmem:[%s5180_s2] sm:$0xff]   ;;  %3553 = vmatprep.subr.bf16.mxu0 %v3890_v0  ;;  %3873 = vmatprep.subr.bf16.mxu1 %v3890_v0  ;;  %v3893_v4 = vld [vmem:[%s5180_s2 + $0x8] sm:$0xff]  }
   0x3   :  { %3554 = vmatpush3.bf16.msra.mxu0 %v3891_v2  ;;  %3881 = vmatpush3.bf16.msra.mxu1 %v3891_v2  ;;  %v3894_v5 = vld [vmem:[%s5180_s2 + $0x50] sm:$0xff]   ;;  %v3896_v7 = vld [vmem:[%s5180_s2 + $0x58] sm:$0xff]   ;;  %v3898_v9 = vld [vmem:[%s5180_s2 + $0x60] sm:$0xff]   ;;  %vm52_vm3 = vsmask.f32 7938  ;;  %v5200_v17 = vmov 0 }
   0x4   :  { %3555 = vmatprep.subr.bf16.mxu0 %v3892_v3  ;;  %3874 = vmatprep.subr.bf16.mxu1 %v3892_v3  ;;  %v3895_v6 = vld [vmem:[%s5180_s2 + $0x10] sm:$0xff]   ;;  %v3897_v8 = vld [vmem:[%s5180_s2 + $0x18] sm:$0xff]   ;;  %v3899_v11 = vld [vmem:[%s5180_s2 + $0x20] sm:$0xff]   ;;  %vm166_vm5 = vcmask 1043456   ;;  %vm268_vm7 = vsmask.f32 3328 }
   0x5   :  { %v3900_v12 = vld [vmem:[%s5180_s2 + $0x68] sm:$0xff]   ;;  %vm4049_vm2 = vmand %vm25_vm1, %vm26_vm0  ;;  %v78_v15 = vld [vmem:[%s5181_s0] sm:$0xf]  ;;  %vm269_vm8 = vsmask.f32 7440  ;;  %vm435_vm10 = vcmask 1042432  }
   0x6   :  { %v54_v14 = vld [vmem:[#allocation2 + $0xc] sm:$0x1]  ;;  %v29_v16 = vsel %vm4049_vm2, 0, %v28_v10  ;;  %vm4059_vm4 = vmand %vm25_vm1, %vm52_vm3  ;;  %v87_v18 = vshrl.u32 %v78_v15, 16  ;;  %v90_v21 = vshll.u32 %v78_v15, 16  ;;  %v3902_v27 = vld [vmem:[%s5180_s2 + $0x70] sm:$0xff]  }
   0x7   :  { %3556 = vmatpush3.bf16.msra.mxu0 %v3893_v4  ;;  %3882 = vmatpush3.bf16.msra.mxu1 %v3893_v4  ;;  %v5201_v17 = vsel %vm4059_vm4, 4294967295, %v5200_v17  ;;  %30 = vst [vmem:[#allocation2 + $0x8] sm:$0x1] %v29_v16  ;;  %v55_v20 = vsel %vm4059_vm4, 0, %v54_v14  ;;  %v3901_v24 = vld [vmem:[%s5180_s2 + $0x28] sm:$0xff]   ;;  %v3903_v31 = vld [vmem:[%s5180_s2 + $0x30] sm:$0xff]   ;;  %vm4078_vm6 = vmand %vm166_vm5, %vm52_vm3 }
   0x8   :  { %3557 = vmatprep.subr.bf16.mxu0 %v3894_v5  ;;  %3875 = vmatprep.subr.bf16.mxu1 %v3894_v5  ;;  %5202 = vst [vmem:[#allocation4_spill] sm:$0xff] %v5201_v17  ;;  %v252_v19 = vld [vmem:[#allocation2] sm:$0xf]  ;;  %v253_v22 = vld [vmem:[#allocation2 + $0x4] sm:$0x1]  ;;  %v89_v25 = vrot.slane %v87_v18, 7  ;;  %vm4125_vm9 = vmor %vm268_vm7, %vm269_vm8 }
   0x9   :  { %v272_v23 = vshrl.u32 %v252_v19, 16  ;;  %56 = vst [vmem:[#allocation2 + $0xc] sm:$0x1] %v55_v20  ;;  %v275_v26 = vshll.u32 %v252_v19, 16  ;;  %v281_v28 = vshll.u32 %v253_v22, 16  ;;  %v3904_v37 = vld [vmem:[%s5180_s2 + $0x78] sm:$0xff]  }
   0xa   :  { %v3346_v29 = vld [vmem:[%s5181_s0 + $0x20] sm:$0xf]  ;;  %v92_v32 = vor.u32 %v90_v21, %v89_v25  ;;  %v93_v34 = vrot.slane %v89_v25, 4  ;;  %v3905_v40 = vld [vmem:[%s5180_s2 + $0x38] sm:$0xff]   ;;  %v31_v55 = vld [vmem:[#allocation2 + $0x10] sm:$0x1] }
   0xb   :  { %3558 = vmatpush3.bf16.msra.mxu0 %v3895_v6  ;;  %3883 = vmatpush3.bf16.msra.mxu1 %v3895_v6  ;;  %v1236_v30 = vld [vmem:[#allocation2] sm:$0xf]  ;;  %v274_v33 = vrot.slane %v272_v23, 4  ;;  %v277_v36 = vrot.slane %v275_v26, 5  ;;  %v1073_v38 = vshrl.u32 %v3346_v29, 16  ;;  %v4088_v42 = vrot.slane %v281_v28, 5 }
   0xc   :  { %3559 = vmatprep.subr.bf16.mxu0 %v3896_v7  ;;  %3876 = vmatprep.subr.bf16.mxu1 %v3896_v7  ;;  %v1253_v39 = vshrl.u32 %v1236_v30, 16  ;;  %v1076_v45 = vshll.u32 %v3346_v29, 16  ;;  %v1256_v46 = vshll.u32 %v1236_v30, 16  ;;  %v3907_v47 = vld [vmem:[%s5180_s2 + $0xc0] sm:$0xff]   ;;  %v32_v57 = vsel %vm4049_vm2, 0, %v31_v55 }
   0xd   :  { %v3908_v48 = vld [vmem:[%s5180_s2 + $0x140] sm:$0xff]   ;;  %v278_v50 = vor.u32 %v277_v36, %v274_v33  ;;  %v1075_v51 = vrot.slane %v1073_v38, 7  ;;  %v34_v58 = vld [vmem:[#allocation2 + $0x18] sm:$0x1]  ;;  %v57_v59 = vld [vmem:[#allocation2 + $0x14] sm:$0x1] }
   0xe   :  { %v168_v41 = vld [vmem:[#allocation2 + $0x8] sm:$0xf]  ;;  %v4100_v52 = vrot.slane %v1253_v39, 4  ;;  %v4102_v54 = vrot.slane %v1256_v46, 5  ;;  %33 = vst [vmem:[#allocation2 + $0x10] sm:$0x1] %v32_v57 }
   0xf   :  { %3560 = vmatpush3.bf16.msra.mxu0 %v3897_v8  ;;  %3884 = vmatpush3.bf16.msra.mxu1 %v3897_v8  ;;  %v169_v43 = vsel %vm4078_vm6, %v92_v32, %v168_v41  ;;  %v279_v53 = vrot.slane %v278_v50, 4  ;;  %v1079_v56 = vrot.slane %v1075_v51, 4  ;;  %v1078_v60 = vor.u32 %v1076_v45, %v1075_v51  ;;  %v60_v63 = vld [vmem:[#allocation2 + $0x1c] sm:$0x1]  ;;  %v79_v0 = vld [vmem:[%s5181_s0 + $0x4] sm:$0xf] }
  0x10   :  { %3561 = vmatprep.subr.bf16.mxu0 %v3898_v9  ;;  %3877 = vmatprep.subr.bf16.mxu1 %v3898_v9  ;;  %v171_v44 = vld [vmem:[#allocation2 + $0xc] sm:$0x1]  ;;  %170 = vst [vmem:[#allocation2 + $0x8] sm:$0xf] %v169_v43  ;;  %v35_v61 = vsel %vm4049_vm2, 0, %v34_v58  ;;  %v58_v62 = vsel %vm4059_vm4, 0, %v57_v59  ;;  %v1259_v43 = vor.u32 %v4102_v54, %v4100_v52 }
  0x11   :  { %v172_v49 = vsel %vm4049_vm2, %v93_v34, %v171_v44  ;;  %36 = vst [vmem:[#allocation2 + $0x18] sm:$0x1] %v35_v61  ;;  %59 = vst [vmem:[#allocation2 + $0x14] sm:$0x1] %v58_v62  ;;  %v61_v10 = vsel %vm4059_vm4, 0, %v60_v63  ;;  %v95_v23 = vshrl.u32 %v79_v0, 16  ;;  %v284_v33 = vsel %vm4125_vm9, %v279_v53, %v4088_v42 }
  0x12   :  { %173 = vst [vmem:[#allocation2 + $0xc] sm:$0x1] %v172_v49  ;;  %62 = vst [vmem:[#allocation2 + $0x1c] sm:$0x1] %v61_v10  ;;  %v1237_v28 = vld [vmem:[#allocation2 + $0x4] sm:$0x1] }
  0x13   :  { %3562 = vmatpush3.bf16.msra.mxu0 %v3899_v11  ;;  %3885 = vmatpush3.bf16.msra.mxu1 %v3899_v11  ;;  %v97_v29 = vrot.slane %v95_v23, 7  ;;  %v98_v30 = vshll.u32 %v79_v0, 16  ;;  %v1262_v44 = vshll.u32 %v1237_v28, 16  ;;  %v3913_v51 = vld [vmem:[%s5180_s2 + $0x148] sm:$0xff]   ;;  %v4162_v53 = vld [vmem:[%s5181_s0 + $0x24] sm:$0xf] }
  0x14   :  { %3563 = vmatprep.subr.bf16.mxu0 %v3900_v12  ;;  %3878 = vmatprep.subr.bf16.mxu1 %v3900_v12  ;;  %v1260_v59 = vrot.slane %v1259_v43, 4  ;;  %v3915_v63 = vld [vmem:[%s5180_s2 + $0x108] sm:$0xff]   ;;  %vm436_vm11 = vcmask 1046532  }
  0x15   :  { %v174_v36 = vld [vmem:[#allocation2 + $0x10] sm:$0xf]  ;;  %v101_v38 = vrot.slane %v97_v29, 4  ;;  %v1264_v58 = vrot.slane %v1262_v44, 5  ;;  %v4174_v0 = vld [vmem:[%s5181_s0 + $0x28] sm:$0xf]  ;;  %vm4343_vm12 = vmor %vm435_vm10, %vm436_vm11 }
  0x16   :  { %v3910_v44 = vld [vmem:[%s5180_s2 + $0x80] sm:$0xff]   ;;  %v1935_v18 = vld [vmem:[#allocation2 + $0x4c] sm:$0x1] }
  0x17   :  { %3564 = vmatpush3.bf16.msra.mxu0 %v3901_v24  ;;  %3886 = vmatpush3.bf16.msra.mxu1 %v3901_v24  ;;  %v254_v1 = vld [vmem:[#allocation2 + $0x8] sm:$0xf] }
  0x18   :  { %3565 = vmatprep.subr.bf16.mxu0 %v3902_v27  ;;  %3879 = vmatprep.subr.bf16.mxu1 %v3902_v27  ;;  %v1152_v2 = vld [vmem:[#allocation2 + $0x8] sm:$0xf]  ;;  %v286_v4 = vshrl.u32 %v254_v1, 16  ;;  %v289_v5 = vshll.u32 %v254_v1, 16  ;;  %v180_v45 = vld [vmem:[#allocation2 + $0x18] sm:$0xf] }
  0x19   :  { %v255_v3 = vld [vmem:[#allocation2 + $0xc] sm:$0x1]  ;;  %v1153_v14 = vsel %vm4078_vm6, %v1078_v60, %v1152_v2  ;;  %v3906_v16 = vld [vmem:[#allocation2] ss:$8 sps:$4 sm:$0xff]   ;;  %v183_v50 = vld [vmem:[#allocation2 + $0x1c] sm:$0x1] }
  0x1a   :  { %v4113_v6 = vld [vmem:[#allocation2 + $0xc] sm:$0x1]  ;;  %v295_v7 = vshll.u32 %v255_v3, 16  ;;  %v288_v11 = vrot.slane %v286_v4, 4  ;;  %v291_v12 = vrot.slane %v289_v5, 5  ;;  %v1081_v1 = vshrl.u32 %v4162_v53, 16 }
  0x1b   :  { %3566 = vmatpush3.bf16.msra.mxu0 %v3903_v31  ;;  %3887 = vmatpush3.bf16.msra.mxu1 %v3903_v31  ;;  %v4115_v8 = vld [vmem:[#allocation2 + $0xc] sm:$0x1]  ;;  %v4131_v21 = vld [vmem:[#allocation2 + $0x8] sm:$0xe]  ;;  %v3918_v2 = vld [vmem:[%s5180_s2 + $0x150] sm:$0xff]  }
  0x1c   :  { %3567 = vmatprep.subr.bf16.mxu0 %v3904_v37  ;;  %3880 = vmatprep.subr.bf16.mxu1 %v3904_v37  ;;  %v4117_v9 = vld [vmem:[#allocation2 + $0xc] sm:$0x1]  ;;  %v297_v19 = vrot.slane %v295_v7, 5  ;;  %v4133_v22 = vld [vmem:[#allocation2 + $0x8] sm:$0xf]  ;;  %v292_v24 = vor.u32 %v291_v12, %v288_v11  ;;  %v100_v37 = vor.u32 %v98_v30, %v97_v29  ;;  %v3921_v12 = vld [vmem:[%s5180_s2 + $0x110] sm:$0xff]  }
  0x1d   :  { %v1155_v15 = vld [vmem:[#allocation2 + $0xc] sm:$0x1]  ;;  %v4135_v25 = vld [vmem:[#allocation2 + $0x8] sm:$0xf]  ;;  %v1084_v29 = vshll.u32 %v4162_v53, 16  ;;  %v1089_v30 = vshrl.u32 %v4174_v0, 16 }
  0x1e   :  { %v1156_v20 = vsel %vm4049_vm2, %v1079_v56, %v1155_v15  ;;  %v4137_v26 = vld [vmem:[#allocation2 + $0x8] sm:$0xe]  ;;  %v293_v34 = vrot.slane %v292_v24, 4  ;;  %v175_v49 = vsel %vm4078_vm6, %v100_v37, %v174_v36 }
  0x1f   :  { %3568 = vmatpush3.bf16.msra.mxu0 %v3905_v40  ;;  %3888 = vmatpush3.bf16.msra.mxu1 %v3905_v40  ;;  %1157 = vst [vmem:[#allocation2 + $0xc] sm:$0x1] %v1156_v20  ;;  %v80_v27 = vld [vmem:[%s5181_s0 + $0x8] sm:$0xf]  ;;  %1154 = vst [vmem:[#allocation2 + $0x8] sm:$0xf] %v1153_v14  ;;  %v1265_v14 = vsel %vm4125_vm9, %v1260_v59, %v1264_v58 }
  0x20   :  { %3617 = vmatprep.subr.bf16.mxu1 %v3907_v47  ;;  %3681 = vmatprep.subr.bf16.mxu0 %v3908_v48  ;;  %v103_v31 = vshrl.u32 %v80_v27, 16  ;;  %v106_v32 = vshll.u32 %v80_v27, 16  ;;  %v177_v40 = vld [vmem:[#allocation2 + $0x14] sm:$0x1]  ;;  %v298_v41 = vsel %vm4125_vm9, %v293_v34, %v297_v19  ;;  %v3911_v47 = vld [vmem:[%s5180_s2 + $0x100] sm:$0xff]   ;;  %v3923_v20 = vld [vmem:[%s5180_s2 + $0x158] sm:$0xff]  }
  0x21   :  { %v3286_v46 = vcombine.low %v284_v33, %v298_v41  ;;  %176 = vst [vmem:[#allocation2 + $0x10] sm:$0xf] %v175_v49  ;;  %v178_v52 = vsel %vm4049_vm2, %v101_v38, %v177_v40  ;;  %v4196_v41 = vrot.slane %v1081_v1, 7  ;;  %v1092_v49 = vshll.u32 %v4174_v0, 16  ;;  %v3928_v0 = vld [vmem:[%s5180_s2 + $0x160] sm:$0xff]  }
  0x22   :  { %v105_v39 = vrot.slane %v103_v31, 7  ;;  %179 = vst [vmem:[#allocation2 + $0x14] sm:$0x1] %v178_v52 }
  0x23   :  { %2793 = vmatprep.mubr.bf16.mxu0 %v3286_v46 }
  0x24   :  { %v108_v42 = vor.u32 %v106_v32, %v105_v39  ;;  %v109_v48 = vrot.slane %v105_v39, 4  ;;  %2794 = vmatmul.mubr.bf16.vlgmr.msra.gmra.mrb[0].mxu0 %v3906_v16 }
  0x25   :  { %3682 = vmatpush3.bf16.msra.mxu0 %v3911_v47 }
  0x26   :  { %v1239_v54 = vld [vmem:[#allocation2 + $0xc] sm:$0x1]  ;;  %v181_v55 = vsel %vm4078_vm6, %v108_v42, %v180_v45  ;;  %v184_v56 = vsel %vm4049_vm2, %v109_v48, %v183_v50  ;;  %v1238_v57 = vld [vmem:[#allocation2 + $0x8] sm:$0xf]  ;;  %3683 = vmatprep.subr.bf16.mxu0 %v3913_v51  ;;  %v1091_v48 = vrot.slane %v1089_v30, 7  ;;  %v3925_v50 = vld [vmem:[%s5180_s2 + $0x118] sm:$0xff]  }
  0x27   :  { %182 = vst [vmem:[#allocation2 + $0x18] sm:$0xf] %v181_v55  ;;  %185 = vst [vmem:[#allocation2 + $0x1c] sm:$0x1] %v184_v56  ;;  %v1267_v60 = vshrl.u32 %v1238_v57, 16  ;;  %v1270_v61 = vshll.u32 %v1238_v57, 16 }
  0x28   :  { %v1276_v62 = vshll.u32 %v1239_v54, 16  ;;  %v256_v10 = vld [vmem:[#allocation2 + $0x10] sm:$0xf]  ;;  %v3909_v38 = vld [vmem:[#allocation2] ss:$8 sps:$4 sm:$0xff]   ;;  %v1087_v55 = vrot.slane %v4196_v41, 4 }
  0x29   :  { %v1269_v3 = vrot.slane %v1267_v60, 4  ;;  %v1272_v4 = vrot.slane %v1270_v61, 5  ;;  %3684 = vmatpush3.bf16.msra.mxu0 %v3915_v63  ;;  %v4180_v11 = vld [vmem:[#allocation2 + $0x10] sm:$0xf]  ;;  %v257_v15 = vld [vmem:[#allocation2 + $0x14] sm:$0x1]  ;;  %v1086_v63 = vor.u32 %v1084_v29, %v4196_v41  ;;  %v1094_v29 = vor.u32 %v1092_v49, %v1091_v48 }
  0x2a   :  { %v1278_v7 = vrot.slane %v1276_v62, 5  ;;  %v300_v16 = vshrl.u32 %v256_v10, 16  ;;  %v303_v19 = vshll.u32 %v256_v10, 16  ;;  %3685 = vmatprep.subr.bf16.mxu0 %v3918_v2  ;;  %v309_v28 = vshll.u32 %v257_v15, 16  ;;  %v3912_v42 = vld [vmem:[%s5180_s2 + $0xc8] sm:$0xff]   ;;  %v3917_v57 = vld [vmem:[%s5180_s2 + $0xd0] sm:$0xff]  }
  0x2b   :  { %v1273_v5 = vor.u32 %v1272_v4, %v1269_v3  ;;  %v3914_v54 = vld [vmem:[%s5180_s2 + $0x88] sm:$0xff]   ;;  %v1095_v56 = vrot.slane %v1091_v48, 4  ;;  %v4217_v60 = vld [vmem:[#allocation2 + $0x14] sm:$0x1]  ;;  %v4227_v1 = vld [vmem:[#allocation2 + $0x10] sm:$0xe] }
  0x2c   :  { %v302_v32 = vrot.slane %v300_v16, 4  ;;  %v305_v33 = vrot.slane %v303_v19, 5  ;;  %v311_v39 = vrot.slane %v309_v28, 5  ;;  %v4219_v61 = vld [vmem:[#allocation2 + $0x14] sm:$0x1]  ;;  %v3924_v48 = vld [vmem:[%s5180_s2 + $0x98] sm:$0xff]  }
  0x2d   :  { %v1274_v24 = vrot.slane %v1273_v5, 4  ;;  %3686 = vmatpush3.bf16.msra.mxu0 %v3921_v12  ;;  %v4221_v62 = vld [vmem:[#allocation2 + $0x14] sm:$0x1]  ;;  %v4235_v5 = vld [vmem:[#allocation2 + $0x10] sm:$0xf] }
  0x2e   :  { %v258_v27 = vld [vmem:[#allocation2 + $0x18] sm:$0xf]  ;;  %v259_v31 = vld [vmem:[#allocation2 + $0x1c] sm:$0x1]  ;;  %v306_v45 = vor.u32 %v305_v33, %v302_v32  ;;  %3687 = vmatprep.subr.bf16.mxu0 %v3923_v20  ;;  %v4241_v12 = vld [vmem:[#allocation2 + $0x10] sm:$0xe] }
  0x2f   :  { %v314_v34 = vshrl.u32 %v258_v27, 16  ;;  %v317_v36 = vshll.u32 %v258_v27, 16  ;;  %v1279_v37 = vsel %vm4125_vm9, %v1274_v24, %v1278_v7  ;;  %v323_v40 = vshll.u32 %v259_v31, 16  ;;  %v4229_v2 = vld [vmem:[#allocation2 + $0x18] sm:$0xe] }
  0x30   :  { %v3358_v43 = vcombine.low %v1265_v14, %v1279_v37  ;;  %v307_v51 = vrot.slane %v306_v45, 4  ;;  %v4231_v3 = vld [vmem:[#allocation2 + $0x1c] sm:$0x1]  ;;  %v4233_v4 = vld [vmem:[#allocation2 + $0x18] sm:$0xf] }
  0x31   :  { %v316_v46 = vrot.slane %v314_v34, 4  ;;  %v319_v47 = vrot.slane %v317_v36, 5  ;;  %v325_v53 = vrot.slane %v323_v40, 5  ;;  %3688 = vmatpush3.bf16.msra.mxu0 %v3925_v50  ;;  %v4237_v7 = vld [vmem:[#allocation2 + $0x18] sm:$0xf]  ;;  %v3920_v34 = vld [vmem:[%s5180_s2 + $0x90] sm:$0xff]  }
  0x32   :  { %2825 = vmatprep.mubr.bf16.mxu1 %v3358_v43  ;;  %v312_v58 = vsel %vm4125_vm9, %v307_v51, %v311_v39  ;;  %v4239_v10 = vld [vmem:[#allocation2 + $0x1c] sm:$0x1]  ;;  %v4243_v14 = vld [vmem:[#allocation2 + $0x18] sm:$0xe]  ;;  %v4247_v16 = vld [vmem:[#allocation2 + $0x10] sm:$0xf]  ;;  %3689 = vmatprep.subr.bf16.mxu0 %v3928_v0 }
  0x33   :  { %v320_v52 = vor.u32 %v319_v47, %v316_v46  ;;  %2826 = vmatmul.mubr.bf16.vlgmr.msra.gmra.mrb[0].mxu1 %v3909_v38  ;;  %v4245_v15 = vld [vmem:[#allocation2 + $0x1c] sm:$0x1]  ;;  %5207 = vst [vmem:[#allocation5_spill] sm:$0xff] %v4247_v16  ;;  %v4249_v19 = vld [vmem:[#allocation2 + $0x18] sm:$0xf] }
  0x34   :  { %3618 = vmatpush3.bf16.msra.mxu1 %v3910_v44  ;;  %5208 = vst [vmem:[#allocation6_spill] sm:$0xff] %v4249_v19  ;;  %v4251_v20 = vld [vmem:[#allocation2 + $0x10] sm:$0xf]  ;;  %v4253_v24 = vld [vmem:[#allocation2 + $0x14] sm:$0x1]  ;;  %v3922_v40 = vld [vmem:[%s5180_s2 + $0xd8] sm:$0xff]  }
  0x35   :  { %v321_v59 = vrot.slane %v320_v52, 4  ;;  %3619 = vmatprep.subr.bf16.mxu1 %v3912_v42  ;;  %5209 = vst [vmem:[#allocation7_spill] sm:$0xff] %v4251_v20  ;;  %5210 = vst [vmem:[#allocation8_spill] sm:$0xff] %v4253_v24  ;;  %v4255_v27 = vld [vmem:[#allocation2 + $0x18] sm:$0xf] }
  0x36   :  { %5211 = vst [vmem:[#allocation9_spill] sm:$0xff] %v4255_v27  ;;  %v4257_v28 = vld [vmem:[#allocation2 + $0x1c] sm:$0x1]  ;;  %v4261_v31 = vld [vmem:[#allocation2 + $0x10] sm:$0xe] }
  0x37   :  { %5212 = vst [vmem:[#allocation10_spill] sm:$0xff] %v4257_v28  ;;  %v326_v30 = vsel %vm4125_vm9, %v321_v59, %v325_v53  ;;  %5213 = vst [vmem:[#allocation11_spill] sm:$0xff] %v4261_v31  ;;  %v4263_v32 = vld [vmem:[#allocation2 + $0x14] sm:$0x1]  ;;  %v4265_v33 = vld [vmem:[#allocation2 + $0x18] sm:$0xe] }
  0x38   :  { %5214 = vst [vmem:[#allocation12_spill] sm:$0xff] %v4263_v32  ;;  %5215 = vst [vmem:[#allocation13_spill] sm:$0xff] %v4265_v33  ;;  %v3287_v36 = vcombine.low %v312_v58, %v326_v30  ;;  %v4270_v37 = vld [vmem:[#allocation2 + $0x1c] sm:$0x1]  ;;  %v1158_v38 = vld [vmem:[#allocation2 + $0x10] sm:$0xf]  ;;  %3620 = vmatpush3.bf16.msra.mxu1 %v3914_v54 }
  0x39   :  { %5216 = vst [vmem:[#allocation14_spill] sm:$0xff] %v4270_v37  ;;  %v1161_v39 = vld [vmem:[#allocation2 + $0x14] sm:$0x1]  ;;  %v1159_v41 = vsel %vm4078_vm6, %v1086_v63, %v1158_v38  ;;  %v1164_v44 = vld [vmem:[#allocation2 + $0x18] sm:$0xf]  ;;  %3621 = vmatprep.subr.bf16.mxu1 %v3917_v57  ;;  %v3931_v63 = vld [vmem:[%s5180_s2 + $0x120] sm:$0xff]  }
  0x3a   :  { %v1162_v43 = vsel %vm4049_vm2, %v1087_v55, %v1161_v39  ;;  %v1167_v45 = vld [vmem:[#allocation2 + $0x1c] sm:$0x1]  ;;  %v1165_v46 = vsel %vm4078_vm6, %v1094_v29, %v1164_v44  ;;  %2801 = vmatprep.mubr.bf16.mxu0 %v3287_v36  ;;  %v3916_v42 = vld [vmem:[#allocation2 + $0x10] ss:$8 sps:$4 sm:$0xff]   ;;  %v37_v49 = vld [vmem:[#allocation2 + $0x20] sm:$0x1]  ;;  %3690 = vmatpush3.bf16.msra.mxu0 %v3931_v63 }
  0x3b   :  { %1163 = vst [vmem:[#allocation2 + $0x14] sm:$0x1] %v1162_v43  ;;  %v1168_v47 = vsel %vm4049_vm2, %v1095_v56, %v1167_v45  ;;  %1160 = vst [vmem:[#allocation2 + $0x10] sm:$0xf] %v1159_v41  ;;  %2802 = vmatmul.mubr.bf16.gmra.mrb[4].mxu0 %v3916_v42  ;;  %v40_v50 = vld [vmem:[#allocation2 + $0x28] sm:$0x1] }
  0x3c   :  { %1169 = vst [vmem:[#allocation2 + $0x1c] sm:$0x1] %v1168_v47  ;;  %1166 = vst [vmem:[#allocation2 + $0x18] sm:$0xf] %v1165_v46  ;;  %v63_v51 = vld [vmem:[#allocation2 + $0x24] sm:$0x1]  ;;  %3622 = vmatpush3.bf16.msra.mxu1 %v3920_v34 }
  0x3d   :  { %v38_v52 = vsel %vm4049_vm2, 0, %v37_v49  ;;  %v41_v53 = vsel %vm4049_vm2, 0, %v40_v50  ;;  %v64_v54 = vsel %vm4059_vm4, 0, %v63_v51  ;;  %v66_v55 = vld [vmem:[#allocation2 + $0x2c] sm:$0x1]  ;;  %v3927_v56 = vld [vmem:[%s5180_s2 + $0xe0] sm:$0xff]   ;;  %3623 = vmatprep.subr.bf16.mxu1 %v3922_v40 }
  0x3e   :  { %39 = vst [vmem:[#allocation2 + $0x20] sm:$0x1] %v38_v52  ;;  %42 = vst [vmem:[#allocation2 + $0x28] sm:$0x1] %v41_v53  ;;  %v67_v57 = vsel %vm4059_vm4, 0, %v66_v55  ;;  %v3930_v40 = vld [vmem:[%s5180_s2 + $0xa0] sm:$0xff]  }
  0x3f   :  { %65 = vst [vmem:[#allocation2 + $0x24] sm:$0x1] %v64_v54  ;;  %v81_v58 = vld [vmem:[%s5181_s0 + $0xc] sm:$0xf]  ;;  %v82_v59 = vld [vmem:[%s5181_s0 + $0x10] sm:$0xf] }
  0x40   :  { %68 = vst [vmem:[#allocation2 + $0x2c] sm:$0x1] %v67_v57  ;;  %v111_v0 = vshrl.u32 %v81_v58, 16  ;;  %v119_v29 = vshrl.u32 %v82_v59, 16  ;;  %v114_v30 = vshll.u32 %v81_v58, 16  ;;  %v122_v34 = vshll.u32 %v82_v59, 16  ;;  %3624 = vmatpush3.bf16.msra.mxu1 %v3924_v48 }
  0x41   :  { %3625 = vmatprep.subr.bf16.mxu1 %v3927_v56 }
  0x42   :  { %v1241_v36 = vld [vmem:[#allocation2 + $0x14] sm:$0x1]  ;;  %v113_v38 = vrot.slane %v111_v0, 7  ;;  %v121_v39 = vrot.slane %v119_v29, 7  ;;  %v1240_v41 = vld [vmem:[#allocation2 + $0x10] sm:$0xf] }
  0x43   :  { %v1242_v43 = vld [vmem:[#allocation2 + $0x18] sm:$0xf]  ;;  %v1243_v44 = vld [vmem:[#allocation2 + $0x1c] sm:$0x1]  ;;  %v1281_v45 = vshrl.u32 %v1240_v41, 16  ;;  %v1284_v46 = vshll.u32 %v1240_v41, 16 }
  0x44   :  { %v1290_v47 = vshll.u32 %v1241_v36, 16  ;;  %v1295_v42 = vshrl.u32 %v1242_v43, 16  ;;  %v1298_v49 = vshll.u32 %v1242_v43, 16  ;;  %v1304_v50 = vshll.u32 %v1243_v44, 16  ;;  %3626 = vmatpush3.bf16.msra.mxu1 %v3930_v40 }
  0x45   :  { %v116_v51 = vor.u32 %v114_v30, %v113_v38  ;;  %v124_v52 = vor.u32 %v122_v34, %v121_v39  ;;  %v1283_v53 = vrot.slane %v1281_v45, 4  ;;  %v1286_v48 = vrot.slane %v1284_v46, 5  ;;  %v186_v55 = vld [vmem:[#allocation2 + $0x20] sm:$0xf]  ;;  %v192_v41 = vld [vmem:[#allocation2 + $0x28] sm:$0xf] }
  0x46   :  { %v1297_v54 = vrot.slane %v1295_v42, 4  ;;  %v1300_v57 = vrot.slane %v1298_v49, 5  ;;  %v117_v58 = vrot.slane %v113_v38, 4  ;;  %v125_v59 = vrot.slane %v121_v39, 4  ;;  %v189_v63 = vld [vmem:[#allocation2 + $0x24] sm:$0x1] }
  0x47   :  { %v1287_v0 = vor.u32 %v1286_v48, %v1283_v53  ;;  %v1292_v29 = vrot.slane %v1290_v47, 5  ;;  %v1306_v56 = vrot.slane %v1304_v50, 5  ;;  %v187_v36 = vsel %vm4078_vm6, %v116_v51, %v186_v55  ;;  %v195_v43 = vld [vmem:[#allocation2 + $0x2c] sm:$0x1]  ;;  %v3919_v45 = vld [vmem:[#allocation2 + $0x10] ss:$8 sps:$4 sm:$0xff]  }
  0x48   :  { %v1301_v44 = vor.u32 %v1300_v57, %v1297_v54  ;;  %188 = vst [vmem:[#allocation2 + $0x20] sm:$0xf] %v187_v36  ;;  %v190_v30 = vsel %vm4049_vm2, %v117_v58, %v189_v63  ;;  %v193_v34 = vsel %vm4078_vm6, %v124_v52, %v192_v41  ;;  %v196_v38 = vsel %vm4049_vm2, %v125_v59, %v195_v43  ;;  %v3349_v46 = vld [vmem:[%s5181_s0 + $0x2c] sm:$0xf]  ;;  %v3350_v47 = vld [vmem:[%s5181_s0 + $0x30] sm:$0xf] }
  0x49   :  { %v1288_v39 = vrot.slane %v1287_v0, 4  ;;  %191 = vst [vmem:[#allocation2 + $0x24] sm:$0x1] %v190_v30  ;;  %194 = vst [vmem:[#allocation2 + $0x28] sm:$0xf] %v193_v34  ;;  %v3932_v49 = vld [vmem:[%s5180_s2 + $0xe8] sm:$0xff]  }
  0x4a   :  { %197 = vst [vmem:[#allocation2 + $0x2c] sm:$0x1] %v196_v38  ;;  %v1302_v40 = vrot.slane %v1301_v44, 4  ;;  %v3933_v51 = vld [vmem:[%s5180_s2 + $0x168] sm:$0xff]   ;;  %3627 = vmatprep.subr.bf16.mxu1 %v3932_v49  ;;  %v3310_v48 = vrot.slane %v4137_v26, 9  ;;  %v708_v55 = vrot.slane %v4117_v9, 5 }
  0x4b   :  { %v1293_v42 = vsel %vm4125_vm9, %v1288_v39, %v1292_v29  ;;  %v3934_v53 = vld [vmem:[%s5180_s2 + $0xa8] sm:$0xff]   ;;  %3691 = vmatprep.subr.bf16.mxu0 %v3933_v51  ;;  %v1097_v57 = vshrl.u32 %v3349_v46, 16  ;;  %v1105_v58 = vshrl.u32 %v3350_v47, 16 }
  0x4c   :  { %v1307_v50 = vsel %vm4125_vm9, %v1302_v40, %v1306_v56  ;;  %v3935_v54 = vld [vmem:[%s5180_s2 + $0x128] sm:$0xff]   ;;  %3628 = vmatpush3.bf16.msra.mxu1 %v3934_v53  ;;  %v4349_v30 = vsel %vm4343_vm12, %v3310_v48, %v708_v55  ;;  %v1100_v40 = vshll.u32 %v3349_v46, 16  ;;  %v3937_v48 = vld [vmem:[%s5180_s2 + $0xf0] sm:$0xff]  }
  0x4d   :  { %v3359_v52 = vcombine.low %v1293_v42, %v1307_v50  ;;  %3692 = vmatpush3.bf16.msra.mxu0 %v3935_v54  ;;  %v1099_v42 = vrot.slane %v1097_v57, 7  ;;  %v1107_v49 = vrot.slane %v1105_v58, 7  ;;  %v1108_v50 = vshll.u32 %v3350_v47, 16  ;;  %3629 = vmatprep.subr.bf16.mxu1 %v3937_v48 }
  0x4f   :  { %2833 = vmatprep.mubr.bf16.mxu1 %v3359_v52  ;;  %v260_v59 = vld [vmem:[#allocation2 + $0x20] sm:$0xf]  ;;  %v1102_v47 = vor.u32 %v1100_v40, %v1099_v42  ;;  %v1110_v58 = vor.u32 %v1108_v50, %v1107_v49 }
  0x50   :  { %2834 = vmatmul.mubr.bf16.gmra.mrb[4].mxu1 %v3919_v45  ;;  %v261_v63 = vld [vmem:[#allocation2 + $0x24] sm:$0x1]  ;;  %v262_v0 = vld [vmem:[#allocation2 + $0x28] sm:$0xf]  ;;  %v328_v56 = vshrl.u32 %v260_v59, 16  ;;  %v331_v36 = vshll.u32 %v260_v59, 16 }
  0x51   :  { %v263_v29 = vld [vmem:[#allocation2 + $0x2c] sm:$0x1]  ;;  %v337_v26 = vshll.u32 %v261_v63, 16  ;;  %v342_v41 = vshrl.u32 %v262_v0, 16  ;;  %v345_v9 = vshll.u32 %v262_v0, 16  ;;  %v1103_v63 = vrot.slane %v1099_v42, 4 }
  0x52   :  { %v351_v44 = vshll.u32 %v263_v29, 16  ;;  %v330_v34 = vrot.slane %v328_v56, 4  ;;  %v333_v38 = vrot.slane %v331_v36, 5  ;;  %v1111_v0 = vrot.slane %v1107_v49, 4  ;;  %v4354_v29 = vld [vmem:[#allocation2 + $0x24] sm:$0x1] }
  0x53   :  { %v344_v39 = vrot.slane %v342_v41, 4  ;;  %v347_v45 = vrot.slane %v345_v9, 5  ;;  %v339_v52 = vrot.slane %v337_v26, 5  ;;  %v4356_v56 = vld [vmem:[#allocation2 + $0x24] sm:$0x1]  ;;  %v3938_v36 = vld [vmem:[%s5180_s2 + $0x170] sm:$0xff]  }
  0x54   :  { %v334_v51 = vor.u32 %v333_v38, %v330_v34  ;;  %v353_v54 = vrot.slane %v351_v44, 5  ;;  %v4358_v46 = vld [vmem:[#allocation2 + $0x24] sm:$0x1]  ;;  %v4367_v41 = vld [vmem:[#allocation2 + $0x20] sm:$0xe]  ;;  %3693 = vmatprep.subr.bf16.mxu0 %v3938_v36 }
  0x55   :  { %v348_v53 = vor.u32 %v347_v45, %v344_v39  ;;  %v4360_v57 = vld [vmem:[#allocation2 + $0x24] sm:$0x1]  ;;  %v4369_v9 = vld [vmem:[#allocation2 + $0x28] sm:$0xe]  ;;  %v4371_v44 = vld [vmem:[#allocation2 + $0x2c] sm:$0x1] }
  0x56   :  { %v335_v59 = vrot.slane %v334_v51, 4  ;;  %5219 = vst [vmem:[#allocation15_spill] sm:$0xff] %v4360_v57  ;;  %5220 = vst [vmem:[#allocation16_spill] sm:$0xff] %v4369_v9  ;;  %v4373_v34 = vld [vmem:[#allocation2 + $0x20] sm:$0xf] }
  0x57   :  { %v349_v55 = vrot.slane %v348_v53, 4  ;;  %5221 = vst [vmem:[#allocation17_spill] sm:$0xff] %v4371_v44  ;;  %v4375_v38 = vld [vmem:[#allocation2 + $0x28] sm:$0xf]  ;;  %v4377_v39 = vld [vmem:[#allocation2 + $0x20] sm:$0xf] }
  0x58   :  { %v340_v26 = vsel %vm4125_vm9, %v335_v59, %v339_v52  ;;  %5222 = vst [vmem:[#allocation18_spill] sm:$0xff] %v4375_v38  ;;  %v4379_v40 = vld [vmem:[#allocation2 + $0x28] sm:$0xf]  ;;  %v4381_v45 = vld [vmem:[#allocation2 + $0x2c] sm:$0x1] }
  0x59   :  { %v4383_v42 = vld [vmem:[#allocation2 + $0x20] sm:$0xe]  ;;  %v4385_v49 = vld [vmem:[#allocation2 + $0x28] sm:$0xe]  ;;  %v4387_v50 = vld [vmem:[#allocation2 + $0x2c] sm:$0x1]  ;;  %v354_v37 = vsel %vm4125_vm9, %v349_v55, %v353_v54 }
  0x5a   :  { %v4389_v51 = vld [vmem:[#allocation2 + $0x20] sm:$0xf]  ;;  %v4391_v52 = vld [vmem:[#allocation2 + $0x28] sm:$0xf]  ;;  %v4397_v23 = vld [vmem:[#allocation2 + $0x2c] sm:$0x1]  ;;  %v3288_v28 = vcombine.low %v340_v26, %v354_v37 }
  0x5b   :  { %5223 = vst [vmem:[#allocation19_spill] sm:$0xff] %v4389_v51  ;;  %5224 = vst [vmem:[#allocation20_spill] sm:$0xff] %v4391_v52  ;;  %v4393_v53 = vld [vmem:[#allocation2 + $0x20] sm:$0xf]  ;;  %v4395_v59 = vld [vmem:[#allocation2 + $0x28] sm:$0xf] }
  0x5c   :  { %5225 = vst [vmem:[#allocation21_spill] sm:$0xff] %v4393_v53  ;;  %5226 = vst [vmem:[#allocation22_spill] sm:$0xff] %v4395_v59  ;;  %v4399_v57 = vld [vmem:[#allocation2 + $0x20] sm:$0xe]  ;;  %v4403_v33 = vld [vmem:[#allocation2 + $0x24] sm:$0x1]  ;;  %2809 = vmatprep.mubr.bf16.mxu0 %v3288_v28 }
  0x5d   :  { %5227 = vst [vmem:[#allocation23_spill] sm:$0xff] %v4397_v23  ;;  %5228 = vst [vmem:[#allocation24_spill] sm:$0xff] %v4399_v57  ;;  %v4405_v32 = vld [vmem:[#allocation2 + $0x28] sm:$0xe]  ;;  %v4407_v31 = vld [vmem:[#allocation2 + $0x2c] sm:$0x1] }
  0x5e   :  { %5229 = vst [vmem:[#allocation25_spill] sm:$0xff] %v4403_v33  ;;  %5230 = vst [vmem:[#allocation26_spill] sm:$0xff] %v4405_v32  ;;  %v1170_v27 = vld [vmem:[#allocation2 + $0x20] sm:$0xf]  ;;  %v1173_v53 = vld [vmem:[#allocation2 + $0x24] sm:$0x1] }
  0x5f   :  { %5231 = vst [vmem:[#allocation27_spill] sm:$0xff] %v4407_v31  ;;  %v1176_v24 = vld [vmem:[#allocation2 + $0x28] sm:$0xf]  ;;  %v1171_v23 = vsel %vm4078_vm6, %v1102_v47, %v1170_v27  ;;  %v1174_v48 = vsel %vm4049_vm2, %v1103_v63, %v1173_v53  ;;  %v1179_v55 = vld [vmem:[#allocation2 + $0x2c] sm:$0x1] }
  0x60   :  { %v1177_v54 = vsel %vm4078_vm6, %v1110_v58, %v1176_v24  ;;  %1175 = vst [vmem:[#allocation2 + $0x24] sm:$0x1] %v1174_v48  ;;  %v1180_v32 = vsel %vm4049_vm2, %v1111_v0, %v1179_v55  ;;  %v3926_v36 = vld [vmem:[#allocation2 + $0x20] ss:$8 sps:$4 sm:$0xff]   ;;  %v43_v37 = vld [vmem:[#allocation2 + $0x30] sm:$0x1] }
  0x61   :  { %v46_v26 = vld [vmem:[#allocation2 + $0x38] sm:$0x1]  ;;  %1181 = vst [vmem:[#allocation2 + $0x2c] sm:$0x1] %v1180_v32  ;;  %1172 = vst [vmem:[#allocation2 + $0x20] sm:$0xf] %v1171_v23  ;;  %2810 = vmatmul.mubr.bf16.gmra.mrb[8].mxu0 %v3926_v36 }
  0x62   :  { %1178 = vst [vmem:[#allocation2 + $0x28] sm:$0xf] %v1177_v54  ;;  %v44_v27 = vsel %vm4049_vm2, 0, %v43_v37  ;;  %v47_v63 = vsel %vm4049_vm2, 0, %v46_v26  ;;  %v69_v47 = vld [vmem:[#allocation2 + $0x34] sm:$0x1] }
  0x63   :  { %v72_v24 = vld [vmem:[#allocation2 + $0x3c] sm:$0x1]  ;;  %45 = vst [vmem:[#allocation2 + $0x30] sm:$0x1] %v44_v27  ;;  %48 = vst [vmem:[#allocation2 + $0x38] sm:$0x1] %v47_v63 }
  0x64   :  { %v70_v28 = vsel %vm4059_vm4, 0, %v69_v47  ;;  %v73_v0 = vsel %vm4059_vm4, 0, %v72_v24  ;;  %v83_v23 = vld [vmem:[%s5181_s0 + $0x14] sm:$0xf]  ;;  %v84_v32 = vld [vmem:[%s5181_s0 + $0x18] sm:$0xf] }
  0x65   :  { %71 = vst [vmem:[#allocation2 + $0x34] sm:$0x1] %v70_v28  ;;  %74 = vst [vmem:[#allocation2 + $0x3c] sm:$0x1] %v73_v0  ;;  %v127_v58 = vshrl.u32 %v83_v23, 16  ;;  %v135_v53 = vshrl.u32 %v84_v32, 16 }
  0x66   :  { %v130_v48 = vshll.u32 %v83_v23, 16  ;;  %v138_v54 = vshll.u32 %v84_v32, 16  ;;  %v3940_v37 = vld [vmem:[%s5180_s2 + $0xb0] sm:$0xff]  }
  0x67   :  { %v129_v55 = vrot.slane %v127_v58, 7  ;;  %v137_v36 = vrot.slane %v135_v53, 7  ;;  %v1245_v26 = vld [vmem:[#allocation2 + $0x24] sm:$0x1]  ;;  %3630 = vmatpush3.bf16.msra.mxu1 %v3940_v37  ;;  %v3311_v37 = vrot.slane %v4241_v12, 9 }
  0x68   :  { %v1244_v63 = vld [vmem:[#allocation2 + $0x20] sm:$0xf]  ;;  %v1247_v24 = vld [vmem:[#allocation2 + $0x2c] sm:$0x1]  ;;  %v1318_v57 = vshll.u32 %v1245_v26, 16 }
  0x69   :  { %v133_v27 = vrot.slane %v129_v55, 4  ;;  %v1246_v47 = vld [vmem:[#allocation2 + $0x28] sm:$0xf]  ;;  %v132_v31 = vor.u32 %v130_v48, %v129_v55  ;;  %v140_v33 = vor.u32 %v138_v54, %v137_v36  ;;  %v1309_v28 = vshrl.u32 %v1244_v63, 16 }
  0x6a   :  { %v1312_v0 = vshll.u32 %v1244_v63, 16  ;;  %v1323_v59 = vshrl.u32 %v1246_v47, 16  ;;  %v1326_v23 = vshll.u32 %v1246_v47, 16  ;;  %v1332_v32 = vshll.u32 %v1247_v24, 16  ;;  %v198_v44 = vld [vmem:[#allocation2 + $0x30] sm:$0xf] }
  0x6b   :  { %v141_v58 = vrot.slane %v137_v36, 4  ;;  %v1311_v20 = vrot.slane %v1309_v28, 4  ;;  %v199_v48 = vsel %vm4078_vm6, %v132_v31, %v198_v44  ;;  %v204_v55 = vld [vmem:[#allocation2 + $0x38] sm:$0xf]  ;;  %v1320_v63 = vrot.slane %v1318_v57, 5 }
  0x6c   :  { %v1314_v38 = vrot.slane %v1312_v0, 5  ;;  %v1325_v17 = vrot.slane %v1323_v59, 4  ;;  %v1328_v9 = vrot.slane %v1326_v23, 5  ;;  %v201_v54 = vld [vmem:[#allocation2 + $0x34] sm:$0x1]  ;;  %v205_v47 = vsel %vm4078_vm6, %v140_v33, %v204_v55  ;;  %v3944_v0 = vld [vmem:[%s5180_s2 + $0xb8] sm:$0xff]  }
  0x6d   :  { %200 = vst [vmem:[#allocation2 + $0x30] sm:$0xf] %v199_v48  ;;  %v202_v36 = vsel %vm4049_vm2, %v133_v27, %v201_v54  ;;  %v207_v24 = vld [vmem:[#allocation2 + $0x3c] sm:$0x1]  ;;  %v3941_v59 = vld [vmem:[%s5180_s2 + $0x130] sm:$0xff]   ;;  %v1334_v31 = vrot.slane %v1332_v32, 5 }
  0x6e   :  { %v1315_v26 = vor.u32 %v1314_v38, %v1311_v20  ;;  %v1329_v28 = vor.u32 %v1328_v9, %v1325_v17  ;;  %203 = vst [vmem:[#allocation2 + $0x34] sm:$0x1] %v202_v36  ;;  %206 = vst [vmem:[#allocation2 + $0x38] sm:$0xf] %v205_v47  ;;  %v208_v12 = vsel %vm4049_vm2, %v141_v58, %v207_v24  ;;  %v3942_v20 = vld [vmem:[%s5180_s2 + $0xf8] sm:$0xff]   ;;  %3694 = vmatpush3.bf16.msra.mxu0 %v3941_v59 }
  0x6f   :  { %209 = vst [vmem:[#allocation2 + $0x3c] sm:$0x1] %v208_v12  ;;  %v3351_v33 = vld [vmem:[%s5181_s0 + $0x34] sm:$0xf]  ;;  %v4457_v17 = vld [vmem:[%s5181_s0 + $0x38] sm:$0xf]  ;;  %3631 = vmatprep.subr.bf16.mxu1 %v3942_v20 }
  0x70   :  { %v1316_v57 = vrot.slane %v1315_v26, 4  ;;  %v3943_v9 = vld [vmem:[%s5180_s2 + $0x178] sm:$0xff]   ;;  %v1330_v44 = vrot.slane %v1329_v28, 4  ;;  %v3929_v38 = vld [vmem:[#allocation2 + $0x20] ss:$8 sps:$4 sm:$0xff]   ;;  %v712_v23 = vrot.slane %v4221_v62, 5  ;;  %3632 = vmatpush3.bf16.msra.mxu1 %v3944_v0 }
  0x71   :  { %3695 = vmatprep.subr.bf16.mxu0 %v3943_v9  ;;  %v3945_v58 = vld [vmem:[%s5180_s2 + $0x138] sm:$0xff]   ;;  %v1121_v62 = vshrl.u32 %v4457_v17, 16  ;;  %v546_v0 = vshll.u32 %v4135_v25, 16 }
  0x72   :  { %v1321_v27 = vsel %vm4125_vm9, %v1316_v57, %v1320_v63  ;;  %v1335_v32 = vsel %vm4125_vm9, %v1330_v44, %v1334_v31  ;;  %v4477_v55 = vsel %vm4343_vm12, %v3311_v37, %v712_v23  ;;  %v1113_v63 = vshrl.u32 %v3351_v33, 16  ;;  %3696 = vmatpush3.bf16.msra.mxu0 %v3945_v58 }
  0x73   :  { %v3360_v54 = vcombine.low %v1321_v27, %v1335_v32  ;;  %v543_v37 = vshrl.u32 %v4135_v25, 16  ;;  %v1116_v58 = vshll.u32 %v3351_v33, 16 }
  0x74   :  { %v264_v26 = vld [vmem:[#allocation2 + $0x30] sm:$0xf]  ;;  %v1115_v53 = vrot.slane %v1113_v63, 7 }
  0x75   :  { %2841 = vmatprep.mubr.bf16.mxu1 %v3360_v54  ;;  %v265_v47 = vld [vmem:[#allocation2 + $0x34] sm:$0x1]  ;;  %v266_v24 = vld [vmem:[#allocation2 + $0x38] sm:$0xf]  ;;  %v356_v59 = vshrl.u32 %v264_v26, 16  ;;  %v359_v28 = vshll.u32 %v264_v26, 16 }
  0x76   :  { %2842 = vmatmul.mubr.bf16.gmra.mrb[8].mxu1 %v3929_v38  ;;  %v267_v31 = vld [vmem:[#allocation2 + $0x3c] sm:$0x1]  ;;  %v365_v12 = vshll.u32 %v265_v47, 16  ;;  %v370_v20 = vshrl.u32 %v266_v24, 16  ;;  %v373_v57 = vshll.u32 %v266_v24, 16  ;;  %v552_v26 = vshll.u32 %v4115_v8, 16 }
  0x77   :  { %v358_v9 = vrot.slane %v356_v59, 4  ;;  %v361_v44 = vrot.slane %v359_v28, 5  ;;  %v379_v27 = vshll.u32 %v267_v31, 16  ;;  %v1123_v47 = vrot.slane %v1121_v62, 7  ;;  %v4488_v33 = vld [vmem:[#allocation2 + $0x30] sm:$0xf] }
  0x78   :  { %v372_v23 = vrot.slane %v370_v20, 4  ;;  %v375_v32 = vrot.slane %v373_v57, 5  ;;  %v367_v48 = vrot.slane %v365_v12, 5  ;;  %v1124_v24 = vshll.u32 %v4457_v17, 16  ;;  %v4490_v12 = vld [vmem:[#allocation2 + $0x38] sm:$0xf] }
  0x79   :  { %v362_v54 = vor.u32 %v361_v44, %v358_v9  ;;  %v381_v36 = vrot.slane %v379_v27, 5  ;;  %v545_v51 = vrot.slane %v543_v37, 4  ;;  %v548_v59 = vrot.slane %v546_v0, 5  ;;  %v4497_v20 = vld [vmem:[#allocation2 + $0x30] sm:$0xe] }
  0x7a   :  { %v376_v38 = vor.u32 %v375_v32, %v372_v23  ;;  %v1119_v31 = vrot.slane %v1115_v53, 4  ;;  %v1127_v19 = vrot.slane %v1123_v47, 4  ;;  %v1118_v63 = vor.u32 %v1116_v58, %v1115_v53  ;;  %5232 = vst [vmem:[#allocation28_spill] sm:$0xff] %v4497_v20  ;;  %v4499_v57 = vld [vmem:[#allocation2 + $0x34] sm:$0x1] }
  0x7b   :  { %v363_v52 = vrot.slane %v362_v54, 4  ;;  %v4492_v8 = vrot.slane %v552_v26, 5  ;;  %v557_v62 = vshrl.u32 %v4235_v5, 16  ;;  %5233 = vst [vmem:[#allocation29_spill] sm:$0xff] %v4499_v57  ;;  %v4501_v37 = vld [vmem:[#allocation2 + $0x38] sm:$0xe]  ;;  %v549_v20 = vor.u32 %v548_v59, %v545_v51 }
  0x7c   :  { %v377_v28 = vrot.slane %v376_v38, 4  ;;  %5234 = vst [vmem:[#allocation30_spill] sm:$0xff] %v4501_v37  ;;  %v4503_v9 = vld [vmem:[#allocation2 + $0x3c] sm:$0x1]  ;;  %v4509_v53 = vld [vmem:[#allocation2 + $0x30] sm:$0xf] }
  0x7d   :  { %v368_v25 = vsel %vm4125_vm9, %v363_v52, %v367_v48  ;;  %5235 = vst [vmem:[#allocation31_spill] sm:$0xff] %v4503_v9  ;;  %v4505_v52 = vld [vmem:[#allocation2 + $0x30] sm:$0xf]  ;;  %v4507_v48 = vld [vmem:[#allocation2 + $0x38] sm:$0xf]  ;;  %v550_v16 = vrot.slane %v549_v20, 4 }
  0x7e   :  { %v382_v17 = vsel %vm4125_vm9, %v377_v28, %v381_v36  ;;  %5236 = vst [vmem:[#allocation32_spill] sm:$0xff] %v4505_v52  ;;  %5237 = vst [vmem:[#allocation33_spill] sm:$0xff] %v4507_v48  ;;  %v4511_v44 = vld [vmem:[#allocation2 + $0x34] sm:$0x1]  ;;  %v4513_v27 = vld [vmem:[#allocation2 + $0x38] sm:$0xf]  ;;  %v1126_v28 = vor.u32 %v1124_v24, %v1123_v47 }
  0x7f   :  { %v4515_v0 = vld [vmem:[#allocation2 + $0x3c] sm:$0x1]  ;;  %v4517_v36 = vld [vmem:[#allocation2 + $0x30] sm:$0xe]  ;;  %v4519_v23 = vld [vmem:[#allocation2 + $0x34] sm:$0x1]  ;;  %v3289_v48 = vcombine.low %v368_v25, %v382_v17 }
  0x80   :  { %v4521_v32 = vld [vmem:[#allocation2 + $0x38] sm:$0xe]  ;;  %v4523_v58 = vld [vmem:[#allocation2 + $0x3c] sm:$0x1]  ;;  %v4525_v54 = vld [vmem:[#allocation2 + $0x30] sm:$0xf] }
  0x81   :  { %5238 = vst [vmem:[#allocation34_spill] sm:$0xff] %v4523_v58  ;;  %5239 = vst [vmem:[#allocation35_spill] sm:$0xff] %v4525_v54  ;;  %v4527_v26 = vld [vmem:[#allocation2 + $0x34] sm:$0x1]  ;;  %v4529_v38 = vld [vmem:[#allocation2 + $0x38] sm:$0xf]  ;;  %2817 = vmatprep.mubr.bf16.mxu0 %v3289_v48 }
  0x82   :  { %5240 = vst [vmem:[#allocation36_spill] sm:$0xff] %v4527_v26  ;;  %5241 = vst [vmem:[#allocation37_spill] sm:$0xff] %v4529_v38  ;;  %v4533_v9 = vld [vmem:[#allocation2 + $0x3c] sm:$0x1]  ;;  %v4535_v37 = vld [vmem:[#allocation2 + $0x30] sm:$0xe] }
  0x83   :  { %v4537_v57 = vld [vmem:[#allocation2 + $0x34] sm:$0x1]  ;;  %v4539_v52 = vld [vmem:[#allocation2 + $0x38] sm:$0xe]  ;;  %v4541_v58 = vld [vmem:[#allocation2 + $0x3c] sm:$0x1] }
  0x84   :  { %v1182_v54 = vld [vmem:[#allocation2 + $0x30] sm:$0xf]  ;;  %v1185_v47 = vld [vmem:[#allocation2 + $0x34] sm:$0x1]  ;;  %v1188_v24 = vld [vmem:[#allocation2 + $0x38] sm:$0xf] }
  0x85   :  { %v1183_v38 = vsel %vm4078_vm6, %v1118_v63, %v1182_v54  ;;  %v1191_v26 = vld [vmem:[#allocation2 + $0x3c] sm:$0x1]  ;;  %v1186_v25 = vsel %vm4049_vm2, %v1119_v31, %v1185_v47  ;;  %v1189_v17 = vsel %vm4078_vm6, %v1126_v28, %v1188_v24  ;;  %v3936_v59 = vld [vmem:[#allocation2 + $0x30] ss:$8 sps:$4 sm:$0xff]   ;;  %v559_v63 = vrot.slane %v557_v62, 4  ;;  %v3946_v48 = vld [vmem:[%s5180_s2 + $0x1c0] sm:$0xff]  }
  0x86   :  { %v1192_v51 = vsel %vm4049_vm2, %v1127_v19, %v1191_v26  ;;  %1187 = vst [vmem:[#allocation2 + $0x34] sm:$0x1] %v1186_v25  ;;  %1184 = vst [vmem:[#allocation2 + $0x30] sm:$0xf] %v1183_v38  ;;  %v560_v54 = vshll.u32 %v4235_v5, 16  ;;  %2818 = vmatmul.mubr.bf16.gmra.mrb[12].mxu0 %v3936_v59  ;;  %v566_v28 = vshll.u32 %v4219_v61, 16  ;;  %v5242_v26 = vcombine.low %v4349_v30, %v4477_v55 }
  0x87   :  { %1193 = vst [vmem:[#allocation2 + $0x3c] sm:$0x1] %v1192_v51  ;;  %1190 = vst [vmem:[#allocation2 + $0x38] sm:$0xf] %v1189_v17  ;;  %v403_v31 = vld [vmem:[#allocation2] sm:$0xe]  ;;  %3745 = vmatprep.subr.bf16.mxu1 %v3946_v48 }
  0x88   :  { %v404_v47 = vld [vmem:[#allocation2 + $0x4] sm:$0x1]  ;;  %v3291_v19 = vrot.slane %v4131_v21, 9  ;;  %2987 = vmatprep.mubr.bf16.mxu0 %v5242_v26  ;;  %v562_v38 = vrot.slane %v560_v54, 5  ;;  %v3290_v62 = vrot.slane %v403_v31, 9  ;;  %v444_v5 = vrot.slane %v4113_v6, 5 }
  0x89   :  { %v440_v20 = vrot.slane %v404_v47, 5  ;;  %v3948_v24 = vld [vmem:[%s5180_s2 + $0x240] sm:$0xff]   ;;  %v3312_v25 = vrot.slane %v4243_v14, 9  ;;  %v716_v17 = vrot.slane %v4245_v15, 5  ;;  %v568_v21 = vrot.slane %v566_v28, 5 }
  0x8a   :  { %v563_v61 = vor.u32 %v562_v38, %v559_v63  ;;  %3809 = vmatprep.subr.bf16.mxu0 %v3948_v24  ;;  %v3313_v30 = vrot.slane %v4383_v42, 9  ;;  %v720_v55 = vrot.slane %v4358_v46, 5  ;;  %v571_v51 = vshrl.u32 %v4237_v7, 16 }
  0x8b   :  { %v717_v6 = vsel %vm4343_vm12, %v3312_v25, %v716_v17  ;;  %v574_v54 = vshll.u32 %v4237_v7, 16  ;;  %v580_v48 = vshll.u32 %v4239_v10, 16  ;;  %v555_v15 = vsel %vm4125_vm9, %v550_v16, %v4492_v8 }
  0x8c   :  { %v564_v59 = vrot.slane %v563_v61, 4  ;;  %v4578_v46 = vsel %vm4343_vm12, %v3290_v62, %v440_v20  ;;  %v4582_v42 = vsel %vm4343_vm12, %v3291_v19, %v444_v5  ;;  %v721_v7 = vsel %vm4343_vm12, %v3313_v30, %v720_v55  ;;  %v3949_v19 = vld [vmem:[%s5180_s2 + $0x200] sm:$0xff]  }
  0x8d   :  { %v1248_v14 = vld [vmem:[#allocation2 + $0x30] sm:$0xf]  ;;  %v1249_v63 = vld [vmem:[#allocation2 + $0x34] sm:$0x1]  ;;  %v3319_v8 = vcombine.low %v717_v6, %v721_v7  ;;  %v588_v7 = vshll.u32 %v4377_v39, 16 }
  0x8e   :  { %v1250_v31 = vld [vmem:[#allocation2 + $0x38] sm:$0xf]  ;;  %v1251_v28 = vld [vmem:[#allocation2 + $0x3c] sm:$0x1]  ;;  %v1337_v10 = vshrl.u32 %v1248_v14, 16  ;;  %v1340_v47 = vshll.u32 %v1248_v14, 16  ;;  %v569_v16 = vsel %vm4125_vm9, %v564_v59, %v568_v21 }
  0x8f   :  { %v1346_v26 = vshll.u32 %v1249_v63, 16  ;;  %v1351_v38 = vshrl.u32 %v1250_v31, 16  ;;  %v1354_v24 = vshll.u32 %v1250_v31, 16  ;;  %v1360_v25 = vshll.u32 %v1251_v28, 16  ;;  %v3952_v63 = vld [vmem:[%s5180_s2 + $0x248] sm:$0xff]  }
  0x90   :  { %v1339_v62 = vrot.slane %v1337_v10, 4  ;;  %v1342_v20 = vrot.slane %v1340_v47, 5  ;;  %v3306_v55 = vcombine.low %v555_v15, %v569_v16  ;;  %v573_v14 = vrot.slane %v571_v51, 4 }
  0x91   :  { %v1348_v61 = vrot.slane %v1346_v26, 5  ;;  %v1353_v17 = vrot.slane %v1351_v38, 4  ;;  %v1356_v5 = vrot.slane %v1354_v24, 5  ;;  %v1362_v30 = vrot.slane %v1360_v25, 5  ;;  %v3939_v24 = vld [vmem:[#allocation2 + $0x30] ss:$8 sps:$4 sm:$0xff]  }
  0x92   :  { %v1343_v31 = vor.u32 %v1342_v20, %v1339_v62  ;;  %v576_v28 = vrot.slane %v574_v54, 5  ;;  %v582_v21 = vrot.slane %v580_v48, 5  ;;  %v585_v59 = vshrl.u32 %v4377_v39, 16  ;;  %2988 = vmatmul.mubr.bf16.vlgmr.msra.gmra.mrb[16].mxu0 %v3306_v55  ;;  %v3953_v54 = vld [vmem:[%s5180_s2 + $0x208] sm:$0xff]  }
  0x93   :  { %v1357_v6 = vor.u32 %v1356_v5, %v1353_v17  ;;  %v594_v10 = vshll.u32 %v4356_v56, 16  ;;  %v3292_v47 = vrot.slane %v4227_v1, 9  ;;  %3810 = vmatpush3.bf16.msra.mxu0 %v3949_v19  ;;  %2995 = vmatprep.mubr.bf16.mxu0 %v3319_v8  ;;  %v448_v38 = vrot.slane %v4217_v60, 5 }
  0x94   :  { %v1344_v26 = vrot.slane %v1343_v31, 4  ;;  %v577_v51 = vor.u32 %v576_v28, %v573_v14  ;;  %v587_v15 = vrot.slane %v585_v59, 4  ;;  %v590_v25 = vrot.slane %v588_v7, 5  ;;  %3811 = vmatprep.subr.bf16.mxu0 %v3952_v63  ;;  %v3956_v31 = vld [vmem:[%s5180_s2 + $0x250] sm:$0xff]  }
  0x95   :  { %v1358_v48 = vrot.slane %v1357_v6, 4  ;;  %v596_v16 = vrot.slane %v594_v10, 5  ;;  %v3293_v39 = vrot.slane %v4229_v2, 9  ;;  %v452_v8 = vrot.slane %v4231_v3, 5  ;;  %v3951_v3 = vld [vmem:[%s5180_s2 + $0x188] sm:$0xff]  }
  0x96   :  { %v1349_v56 = vsel %vm4125_vm9, %v1344_v26, %v1348_v61  ;;  %v578_v62 = vrot.slane %v577_v51, 4  ;;  %v591_v17 = vor.u32 %v590_v25, %v587_v15  ;;  %v3314_v19 = vrot.slane %v4385_v49, 9  ;;  %v75_v25 = vld [vmem:[#allocation2 + $0x44] sm:$0x1] }
  0x97   :  { %v1363_v20 = vsel %vm4125_vm9, %v1358_v48, %v1362_v30  ;;  %v724_v5 = vrot.slane %v4387_v50, 5  ;;  %v3298_v14 = vcombine.low %v4578_v46, %v4582_v42  ;;  %v3303_v63 = vcombine.low %v4233_v4, %v4373_v34  ;;  %3812 = vmatpush3.bf16.msra.mxu0 %v3953_v54  ;;  %v5248_v34 = vld [vmem:[#allocation32_spill] sm:$0xff] }
  0x98   :  { %v3361_v55 = vcombine.low %v1349_v56, %v1363_v20  ;;  %v3315_v61 = vrot.slane %v4517_v36, 9  ;;  %v583_v30 = vsel %vm4125_vm9, %v578_v62, %v582_v21  ;;  %v592_v49 = vrot.slane %v591_v17, 4  ;;  %3813 = vmatprep.subr.bf16.mxu0 %v3956_v31 }
  0x99   :  { %v725_v50 = vsel %vm4343_vm12, %v3314_v19, %v724_v5  ;;  %v728_v28 = vrot.slane %v4519_v23, 5  ;;  %v599_v59 = vshrl.u32 %v4379_v40, 16  ;;  %v602_v6 = vshll.u32 %v4379_v40, 16  ;;  %v3957_v40 = vld [vmem:[%s5180_s2 + $0x210] sm:$0xff]  }
  0x9a   :  { %2849 = vmatprep.mubr.bf16.mxu1 %v3361_v55  ;;  %v608_v36 = vshll.u32 %v4381_v45, 16  ;;  %v613_v7 = vshrl.u32 %v4509_v53, 16  ;;  %v597_v21 = vsel %vm4125_vm9, %v592_v49, %v596_v16  ;;  %v616_v26 = vshll.u32 %v4509_v53, 16  ;;  %v5244_v19 = vld [vmem:[#allocation16_spill] sm:$0xff] }
  0x9b   :  { %2850 = vmatmul.mubr.bf16.gmra.mrb[12].mxu1 %v3939_v24  ;;  %v729_v10 = vsel %vm4343_vm12, %v3315_v61, %v728_v28  ;;  %v622_v23 = vshll.u32 %v4511_v44, 16  ;;  %v5243_v45 = vcombine.low %v4133_v22, %v4180_v11  ;;  %v3307_v51 = vcombine.low %v583_v30, %v597_v21  ;;  %v49_v24 = vld [vmem:[#allocation2 + $0x40] sm:$0x1]  ;;  %3814 = vmatpush3.bf16.msra.mxu0 %v3957_v40  ;;  %v85_v44 = vld [vmem:[%s5181_s0 + $0x1c] sm:$0xf] }
  0x9c   :  { %v3320_v15 = vcombine.low %v725_v50, %v729_v10  ;;  %v601_v54 = vrot.slane %v599_v59, 4  ;;  %v604_v48 = vrot.slane %v602_v6, 5  ;;  %v610_v16 = vrot.slane %v608_v36, 5  ;;  %v3947_v22 = vld [vmem:[%s5180_s2 + $0x180] sm:$0xff]   ;;  %v5245_v61 = vld [vmem:[#allocation17_spill] sm:$0xff] }
  0x9d   :  { %2890 = vmatprep.mubr.bf16.mxu1 %v5243_v45  ;;  %v615_v56 = vrot.slane %v613_v7, 4  ;;  %v618_v62 = vrot.slane %v616_v26, 5  ;;  %v624_v53 = vrot.slane %v622_v23, 5  ;;  %2996 = vmatmul.mubr.bf16.gmra.mrb[20].mxu0 %v3307_v51  ;;  %v3294_v20 = vrot.slane %v4367_v41, 9  ;;  %v3960_v28 = vld [vmem:[%s5180_s2 + $0x258] sm:$0xff]   ;;  %v3950_v7 = vld [vmem:[%s5180_s2 + $0x1c8] sm:$0xff]  }
  0x9e   :  { %v605_v11 = vor.u32 %v604_v48, %v601_v54  ;;  %v456_v17 = vrot.slane %v4354_v29, 5  ;;  %v3295_v5 = vrot.slane %v5244_v19, 9  ;;  %3003 = vmatprep.mubr.bf16.mxu0 %v3320_v15  ;;  %v460_v31 = vrot.slane %v5245_v61, 5  ;;  %v3961_v36 = vld [vmem:[%s5180_s2 + $0x218] sm:$0xff]   ;;  %3815 = vmatprep.subr.bf16.mxu0 %v3960_v28 }
  0x9f   :  { %v619_v55 = vor.u32 %v618_v62, %v615_v56  ;;  %v50_v30 = vsel %vm4049_vm2, 0, %v49_v24  ;;  %v76_v50 = vsel %vm4059_vm4, 0, %v75_v25  ;;  %v143_v41 = vshrl.u32 %v85_v44, 16  ;;  %v4679_v23 = vld [vmem:[%s5181_s0 + $0x3c] sm:$0xf]  ;;  %3816 = vmatpush3.bf16.msra.mxu0 %v3961_v36  ;;  %v3955_v24 = vld [vmem:[%s5180_s2 + $0x190] sm:$0xff]  }
  0xa0   :  { %v606_v59 = vrot.slane %v605_v11, 4  ;;  %v4658_v29 = vsel %vm4343_vm12, %v3294_v20, %v456_v17  ;;  %51 = vst [vmem:[#allocation2 + $0x40] sm:$0x1] %v50_v30  ;;  %77 = vst [vmem:[#allocation2 + $0x44] sm:$0x1] %v76_v50  ;;  %v146_v6 = vshll.u32 %v85_v44, 16  ;;  %v449_v21 = vsel %vm4343_vm12, %v3292_v47, %v448_v38 }
  0xa1   :  { %v620_v10 = vrot.slane %v619_v55, 4  ;;  %v4674_v26 = vsel %vm4343_vm12, %v3295_v5, %v460_v31  ;;  %v145_v1 = vrot.slane %v143_v41, 7  ;;  %v627_v47 = vshrl.u32 %v4513_v27, 16  ;;  %v4719_v62 = vld [vmem:[#allocation2 + $0x8] sm:$0xe]  ;;  %v3958_v17 = vld [vmem:[%s5180_s2 + $0x1d8] sm:$0xff]  }
  0xa2   :  { %v611_v40 = vsel %vm4125_vm9, %v606_v59, %v610_v16  ;;  %v3300_v60 = vcombine.low %v4658_v29, %v4674_v26  ;;  %v453_v38 = vsel %vm4343_vm12, %v3293_v39, %v452_v8  ;;  %v630_v51 = vshll.u32 %v4513_v27, 16  ;;  %v3954_v27 = vld [vmem:[%s5180_s2 + $0x1d0] sm:$0xff]   ;;  %v5247_v8 = vld [vmem:[#allocation34_spill] sm:$0xff]  ;;  %v5251_v19 = vld [vmem:[#allocation29_spill] sm:$0xff] }
  0xa3   :  { %2891 = vmatmul.mubr.bf16.vlgmr.msra.gmra.mrb[16].mxu1 %v3298_v14  ;;  %v625_v45 = vsel %vm4125_vm9, %v620_v10, %v624_v53  ;;  %v636_v15 = vshll.u32 %v4515_v0, 16  ;;  %v148_v46 = vor.u32 %v146_v6, %v145_v1  ;;  %v149_v42 = vrot.slane %v145_v1, 4  ;;  %v5250_v16 = vld [vmem:[#allocation28_spill] sm:$0xff]  ;;  %v4721_v53 = vld [vmem:[#allocation2 + $0xc] sm:$0x1]  ;;  %v5252_v55 = vld [vmem:[#allocation30_spill] sm:$0xff] }
  0xa4   :  { %3746 = vmatpush3.bf16.msra.mxu1 %v3947_v22  ;;  %2898 = vmatprep.mubr.bf16.mxu1 %v3303_v63  ;;  %v3308_v2 = vcombine.low %v611_v40, %v625_v45  ;;  %v629_v39 = vrot.slane %v627_v47, 4  ;;  %v3316_v0 = vrot.slane %v4521_v32, 9  ;;  %v732_v14 = vrot.slane %v5247_v8, 5  ;;  %v5249_v63 = vld [vmem:[#allocation18_spill] sm:$0xff]  ;;  %v5253_v50 = vld [vmem:[#allocation31_spill] sm:$0xff]  ;;  %v3959_v10 = vld [vmem:[%s5180_s2 + $0x198] sm:$0xff]  }
  0xa5   :  { %3747 = vmatprep.subr.bf16.mxu1 %v3950_v7  ;;  %v632_v54 = vrot.slane %v630_v51, 5  ;;  %v1129_v4 = vshrl.u32 %v4679_v23, 16  ;;  %v3304_v48 = vcombine.low %v5249_v63, %v5248_v34  ;;  %v4716_v25 = vrot.slane %v636_v15, 5  ;;  %v4735_v59 = vld [vmem:[#allocation2 + $0x10] sm:$0xe]  ;;  %v3965_v34 = vld [vmem:[%s5180_s2 + $0x260] sm:$0xff]  }
  0xa6   :  { %3004 = vmatmul.mubr.bf16.gmra.mrb[24].mxu0 %v3308_v2  ;;  %v3296_v56 = vrot.slane %v5250_v16, 9  ;;  %v3299_v44 = vcombine.low %v449_v21, %v453_v38  ;;  %v464_v5 = vrot.slane %v5251_v19, 5  ;;  %v3297_v61 = vrot.slane %v5252_v55, 9  ;;  %v4737_v41 = vld [vmem:[#allocation2 + $0x14] sm:$0x1]  ;;  %v3963_v2 = vld [vmem:[%s5180_s2 + $0x1e0] sm:$0xff]   ;;  %3817 = vmatprep.subr.bf16.mxu0 %v3965_v34 }
  0xa7   :  { %v210_v22 = vld [vmem:[#allocation2 + $0x40] sm:$0xf]  ;;  %v213_v11 = vld [vmem:[#allocation2 + $0x44] sm:$0x1]  ;;  %v633_v20 = vor.u32 %v632_v54, %v629_v39  ;;  %v4732_v49 = vrot.slane %v1129_v4, 7  ;;  %v468_v28 = vrot.slane %v5253_v50, 5 }
  0xa8   :  { %3748 = vmatpush3.bf16.msra.mxu1 %v3951_v3  ;;  %v211_v31 = vsel %vm4078_vm6, %v148_v46, %v210_v22  ;;  %v214_v30 = vsel %vm4049_vm2, %v149_v42, %v213_v11  ;;  %v1504_v6 = vld [vmem:[#allocation2 + $0x8] sm:$0xf]  ;;  %v1505_v36 = vld [vmem:[#allocation2 + $0xc] sm:$0x1]  ;;  %v3382_v40 = vrot.slane %v4719_v62, 9  ;;  %v1686_v38 = vrot.slane %v4721_v53, 5 }
  0xa9   :  { %3749 = vmatprep.subr.bf16.mxu1 %v3954_v27  ;;  %212 = vst [vmem:[#allocation2 + $0x40] sm:$0xf] %v211_v31  ;;  %215 = vst [vmem:[#allocation2 + $0x44] sm:$0x1] %v214_v30  ;;  %v4739_v7 = vrot.slane %v633_v20, 4  ;;  %v1135_v21 = vrot.slane %v4732_v49, 4 }
  0xaa   :  { %v1506_v1 = vld [vmem:[#allocation2 + $0x10] sm:$0xf]  ;;  %v1521_v47 = vshrl.u32 %v1504_v6, 16  ;;  %v4747_v45 = vld [vmem:[#allocation2 + $0x14] sm:$0x1]  ;;  %v1524_v51 = vshll.u32 %v1504_v6, 16  ;;  %v1687_v13 = vsel %vm4343_vm12, %v3382_v40, %v1686_v38 }
  0xab   :  { %2899 = vmatmul.mubr.bf16.gmra.mrb[20].mxu1 %v3299_v44  ;;  %v1530_v15 = vshll.u32 %v1505_v36, 16  ;;  %v1535_v3 = vshrl.u32 %v1506_v1, 16  ;;  %v1538_v42 = vshll.u32 %v1506_v1, 16  ;;  %v3383_v39 = vrot.slane %v4735_v59, 9  ;;  %v4753_v4 = vld [vmem:[#allocation2] sm:$0xe] }
  0xac   :  { %2906 = vmatprep.mubr.bf16.mxu1 %v3304_v48  ;;  %3750 = vmatpush3.bf16.msra.mxu1 %v3955_v24  ;;  %v1523_v46 = vrot.slane %v1521_v47, 4  ;;  %v1526_v27 = vrot.slane %v1524_v51, 5  ;;  %v1690_v63 = vrot.slane %v4737_v41, 5  ;;  %v1544_v48 = vshll.u32 %v4747_v45, 16  ;;  %v3964_v24 = vld [vmem:[%s5180_s2 + $0x1a0] sm:$0xff]   ;;  %v5254_v45 = vld [vmem:[#allocation33_spill] sm:$0xff] }
  0xad   :  { %3751 = vmatprep.subr.bf16.mxu1 %v3958_v17  ;;  %v1537_v54 = vrot.slane %v1535_v3, 4  ;;  %v4759_v16 = vrot.slane %v1530_v15, 5  ;;  %v1540_v44 = vrot.slane %v1538_v42, 5  ;;  %v1385_v11 = vld [vmem:[#allocation2 + $0x4] sm:$0x1]  ;;  %v3362_v17 = vrot.slane %v4753_v4, 9 }
  0xae   :  { %v1527_v22 = vor.u32 %v1526_v27, %v1523_v46  ;;  %v1386_v20 = vld [vmem:[#allocation2 + $0x8] sm:$0xe]  ;;  %v3966_v19 = vld [vmem:[%s5180_s2 + $0x220] sm:$0xff]   ;;  %v733_v41 = vsel %vm4343_vm12, %v3316_v0, %v732_v14  ;;  %v465_v36 = vsel %vm4343_vm12, %v3296_v56, %v464_v5  ;;  %v1387_v42 = vld [vmem:[#allocation2 + $0xc] sm:$0x1]  ;;  %v1418_v0 = vrot.slane %v1385_v11, 5 }
  0xaf   :  { %v1541_v46 = vor.u32 %v1540_v44, %v1537_v54  ;;  %3818 = vmatpush3.bf16.msra.mxu0 %v3966_v19  ;;  %v3363_v54 = vrot.slane %v1386_v20, 9  ;;  %v3968_v44 = vld [vmem:[%s5180_s2 + $0x1e8] sm:$0xff]   ;;  %v1422_v11 = vrot.slane %v1387_v42, 5  ;;  %v1656_v19 = vld [vmem:[#allocation2 + $0x18] sm:$0xe]  ;;  %v1132_v53 = vshll.u32 %v4679_v23, 16 }
  0xb0   :  { %v688_v31 = vld [vmem:[#allocation2 + $0x40] sm:$0xe]  ;;  %v689_v30 = vld [vmem:[#allocation2 + $0x44] sm:$0x1]  ;;  %3752 = vmatpush3.bf16.msra.mxu1 %v3959_v10  ;;  %v469_v10 = vsel %vm4343_vm12, %v3297_v61, %v468_v28  ;;  %v3969_v61 = vld [vmem:[%s5180_s2 + $0x1a8] sm:$0xff]   ;;  %v1419_v40 = vsel %vm4343_vm12, %v3362_v17, %v1418_v0  ;;  %v3384_v38 = vrot.slane %v1656_v19, 9 }
  0xb1   :  { %v497_v6 = vld [vmem:[#allocation2 + $0x40] sm:$0xf]  ;;  %v3317_v1 = vrot.slane %v688_v31, 9  ;;  %v736_v47 = vrot.slane %v689_v30, 5  ;;  %v541_v3 = vld [vmem:[#allocation2 + $0x44] sm:$0x1]  ;;  %3753 = vmatprep.subr.bf16.mxu1 %v3963_v2  ;;  %v3301_v20 = vcombine.low %v465_v36, %v469_v10  ;;  %v1423_v59 = vsel %vm4343_vm12, %v3363_v54, %v1422_v11 }
  0xb2   :  { %v3305_v51 = vcombine.low %v5254_v45, %v497_v6  ;;  %v540_v15 = vld [vmem:[#allocation2 + $0x40] sm:$0xf]  ;;  %v650_v27 = vshll.u32 %v541_v3, 16  ;;  %v4778_v4 = vld [vmem:[#allocation2 + $0x44] sm:$0x1]  ;;  %v4793_v2 = vrot.slane %v1527_v22, 4 }
  0xb3   :  { %v641_v8 = vshrl.u32 %v540_v15, 16  ;;  %v644_v32 = vshll.u32 %v540_v15, 16  ;;  %2907 = vmatmul.mubr.bf16.gmra.mrb[24].mxu1 %v3300_v60  ;;  %v737_v14 = vsel %vm4343_vm12, %v3317_v1, %v736_v47  ;;  %v4785_v56 = vld [vmem:[#allocation2 + $0x44] sm:$0x1]  ;;  %v4802_v50 = vrot.slane %v1541_v46, 4  ;;  %v3970_v1 = vld [vmem:[%s5180_s2 + $0x268] sm:$0xff]  }
  0xb4   :  { %v1197_v5 = vld [vmem:[#allocation2 + $0x44] sm:$0x1]  ;;  %v3321_v34 = vcombine.low %v733_v41, %v737_v14  ;;  %2914 = vmatprep.mubr.bf16.mxu1 %v3305_v51  ;;  %v652_v60 = vrot.slane %v650_v27, 5  ;;  %3754 = vmatpush3.bf16.msra.mxu1 %v3964_v24  ;;  %v3962_v22 = vld [vmem:[#allocation2 + $0x8] ss:$8 sps:$4 sm:$0xff]   ;;  %v4807_v24 = vrot.slane %v1544_v48, 5  ;;  %v639_v48 = vsel %vm4125_vm9, %v4739_v7, %v4716_v25 }
  0xb5   :  { %v643_v29 = vrot.slane %v641_v8, 4  ;;  %v646_v26 = vrot.slane %v644_v32, 5  ;;  %v1198_v55 = vsel %vm4049_vm2, %v1135_v21, %v1197_v5  ;;  %3755 = vmatprep.subr.bf16.mxu1 %v3968_v44  ;;  %v1691_v21 = vsel %vm4343_vm12, %v3383_v39, %v1690_v63  ;;  %v1657_v31 = vld [vmem:[#allocation2 + $0x1c] sm:$0x1]  ;;  %v1658_v41 = vld [vmem:[#allocation2 + $0x20] sm:$0xe]  ;;  %3819 = vmatprep.subr.bf16.mxu0 %v3970_v1 }
  0xb6   :  { %3011 = vmatprep.mubr.bf16.mxu0 %v3321_v34  ;;  %1199 = vst [vmem:[#allocation2 + $0x44] sm:$0x1] %v1198_v55  ;;  %v1659_v62 = vld [vmem:[#allocation2 + $0x24] sm:$0x1]  ;;  %v1694_v39 = vrot.slane %v1657_v31, 5  ;;  %v3390_v6 = vcombine.low %v1687_v13, %v1691_v21  ;;  %v3385_v36 = vrot.slane %v1658_v41, 9  ;;  %v1533_v17 = vsel %vm4125_vm9, %v4793_v2, %v4759_v16 }
  0xb7   :  { %v647_v28 = vor.u32 %v646_v26, %v643_v29  ;;  %v1698_v25 = vrot.slane %v1659_v62, 5  ;;  %v1508_v7 = vld [vmem:[#allocation2 + $0x18] sm:$0xf]  ;;  %v1547_v45 = vsel %vm4125_vm9, %v4802_v50, %v4807_v24  ;;  %v1509_v51 = vld [vmem:[#allocation2 + $0x1c] sm:$0x1]  ;;  %v3370_v46 = vcombine.low %v1419_v40, %v1423_v59  ;;  %v3971_v27 = vld [vmem:[%s5180_s2 + $0x228] sm:$0xff]  }
  0xb8   :  { %3756 = vmatpush3.bf16.msra.mxu1 %v3969_v61  ;;  %v1510_v15 = vld [vmem:[#allocation2 + $0x20] sm:$0xf]  ;;  %v1511_v3 = vld [vmem:[#allocation2 + $0x24] sm:$0x1]  ;;  %v1549_v42 = vshrl.u32 %v1508_v7, 16  ;;  %v1552_v8 = vshll.u32 %v1508_v7, 16  ;;  %v1695_v16 = vsel %vm4343_vm12, %v3384_v38, %v1694_v39  ;;  %3820 = vmatpush3.bf16.msra.mxu0 %v3971_v27  ;;  %v3378_v19 = vcombine.low %v1533_v17, %v1547_v45 }
  0xb9   :  { %v648_v30 = vrot.slane %v647_v28, 4  ;;  %v1558_v32 = vshll.u32 %v1509_v51, 16  ;;  %v1563_v0 = vshrl.u32 %v1510_v15, 16  ;;  %v1566_v14 = vshll.u32 %v1510_v15, 16  ;;  %v3973_v10 = vld [vmem:[%s5180_s2 + $0x1f0] sm:$0xff]   ;;  %v3978_v38 = vld [vmem:[%s5180_s2 + $0x1f8] sm:$0xff]  }
  0xba   :  { %v1572_v5 = vshll.u32 %v1511_v3, 16  ;;  %v1699_v2 = vsel %vm4343_vm12, %v3385_v36, %v1698_v25  ;;  %v3967_v54 = vld [vmem:[#allocation2 + $0x18] ss:$8 sps:$4 sm:$0xff]   ;;  %v1551_v34 = vrot.slane %v1549_v42, 4  ;;  %v1554_v29 = vrot.slane %v1552_v8, 5  ;;  %v3974_v44 = vld [vmem:[%s5180_s2 + $0x1b0] sm:$0xff]   ;;  %3757 = vmatprep.subr.bf16.mxu1 %v3973_v10 }
  0xbb   :  { %v653_v63 = vsel %vm4125_vm9, %v648_v30, %v652_v60  ;;  %2915 = vmatmul.mubr.bf16.gmra.mrb[28].mxu1 %v3301_v20  ;;  %v1560_v26 = vrot.slane %v1558_v32, 5  ;;  %v1388_v60 = vld [vmem:[#allocation2 + $0x10] sm:$0xe]  ;;  %v1565_v55 = vrot.slane %v1563_v0, 4  ;;  %v1568_v50 = vrot.slane %v1566_v14, 5  ;;  %v3979_v45 = vld [vmem:[%s5180_s2 + $0x1b8] sm:$0xff]  }
  0xbc   :  { %v3309_v47 = vcombine.low %v639_v48, %v653_v63  ;;  %2922 = vmatprep.mubr.bf16.mxu1 %v3962_v22  ;;  %v1574_v61 = vrot.slane %v1572_v5, 5  ;;  %v1389_v28 = vld [vmem:[#allocation2 + $0x14] sm:$0x1]  ;;  %v3364_v22 = vrot.slane %v1388_v60, 9  ;;  %v1555_v24 = vor.u32 %v1554_v29, %v1551_v34  ;;  %v1390_v11 = vld [vmem:[#allocation2 + $0x18] sm:$0xe]  ;;  %3758 = vmatpush3.bf16.msra.mxu1 %v3974_v44 }
  0xbd   :  { %v1391_v20 = vld [vmem:[#allocation2 + $0x1c] sm:$0x1]  ;;  %v1426_v13 = vrot.slane %v1389_v28, 5  ;;  %v3975_v21 = vld [vmem:[%s5180_s2 + $0x270] sm:$0xff]   ;;  %v1569_v31 = vor.u32 %v1568_v50, %v1565_v55  ;;  %v3365_v48 = vrot.slane %v1390_v11, 9  ;;  %v3391_v41 = vcombine.low %v1695_v16, %v1699_v2  ;;  %3759 = vmatprep.subr.bf16.mxu1 %v3978_v38  ;;  %v5255_v11 = vld [vmem:[#allocation7_spill] sm:$0xff] }
  0xbe   :  { %3012 = vmatmul.mubr.bf16.gmra.mrb[28].mxu0 %v3309_v47  ;;  %v1430_v30 = vrot.slane %v1391_v20, 5  ;;  %v1556_v62 = vrot.slane %v1555_v24, 4  ;;  %3821 = vmatprep.subr.bf16.mxu0 %v3975_v21  ;;  %v3976_v40 = vld [vmem:[%s5180_s2 + $0x230] sm:$0xff]   ;;  %v1661_v36 = vld [vmem:[#allocation2 + $0x2c] sm:$0x1]  ;;  %v1134_v0 = vor.u32 %v1132_v53, %v4732_v49  ;;  %v3981_v44 = vld [vmem:[%s5180_s2 + $0x238] sm:$0xff]  }
  0xbf   :  { %3019 = vmatprep.mubr.bf16.mxu0 %v3390_v6  ;;  %v1570_v59 = vrot.slane %v1569_v31, 4  ;;  %v1427_v39 = vsel %vm4343_vm12, %v3364_v22, %v1426_v13  ;;  %v1660_v6 = vld [vmem:[#allocation2 + $0x28] sm:$0xe]  ;;  %v1662_v25 = vld [vmem:[#allocation2 + $0x30] sm:$0xe]  ;;  %3822 = vmatpush3.bf16.msra.mxu0 %v3976_v40  ;;  %v1702_v47 = vrot.slane %v1661_v36, 5 }
  0xc0   :  { %v1431_v63 = vsel %vm4343_vm12, %v3365_v48, %v1430_v30  ;;  %v1663_v7 = vld [vmem:[#allocation2 + $0x34] sm:$0x1]  ;;  %v3386_v1 = vrot.slane %v1660_v6, 9  ;;  %v3387_v17 = vrot.slane %v1662_v25, 9  ;;  %v1561_v51 = vsel %vm4125_vm9, %v1556_v62, %v1560_v26  ;;  %v3972_v32 = vld [vmem:[#allocation2 + $0x28] ss:$8 sps:$4 sm:$0xff]   ;;  %3760 = vmatpush3.bf16.msra.mxu1 %v3979_v45 }
  0xc1   :  { %v1575_v15 = vsel %vm4125_vm9, %v1570_v59, %v1574_v61  ;;  %v1706_v3 = vrot.slane %v1663_v7, 5  ;;  %v3371_v42 = vcombine.low %v1427_v39, %v1431_v63  ;;  %v1512_v27 = vld [vmem:[#allocation2 + $0x28] sm:$0xf]  ;;  %v1513_v16 = vld [vmem:[#allocation2 + $0x2c] sm:$0x1]  ;;  %v812_v20 = vshrl.u32 %v5255_v11, 16 }
  0xc2   :  { %v1703_v8 = vsel %vm4343_vm12, %v3386_v1, %v1702_v47  ;;  %v1514_v5 = vld [vmem:[#allocation2 + $0x30] sm:$0xf]  ;;  %v1515_v10 = vld [vmem:[#allocation2 + $0x34] sm:$0x1]  ;;  %v1577_v2 = vshrl.u32 %v1512_v27, 16  ;;  %v3379_v34 = vcombine.low %v1561_v51, %v1575_v15  ;;  %v1586_v29 = vshll.u32 %v1513_v16, 16 }
  0xc3   :  { %2923 = vmatmul.mubr.bf16.gmra.mrb[32].mxu1 %v3370_v46  ;;  %v3980_v46 = vld [vmem:[%s5180_s2 + $0x278] sm:$0xff]   ;;  %v1707_v14 = vsel %vm4343_vm12, %v3387_v17, %v1706_v3  ;;  %v1591_v26 = vshrl.u32 %v1514_v5, 16  ;;  %v1594_v60 = vshll.u32 %v1514_v5, 16  ;;  %v1194_v55 = vld [vmem:[#allocation2 + $0x40] sm:$0xf]  ;;  %v1600_v53 = vshll.u32 %v1515_v10, 16 }
  0xc4   :  { %2930 = vmatprep.mubr.bf16.mxu1 %v3967_v54  ;;  %v1580_v54 = vshll.u32 %v1512_v27, 16  ;;  %3823 = vmatprep.subr.bf16.mxu0 %v3980_v46  ;;  %v3392_v50 = vcombine.low %v1703_v8, %v1707_v14  ;;  %v1579_v23 = vrot.slane %v1577_v2, 4  ;;  %v1588_v61 = vrot.slane %v1586_v29, 5  ;;  %v1392_v24 = vld [vmem:[#allocation2 + $0x20] sm:$0xe] }
  0xc5   :  { %v1593_v28 = vrot.slane %v1591_v26, 4  ;;  %v1596_v22 = vrot.slane %v1594_v60, 5  ;;  %3824 = vmatpush3.bf16.msra.mxu0 %v3981_v44  ;;  %v1602_v21 = vrot.slane %v1600_v53, 5  ;;  %v1394_v31 = vld [vmem:[#allocation2 + $0x28] sm:$0xe]  ;;  %v3366_v48 = vrot.slane %v1392_v24, 9 }
  0xc6   :  { %3020 = vmatmul.mubr.bf16.gmra.mrb[32].mxu0 %v3378_v19  ;;  %v1582_v49 = vrot.slane %v1580_v54, 5  ;;  %v1393_v19 = vld [vmem:[#allocation2 + $0x24] sm:$0x1]  ;;  %v3367_v40 = vrot.slane %v1394_v31, 9  ;;  %v1195_v39 = vsel %vm4078_vm6, %v1134_v0, %v1194_v55  ;;  %v4896_v7 = vld [vmem:[#allocation2 + $0x40] sm:$0xf] }
  0xc7   :  { %3027 = vmatprep.mubr.bf16.mxu0 %v3391_v41  ;;  %v1597_v30 = vor.u32 %v1596_v22, %v1593_v28  ;;  %v1395_v41 = vld [vmem:[#allocation2 + $0x2c] sm:$0x1]  ;;  %v1434_v62 = vrot.slane %v1393_v19, 5  ;;  %v4898_v1 = vld [vmem:[#allocation2 + $0x40] sm:$0xf]  ;;  %v815_v16 = vshll.u32 %v5255_v11, 16 }
  0xc8   :  { %v1583_v13 = vor.u32 %v1582_v49, %v1579_v23  ;;  %v1438_v38 = vrot.slane %v1395_v41, 5  ;;  %v4902_v35 = vld [vmem:[#allocation2 + $0x40] sm:$0xe]  ;;  %v1664_v45 = vld [vmem:[#allocation2 + $0x38] sm:$0xe]  ;;  %v5256_v55 = vld [vmem:[#allocation8_spill] sm:$0xff] }
  0xc9   :  { %v1598_v63 = vrot.slane %v1597_v30, 4  ;;  %v1435_v6 = vsel %vm4343_vm12, %v3366_v48, %v1434_v62  ;;  %v1665_v51 = vld [vmem:[#allocation2 + $0x3c] sm:$0x1]  ;;  %1196 = vst [vmem:[#allocation2 + $0x40] sm:$0xf] %v1195_v39  ;;  %v3388_v46 = vrot.slane %v1664_v45, 9 }
  0xca   :  { %v1584_v59 = vrot.slane %v1583_v13, 4  ;;  %v1439_v25 = vsel %vm4343_vm12, %v3367_v40, %v1438_v38  ;;  %v1667_v3 = vld [vmem:[#allocation2 + $0x44] sm:$0x1]  ;;  %v1710_v8 = vrot.slane %v1665_v51, 5  ;;  %v1517_v27 = vld [vmem:[#allocation2 + $0x3c] sm:$0x1] }
  0xcb   :  { %2931 = vmatmul.mubr.bf16.gmra.mrb[36].mxu1 %v3371_v42  ;;  %v1603_v47 = vsel %vm4125_vm9, %v1598_v63, %v1602_v21  ;;  %v3372_v17 = vcombine.low %v1435_v6, %v1439_v25  ;;  %v814_v42 = vrot.slane %v812_v20, 4  ;;  %v1714_v0 = vrot.slane %v1667_v3, 5  ;;  %v1519_v14 = vld [vmem:[#allocation2 + $0x44] sm:$0x1]  ;;  %v1396_v44 = vld [vmem:[#allocation2 + $0x30] sm:$0xe] }
  0xcc   :  { %2938 = vmatprep.mubr.bf16.mxu1 %v3972_v32  ;;  %v1589_v36 = vsel %vm4125_vm9, %v1584_v59, %v1588_v61  ;;  %v1516_v32 = vld [vmem:[#allocation2 + $0x38] sm:$0xf]  ;;  %v1614_v2 = vshll.u32 %v1517_v27, 16  ;;  %v1628_v54 = vshll.u32 %v1519_v14, 16  ;;  %v1397_v49 = vld [vmem:[#allocation2 + $0x34] sm:$0x1]  ;;  %v1711_v13 = vsel %vm4343_vm12, %v3388_v46, %v1710_v8 }
  0xcd   :  { %v3380_v15 = vcombine.low %v1589_v36, %v1603_v47  ;;  %v1605_v5 = vshrl.u32 %v1516_v32, 16  ;;  %v1608_v10 = vshll.u32 %v1516_v32, 16  ;;  %v1398_v53 = vld [vmem:[#allocation2 + $0x38] sm:$0xe]  ;;  %v3368_v61 = vrot.slane %v1396_v44, 9  ;;  %v5258_v46 = vld [vmem:[#allocation10_spill] sm:$0xff] }
  0xce   :  { %3028 = vmatmul.mubr.bf16.gmra.mrb[36].mxu0 %v3379_v34  ;;  %v817_v34 = vrot.slane %v815_v16, 5  ;;  %v1616_v60 = vrot.slane %v1614_v2, 5  ;;  %v1630_v23 = vrot.slane %v1628_v54, 5  ;;  %v1399_v22 = vld [vmem:[#allocation2 + $0x3c] sm:$0x1]  ;;  %v1442_v24 = vrot.slane %v1397_v49, 5 }
  0xcf   :  { %3035 = vmatprep.mubr.bf16.mxu0 %v3392_v50  ;;  %v1607_v29 = vrot.slane %v1605_v5, 4  ;;  %v1610_v26 = vrot.slane %v1608_v10, 5  ;;  %v821_v50 = vshll.u32 %v5256_v55, 16  ;;  %v3369_v11 = vrot.slane %v1398_v53, 9  ;;  %v5257_v45 = vld [vmem:[#allocation9_spill] sm:$0xff]  ;;  %v5259_v8 = vld [vmem:[#allocation11_spill] sm:$0xff] }
  0xd0   :  { %v1666_v20 = vld [vmem:[#allocation2 + $0x40] sm:$0xe]  ;;  %v818_v19 = vor.u32 %v817_v34, %v814_v42  ;;  %v1443_v41 = vsel %vm4343_vm12, %v3368_v61, %v1442_v24  ;;  %v1446_v62 = vrot.slane %v1399_v22, 5  ;;  %v826_v51 = vshrl.u32 %v5257_v45, 16  ;;  %v5260_v27 = vld [vmem:[#allocation12_spill] sm:$0xff]  ;;  %v5261_v10 = vld [vmem:[#allocation13_spill] sm:$0xff] }
  0xd1   :  { %v1611_v28 = vor.u32 %v1610_v26, %v1607_v29  ;;  %v3977_v21 = vld [vmem:[#allocation2 + $0x38] ss:$8 sps:$4 sm:$0xff]   ;;  %v3389_v31 = vrot.slane %v1666_v20, 9  ;;  %v835_v42 = vshll.u32 %v5258_v46, 16  ;;  %v3330_v32 = vrot.slane %v5259_v8, 9  ;;  %v5264_v61 = vld [vmem:[#allocation15_spill] sm:$0xff] }
  0xd2   :  { %v1518_v48 = vld [vmem:[#allocation2 + $0x40] sm:$0xf]  ;;  %v1447_v39 = vsel %vm4343_vm12, %v3369_v11, %v1446_v62  ;;  %v977_v16 = vrot.slane %v5260_v27, 5  ;;  %v828_v14 = vrot.slane %v826_v51, 4  ;;  %v3331_v2 = vrot.slane %v5261_v10, 9  ;;  %v5263_v55 = vld [vmem:[#allocation21_spill] sm:$0xff] }
  0xd3   :  { %2939 = vmatmul.mubr.bf16.gmra.mrb[40].mxu1 %v3372_v17  ;;  %v1612_v30 = vrot.slane %v1611_v28, 4  ;;  %v1619_v40 = vshrl.u32 %v1518_v48, 16  ;;  %v1622_v59 = vshll.u32 %v1518_v48, 16  ;;  %v1715_v38 = vsel %vm4343_vm12, %v3389_v31, %v1714_v0  ;;  %v5262_v26 = vld [vmem:[#allocation14_spill] sm:$0xff]  ;;  %v5270_v46 = vld [vmem:[#allocation35_spill] sm:$0xff] }
  0xd4   :  { %2946 = vmatprep.mubr.bf16.mxu1 %v3977_v21  ;;  %v3393_v63 = vcombine.low %v1711_v13, %v1715_v38  ;;  %v3373_v25 = vcombine.low %v1443_v41, %v1447_v39  ;;  %v819_v17 = vrot.slane %v818_v19, 4  ;;  %v823_v0 = vrot.slane %v821_v50, 5  ;;  %v3982_v22 = vld [vmem:[%s5182_s1] sm:$0xff]   ;;  %v5266_v38 = vld [vmem:[#allocation23_spill] sm:$0xff] }
  0xd5   :  { %v1621_v6 = vrot.slane %v1619_v40, 4  ;;  %v1624_v36 = vrot.slane %v1622_v59, 5  ;;  %v1617_v47 = vsel %vm4125_vm9, %v1612_v30, %v1616_v60  ;;  %v837_v34 = vrot.slane %v835_v42, 5  ;;  %v5265_v11 = vld [vmem:[#allocation22_spill] sm:$0xff] }
  0xd6   :  { %3036 = vmatmul.mubr.bf16.gmra.mrb[40].mxu0 %v3380_v15  ;;  %v829_v15 = vshll.u32 %v5257_v45, 16  ;;  %v978_v29 = vsel %vm4343_vm12, %v3330_v32, %v977_v16  ;;  %v981_v60 = vrot.slane %v5262_v26, 5  ;;  %v840_v49 = vshrl.u32 %v5263_v55, 16  ;;  %v5268_v45 = vld [vmem:[#allocation25_spill] sm:$0xff]  ;;  %v5271_v16 = vld [vmem:[#allocation36_spill] sm:$0xff] }
  0xd7   :  { %3043 = vmatprep.mubr.bf16.mxu0 %v3393_v63  ;;  %v1625_v3 = vor.u32 %v1624_v36, %v1621_v6  ;;  %v843_v53 = vshll.u32 %v5263_v55, 16  ;;  %v849_v28 = vshll.u32 %v5264_v61, 16  ;;  %v854_v20 = vshrl.u32 %v5265_v11, 16 }
  0xd8   :  { %v831_v5 = vrot.slane %v829_v15, 5  ;;  %v982_v24 = vsel %vm4343_vm12, %v3331_v2, %v981_v60  ;;  %v857_v13 = vshll.u32 %v5265_v11, 16  ;;  %v824_v19 = vsel %vm4125_vm9, %v819_v17, %v823_v0  ;;  %v5269_v15 = vld [vmem:[#allocation26_spill] sm:$0xff]  ;;  %v5275_v2 = vld [vmem:[#allocation27_spill] sm:$0xff] }
  0xd9   :  { %v1626_v54 = vrot.slane %v1625_v3, 4  ;;  %v842_v48 = vrot.slane %v840_v49, 4  ;;  %v845_v30 = vrot.slane %v843_v53, 5  ;;  %v856_v41 = vrot.slane %v854_v20, 4 }
  0xda   :  { %v832_v44 = vor.u32 %v831_v5, %v828_v14  ;;  %v3338_v40 = vcombine.low %v978_v29, %v982_v24  ;;  %v851_v59 = vrot.slane %v849_v28, 5  ;;  %v863_v39 = vshll.u32 %v5266_v38, 16  ;;  %v5272_v14 = vld [vmem:[#allocation5_spill] sm:$0xff]  ;;  %v5273_v5 = vld [vmem:[#allocation6_spill] sm:$0xff] }
  0xdb   :  { %2947 = vmatmul.mubr.bf16.gmra.mrb[44].mxu1 %v3373_v25  ;;  %v1631_v50 = vsel %vm4125_vm9, %v1626_v54, %v1630_v23  ;;  %v859_v23 = vrot.slane %v857_v13, 5  ;;  %v846_v6 = vor.u32 %v845_v30, %v842_v48  ;;  %v5267_v25 = vld [vmem:[#allocation24_spill] sm:$0xff]  ;;  %v985_v51 = vrot.slane %v5268_v45, 5  ;;  %v5276_v29 = vld [vmem:[#allocation37_spill] sm:$0xff]  ;;  %v810_v48 = vld [vmem:[#allocation2 + $0x4c] sm:$0x1] }
  0xdc   :  { %v3381_v21 = vcombine.low %v1617_v47, %v1631_v50  ;;  %v833_v31 = vrot.slane %v832_v44, 4  ;;  %v3332_v47 = vrot.slane %v5267_v25, 9  ;;  %v865_v17 = vrot.slane %v863_v39, 5  ;;  %v3983_v44 = vld [vmem:[%s5182_s1 + $0x8] sm:$0xff]  }
  0xdd   :  { %v860_v36 = vor.u32 %v859_v23, %v856_v41  ;;  %v3333_v3 = vrot.slane %v5269_v15, 9  ;;  %v868_v42 = vshrl.u32 %v5270_v46, 16  ;;  %v847_v8 = vrot.slane %v846_v6, 4 }
  0xde   :  { %3044 = vmatmul.mubr.bf16.gmra.mrb[44].mxu0 %v3381_v21  ;;  %v838_v62 = vsel %vm4125_vm9, %v833_v31, %v837_v34  ;;  %v871_v27 = vshll.u32 %v5270_v46, 16  ;;  %v877_v0 = vshll.u32 %v5271_v16, 16  ;;  %v5274_v10 = vcombine.low %v5272_v14, %v5273_v5  ;;  %v809_v31 = vld [vmem:[#allocation2 + $0x48] sm:$0xf]  ;;  %v1773_v16 = vld [vmem:[#allocation2 + $0x14] sm:$0x1] }
  0xdf   :  { %3181 = vmatprep.mubr.bf16.mxu0 %v3982_v22  ;;  %v3326_v63 = vcombine.low %v824_v19, %v838_v62  ;;  %v861_v32 = vrot.slane %v860_v36, 4  ;;  %v989_v54 = vrot.slane %v5275_v2, 5  ;;  %v870_v34 = vrot.slane %v868_v42, 4  ;;  %v957_v46 = vld [vmem:[#allocation2 + $0x48] sm:$0xe] }
  0xe0   :  { %v882_v26 = vshrl.u32 %v5276_v29, 16  ;;  %v885_v60 = vshll.u32 %v5276_v29, 16  ;;  %v852_v55 = vsel %vm4125_vm9, %v847_v8, %v851_v59  ;;  %v873_v53 = vrot.slane %v871_v27, 5  ;;  %v958_v42 = vld [vmem:[#allocation2 + $0x4c] sm:$0x1] }
  0xe1   :  { %3084 = vmatprep.mubr.bf16.mxu1 %v3326_v63  ;;  %v866_v49 = vsel %vm4125_vm9, %v861_v32, %v865_v17  ;;  %v986_v22 = vsel %vm4343_vm12, %v3332_v47, %v985_v51  ;;  %v879_v11 = vrot.slane %v877_v0, 5  ;;  %v891_v20 = vshll.u32 %v4533_v9, 16  ;;  %v5277_v47 = vld [vmem:[#allocation19_spill] sm:$0xff]  ;;  %v5278_v17 = vld [vmem:[#allocation20_spill] sm:$0xff]  ;;  %v1774_v0 = vld [vmem:[#allocation2 + $0x18] sm:$0xf] }
  0xe2   :  { %v3327_v61 = vcombine.low %v852_v55, %v866_v49  ;;  %v884_v28 = vrot.slane %v882_v26, 4  ;;  %v887_v50 = vrot.slane %v885_v60, 5  ;;  %v874_v24 = vor.u32 %v873_v53, %v870_v34  ;;  %v1772_v51 = vld [vmem:[#allocation2 + $0x10] sm:$0xf]  ;;  %v4988_v2 = vld [vmem:[#allocation2 + $0x48] sm:$0xf] }
  0xe3   :  { %3085 = vmatmul.mubr.bf16.vlgmr.msra.gmra.mrb[48].mxu1 %v5274_v10  ;;  %v990_v13 = vsel %vm4343_vm12, %v3333_v3, %v989_v54  ;;  %v3334_v19 = vrot.slane %v4535_v37, 9  ;;  %v896_v30 = vshrl.u32 %v4898_v1, 16  ;;  %v893_v23 = vrot.slane %v891_v20, 5  ;;  %v1775_v60 = vld [vmem:[#allocation2 + $0x1c] sm:$0x1] }
  0xe4   :  { %3092 = vmatprep.mubr.bf16.mxu1 %v3327_v61  ;;  %v888_v21 = vor.u32 %v887_v50, %v884_v28  ;;  %v875_v41 = vrot.slane %v874_v24, 4  ;;  %v993_v62 = vrot.slane %v4537_v57, 5  ;;  %v899_v59 = vshll.u32 %v4898_v1, 16  ;;  %v1776_v28 = vld [vmem:[#allocation2 + $0x20] sm:$0xf] }
  0xe5   :  { %v898_v38 = vrot.slane %v896_v30, 4  ;;  %v905_v39 = vshll.u32 %v4778_v4, 16  ;;  %v997_v63 = vrot.slane %v4541_v58, 5  ;;  %v910_v36 = vshrl.u32 %v809_v31, 16  ;;  %v3984_v4 = vld [vmem:[%s5182_s1 + $0x10] sm:$0xff]  }
  0xe6   :  { %3182 = vmatmul.mubr.bf16.vlgmr.msra.gmra.mrb[48].mxu0 %v3338_v40  ;;  %v889_v9 = vrot.slane %v888_v21, 4  ;;  %v3335_v40 = vrot.slane %v4539_v52, 9  ;;  %v880_v37 = vsel %vm4125_vm9, %v875_v41, %v879_v11  ;;  %v901_v6 = vrot.slane %v899_v59, 5  ;;  %v3985_v11 = vld [vmem:[%s5182_s1 + $0x18] sm:$0xff]   ;;  %v4996_v21 = vld [vmem:[#allocation2 + $0x10] sm:$0xe] }
  0xe7   :  { %3189 = vmatprep.mubr.bf16.mxu0 %v3983_v44  ;;  %v3339_v25 = vcombine.low %v986_v22, %v990_v13  ;;  %v5279_v45 = vcombine.low %v5277_v47, %v5278_v17  ;;  %v913_v1 = vshll.u32 %v809_v31, 16  ;;  %v919_v52 = vshll.u32 %v810_v48, 16 }
  0xe8   :  { %v894_v57 = vsel %vm4125_vm9, %v889_v9, %v893_v23  ;;  %v902_v3 = vor.u32 %v901_v6, %v898_v38  ;;  %v912_v58 = vrot.slane %v910_v36, 4  ;;  %v994_v8 = vsel %vm4343_vm12, %v3334_v19, %v993_v62  ;;  %v1777_v23 = vld [vmem:[#allocation2 + $0x24] sm:$0x1]  ;;  %v1778_v62 = vld [vmem:[#allocation2 + $0x28] sm:$0xf] }
  0xe9   :  { %v3328_v15 = vcombine.low %v880_v37, %v894_v57  ;;  %v907_v32 = vrot.slane %v905_v39, 5  ;;  %v915_v27 = vrot.slane %v913_v1, 5  ;;  %v998_v14 = vsel %vm4343_vm12, %v3335_v40, %v997_v63  ;;  %v1921_v39 = vld [vmem:[#allocation2 + $0x14] sm:$0x1]  ;;  %v1922_v37 = vld [vmem:[#allocation2 + $0x18] sm:$0xe] }
  0xea   :  { %v903_v5 = vrot.slane %v902_v3, 4  ;;  %v3336_v10 = vrot.slane %v4902_v35, 9  ;;  %v1789_v54 = vshrl.u32 %v1772_v51, 16  ;;  %v921_v29 = vrot.slane %v919_v52, 5 }
  0xeb   :  { %3093 = vmatmul.mubr.bf16.gmra.mrb[52].mxu1 %v5279_v45  ;;  %v916_v34 = vor.u32 %v915_v27, %v912_v58  ;;  %v1001_v26 = vrot.slane %v4785_v56, 5  ;;  %v1792_v44 = vshll.u32 %v1772_v51, 16  ;;  %v3337_v55 = vrot.slane %v957_v46, 9  ;;  %v1923_v45 = vld [vmem:[#allocation2 + $0x1c] sm:$0x1] }
  0xec   :  { %3100 = vmatprep.mubr.bf16.mxu1 %v3328_v15  ;;  %v1791_v49 = vrot.slane %v1789_v54, 4  ;;  %v1798_v53 = vshll.u32 %v1773_v16, 16  ;;  %v1803_v61 = vshrl.u32 %v1774_v0, 16  ;;  %v908_v50 = vsel %vm4125_vm9, %v903_v5, %v907_v32  ;;  %v1780_v46 = vld [vmem:[#allocation2 + $0x30] sm:$0xf] }
  0xed   :  { %v917_v35 = vrot.slane %v916_v34, 4  ;;  %v1005_v22 = vrot.slane %v958_v42, 5  ;;  %v1794_v24 = vrot.slane %v1792_v44, 5  ;;  %v1806_v56 = vshll.u32 %v1774_v0, 16  ;;  %v1781_v16 = vld [vmem:[#allocation2 + $0x34] sm:$0x1] }
  0xee   :  { %3190 = vmatmul.mubr.bf16.gmra.mrb[52].mxu0 %v3339_v25  ;;  %v1805_v20 = vrot.slane %v1803_v61, 4  ;;  %v1812_v13 = vshll.u32 %v1775_v60, 16  ;;  %v3340_v19 = vcombine.low %v994_v8, %v998_v14  ;;  %v5280_v31 = vcombine.low %v4488_v33, %v4490_v12  ;;  %v1779_v25 = vld [vmem:[#allocation2 + $0x2c] sm:$0x1]  ;;  %v1924_v44 = vld [vmem:[#allocation2 + $0x20] sm:$0xe] }
  0xef   :  { %3197 = vmatprep.mubr.bf16.mxu0 %v3984_v4  ;;  %v922_v48 = vsel %vm4125_vm9, %v917_v35, %v921_v29  ;;  %v3325_v30 = vcombine.low %v4896_v7, %v4988_v2  ;;  %v1795_v41 = vor.u32 %v1794_v24, %v1791_v49  ;;  %v1002_v9 = vsel %vm4343_vm12, %v3336_v10, %v1001_v26  ;;  %v1782_v10 = vld [vmem:[#allocation2 + $0x38] sm:$0xf]  ;;  %v1783_v2 = vld [vmem:[#allocation2 + $0x3c] sm:$0x1]  ;;  %v1925_v35 = vld [vmem:[#allocation2 + $0x24] sm:$0x1] }
  0xf0   :  { %v3329_v59 = vcombine.low %v908_v50, %v922_v48  ;;  %v1800_v40 = vrot.slane %v1798_v53, 5  ;;  %v1808_v38 = vrot.slane %v1806_v56, 5  ;;  %v1006_v33 = vsel %vm4343_vm12, %v3337_v55, %v1005_v22  ;;  %v3986_v55 = vld [vmem:[%s5182_s1 + $0x20] sm:$0xff]   ;;  %v3987_v48 = vld [vmem:[#allocation2 + $0x10] ss:$8 sps:$4 sm:$0xff]  }
  0xf1   :  { %v1796_v12 = vrot.slane %v1795_v41, 4  ;;  %v1817_v63 = vshrl.u32 %v1776_v28, 16  ;;  %v1820_v6 = vshll.u32 %v1776_v28, 16  ;;  %v1814_v7 = vrot.slane %v1812_v13, 5 }
  0xf2   :  { %v1809_v36 = vor.u32 %v1808_v38, %v1805_v20  ;;  %v1826_v47 = vshll.u32 %v1777_v23, 16  ;;  %v1831_v17 = vshrl.u32 %v1778_v62, 16  ;;  %v3402_v57 = vrot.slane %v4996_v21, 9  ;;  %v1926_v20 = vld [vmem:[#allocation2 + $0x28] sm:$0xe] }
  0xf3   :  { %3101 = vmatmul.mubr.bf16.gmra.mrb[56].mxu1 %v5280_v31  ;;  %v1954_v1 = vrot.slane %v1921_v39, 5  ;;  %v1819_v52 = vrot.slane %v1817_v63, 4  ;;  %v1822_v51 = vrot.slane %v1820_v6, 5  ;;  %v1801_v4 = vsel %vm4125_vm9, %v1796_v12, %v1800_v40  ;;  %v1784_v23 = vld [vmem:[#allocation2 + $0x40] sm:$0xf] }
  0xf4   :  { %3108 = vmatprep.mubr.bf16.mxu1 %v3329_v59  ;;  %v1810_v15 = vrot.slane %v1809_v36, 4  ;;  %v1833_v3 = vrot.slane %v1831_v17, 4  ;;  %v1834_v58 = vshll.u32 %v1778_v62, 16  ;;  %v3403_v42 = vrot.slane %v1922_v37, 9  ;;  %v1927_v59 = vld [vmem:[#allocation2 + $0x2c] sm:$0x1] }
  0xf5   :  { %v1823_v8 = vor.u32 %v1822_v51, %v1819_v52  ;;  %v1828_v32 = vrot.slane %v1826_v47, 5  ;;  %v1840_v27 = vshll.u32 %v1779_v25, 16  ;;  %v3341_v34 = vcombine.low %v1002_v9, %v1006_v33  ;;  %v1786_v39 = vld [vmem:[#allocation2 + $0x48] sm:$0xf]  ;;  %v1785_v6 = vld [vmem:[#allocation2 + $0x44] sm:$0x1] }
  0xf6   :  { %3198 = vmatmul.mubr.bf16.gmra.mrb[56].mxu0 %v3340_v19  ;;  %v1815_v14 = vsel %vm4125_vm9, %v1810_v15, %v1814_v7  ;;  %v1836_v5 = vrot.slane %v1834_v58, 5  ;;  %v1958_v26 = vrot.slane %v1923_v45, 5  ;;  %v1845_v61 = vshrl.u32 %v1780_v46, 16  ;;  %v1787_v17 = vld [vmem:[#allocation2 + $0x4c] sm:$0x1] }
  0xf7   :  { %3205 = vmatprep.mubr.bf16.mxu0 %v3985_v11  ;;  %v5012_v0 = vpop.f32.mrb[0].mxu0  ;;  %v3398_v29 = vcombine.low %v1801_v4, %v1815_v14  ;;  %v1824_v60 = vrot.slane %v1823_v8, 4  ;;  %v1842_v53 = vrot.slane %v1840_v27, 5  ;;  %v1848_v28 = vshll.u32 %v1780_v46, 16  ;;  %v3988_v15 = vld [vmem:[%s5182_s1 + $0x28] sm:$0xff]  }
  0xf8   :  { %v5016_v54 = vpop.f32.mrb[1].mxu0  ;;  %v1837_v49 = vor.u32 %v1836_v5, %v1833_v3  ;;  %v1854_v22 = vshll.u32 %v1781_v16, 16  ;;  %v1859_v24 = vshrl.u32 %v1782_v10, 16  ;;  %v1847_v56 = vrot.slane %v1845_v61, 4 }
  0xf9   :  { %v1829_v50 = vsel %vm4125_vm9, %v1824_v60, %v1828_v32  ;;  %v1850_v13 = vrot.slane %v1848_v28, 5  ;;  %v1862_v21 = vshll.u32 %v1782_v10, 16  ;;  %v1955_v19 = vsel %vm4343_vm12, %v3402_v57, %v1954_v1  ;;  %v3572_v36 = vpop.f32.mrb[2].mxu0 }
  0xfa   :  { %v1838_v11 = vrot.slane %v1837_v49, 4  ;;  %v1959_v31 = vsel %vm4343_vm12, %v3403_v42, %v1958_v26  ;;  %v1868_v41 = vshll.u32 %v1783_v2, 16  ;;  %v3404_v9 = vrot.slane %v1924_v44, 9  ;;  %v3573_v4 = vpop.f32.mrb[3].mxu0  ;;  %v1929_v49 = vld [vmem:[#allocation2 + $0x34] sm:$0x1] }
  0xfb   :  { %3109 = vmatmul.mubr.bf16.gmra.mrb[60].mxu1 %v3325_v30  ;;  %v1861_v30 = vrot.slane %v1859_v24, 4  ;;  %v1851_v40 = vor.u32 %v1850_v13, %v1847_v56  ;;  %v1864_v38 = vrot.slane %v1862_v21, 5  ;;  %v1962_v12 = vrot.slane %v1925_v35, 5  ;;  %v1930_v35 = vld [vmem:[#allocation2 + $0x38] sm:$0xe] }
  0xfc   :  { %3116 = vmatprep.mubr.bf16.mxu1 %v3398_v29  ;;  %v1843_v62 = vsel %vm4125_vm9, %v1838_v11, %v1842_v53  ;;  %v3405_v37 = vrot.slane %v1926_v20, 9  ;;  %v1856_v63 = vrot.slane %v1854_v22, 5  ;;  %v1870_v47 = vrot.slane %v1868_v41, 5  ;;  %v1928_v29 = vld [vmem:[#allocation2 + $0x30] sm:$0xe] }
  0xfd   :  { %v3399_v33 = vcombine.low %v1829_v50, %v1843_v62  ;;  %v1852_v7 = vrot.slane %v1851_v40, 4  ;;  %v1865_v25 = vor.u32 %v1864_v38, %v1861_v30  ;;  %v1873_v45 = vshrl.u32 %v1784_v23, 16  ;;  %v1931_v22 = vld [vmem:[#allocation2 + $0x3c] sm:$0x1] }
  0xfe   :  { %3206 = vmatmul.mubr.bf16.gmra.mrb[60].mxu0 %v3341_v34  ;;  %v3410_v57 = vcombine.low %v1955_v19, %v1959_v31  ;;  %v1966_v1 = vrot.slane %v1927_v59, 5  ;;  %v1876_v52 = vshll.u32 %v1784_v23, 16  ;;  %v1887_v51 = vshrl.u32 %v1786_v39, 16  ;;  %v3989_v34 = vld [vmem:[#allocation2 + $0x20] ss:$8 sps:$4 sm:$0xff]  }
  0xff   :  { %3213 = vmatprep.mubr.bf16.mxu0 %v3986_v55  ;;  %v1866_v3 = vrot.slane %v1865_v25, 4  ;;  %v1875_v58 = vrot.slane %v1873_v45, 4  ;;  %v1882_v46 = vshll.u32 %v1785_v6, 16  ;;  %v1857_v42 = vsel %vm4125_vm9, %v1852_v7, %v1856_v63 }
 0x100   :  { %v1878_v8 = vrot.slane %v1876_v52, 5  ;;  %v1889_v32 = vrot.slane %v1887_v51, 4  ;;  %v1890_v27 = vshll.u32 %v1786_v39, 16  ;;  %v1896_v14 = vshll.u32 %v1787_v17, 16  ;;  %v3992_v17 = vld [vmem:[%s5182_s1 + $0x38] sm:$0xff]  }
 0x101   :  { %v1871_v16 = vsel %vm4125_vm9, %v1866_v3, %v1870_v47  ;;  %v1963_v10 = vsel %vm4343_vm12, %v3404_v9, %v1962_v12  ;;  %v1967_v2 = vsel %vm4343_vm12, %v3405_v37, %v1966_v1  ;;  %v1884_v53 = vrot.slane %v1882_v46, 5  ;;  %v3991_v9 = vld [vmem:[#allocation2 + $0x30] ss:$8 sps:$4 sm:$0xff]   ;;  %v1932_v12 = vld [vmem:[#allocation2 + $0x40] sm:$0xe] }
 0x102   :  { %v1879_v26 = vor.u32 %v1878_v8, %v1875_v58  ;;  %v1892_v60 = vrot.slane %v1890_v27, 5  ;;  %v3400_v55 = vcombine.low %v1857_v42, %v1871_v16  ;;  %v1898_v61 = vrot.slane %v1896_v14, 5  ;;  %v1933_v37 = vld [vmem:[#allocation2 + $0x44] sm:$0x1]  ;;  %v3993_v51 = vld [vmem:[#allocation2 + $0x40] ss:$8 sps:$4 sm:$0xff]  }
 0x103   :  { %3117 = vmatmul.mubr.bf16.gmra.mrb[64].mxu1 %v3987_v48  ;;  %v5042_v28 = vadd.f32 %v5016_v54, %v5012_v0  ;;  %v5046_v56 = vadd.f32 %v3573_v4, %v3572_v36  ;;  %v3411_v19 = vcombine.low %v1963_v10, %v1967_v2  ;;  %v3990_v0 = vld [vmem:[%s5182_s1 + $0x30] sm:$0xff]   ;;  %v3406_v54 = vrot.slane %v1928_v29, 9  ;;  %v1934_v36 = vld [vmem:[#allocation2 + $0x48] sm:$0xe] }
 0x104   :  { %3124 = vmatprep.mubr.bf16.mxu1 %v3399_v33  ;;  %v1880_v24 = vrot.slane %v1879_v26, 4  ;;  %v1893_v11 = vor.u32 %v1892_v60, %v1889_v32  ;;  %v1970_v48 = vrot.slane %v1929_v49, 5  ;;  %v3407_v30 = vrot.slane %v1930_v35, 9 }
 0x105   :  { %v1974_v41 = vrot.slane %v1931_v22, 5  ;;  %v3408_v45 = vrot.slane %v1932_v12, 9  ;;  %v3409_v1 = vrot.slane %v1934_v36, 9  ;;  %v1982_v52 = vrot.slane %v1935_v18, 5 }
 0x106   :  { %v3593_v5 = vpop.f32.mrb[0].mxu1  ;;  %3214 = vmatmul.mubr.bf16.gmra.mrb[64].mxu0 %v3410_v57  ;;  %v1894_v31 = vrot.slane %v1893_v11, 4  ;;  %v1885_v23 = vsel %vm4125_vm9, %v1880_v24, %v1884_v53  ;;  %v1971_v38 = vsel %vm4343_vm12, %v3406_v54, %v1970_v48  ;;  %v1978_v57 = vrot.slane %v1933_v37, 5 }
 0x107   :  { %v3594_v44 = vpop.f32.mrb[1].mxu1  ;;  %3221 = vmatprep.mubr.bf16.mxu0 %v3988_v15  ;;  %v1975_v39 = vsel %vm4343_vm12, %v3407_v30, %v1974_v41  ;;  %v1983_v15 = vsel %vm4343_vm12, %v3409_v1, %v1982_v52 }
 0x108   :  { %v3596_v50 = vpop.f32.mrb[2].mxu1  ;;  %v5044_v20 = vadd.f32 %v3594_v44, %v3593_v5  ;;  %v1899_v62 = vsel %vm4125_vm9, %v1894_v31, %v1898_v61  ;;  %v3412_v47 = vcombine.low %v1971_v38, %v1975_v39  ;;  %v1979_v4 = vsel %vm4343_vm12, %v3408_v45, %v1978_v57 }
 0x109   :  { %v3597_v13 = vpop.f32.mrb[3].mxu1  ;;  %v3401_v33 = vcombine.low %v1885_v23, %v1899_v62  ;;  %v3413_v3 = vcombine.low %v1979_v4, %v1983_v15 }
 0x10a   :  { %v5048_v21 = vadd.f32 %v3597_v13, %v3596_v50 }
 0x10b   :  { %3125 = vmatmul.mubr.bf16.gmra.mrb[68].mxu1 %v3989_v34 }
 0x10c   :  { %3132 = vmatprep.mubr.bf16.mxu1 %v3400_v55 }
 0x10e   :  { %v3575_v59 = vpop.f32.mrb[4].mxu0  ;;  %3222 = vmatmul.mubr.bf16.gmra.mrb[68].mxu0 %v3411_v19 }
 0x10f   :  { %v3576_v40 = vpop.f32.mrb[5].mxu0  ;;  %3229 = vmatprep.mubr.bf16.mxu0 %v3990_v0 }
 0x110   :  { %v5061_v63 = vadd.f32 %v3576_v40, %v3575_v59  ;;  %v3578_v6 = vpop.f32.mrb[6].mxu0 }
 0x111   :  { %v3579_v7 = vpop.f32.mrb[7].mxu0 }
 0x112   :  { %v5063_v25 = vadd.f32 %v3579_v7, %v3578_v6 }
 0x113   :  { %3133 = vmatmul.mubr.bf16.gmra.mrb[72].mxu1 %v3991_v9 }
 0x114   :  { %3140 = vmatprep.mubr.bf16.mxu1 %v3401_v33 }
 0x116   :  { %3230 = vmatmul.mubr.bf16.gmra.mrb[72].mxu0 %v3412_v47 }
 0x117   :  { %3237 = vmatprep.mubr.bf16.mxu0 %v3992_v17 }
 0x11b   :  { %3141 = vmatmul.mubr.bf16.gmra.mrb[76].mxu1 %v3993_v51 }
 0x11e   :  { %3238 = vmatmul.mubr.bf16.gmra.mrb[76].mxu0 %v3413_v3 }
 0x123   :  { %v3599_v58 = vpop.f32.mrb[4].mxu1 }
 0x124   :  { %v3600_v46 = vpop.f32.mrb[5].mxu1 }
 0x125   :  { %v5072_v42 = vadd.f32 %v3600_v46, %v3599_v58  ;;  %v3602_v8 = vpop.f32.mrb[6].mxu1 }
 0x126   :  { %v3603_v32 = vpop.f32.mrb[7].mxu1 }
 0x127   :  { %v5074_v27 = vadd.f32 %v3603_v32, %v3602_v8 }
 0x134   :  { %v3581_v16 = vpop.f32.mrb[8].mxu0 }
 0x135   :  { %v3582_v14 = vpop.f32.mrb[9].mxu0 }
 0x136   :  { %v5076_v5 = vadd.f32 %v3582_v14, %v3581_v16  ;;  %v3584_v10 = vpop.f32.mrb[10].mxu0 }
 0x137   :  { %v3585_v2 = vpop.f32.mrb[11].mxu0 }
 0x138   :  { %v5078_v34 = vadd.f32 %v3585_v2, %v3584_v10 }
 0x149   :  { %v3605_v43 = vpop.f32.mrb[8].mxu1 }
 0x14a   :  { %v3606_v29 = vpop.f32.mrb[9].mxu1 }
 0x14b   :  { %v5080_v26 = vadd.f32 %v3606_v29, %v3605_v43  ;;  %v3608_v60 = vpop.f32.mrb[10].mxu1 }
 0x14c   :  { %v3609_v44 = vpop.f32.mrb[11].mxu1 }
 0x14d   :  { %v5082_v55 = vadd.f32 %v3609_v44, %v3608_v60 }
 0x159   :  { %v3587_v49 = vpop.f32.mrb[12].mxu0 }
 0x15a   :  { %v3588_v53 = vpop.f32.mrb[13].mxu0 }
 0x15b   :  { %v5084_v61 = vadd.f32 %v3588_v53, %v3587_v49  ;;  %v3590_v50 = vpop.f32.mrb[14].mxu0 }
 0x15c   :  { %v3591_v35 = vpop.f32.mrb[15].mxu0 }
 0x15d   :  { %v5086_v22 = vadd.f32 %v3591_v35, %v3590_v50 }
 0x165   :  { %v3697_v24 = vpop.f32.mrb[16].mxu0 }
 0x166   :  { %v3698_v11 = vpop.f32.mrb[17].mxu0 }
 0x167   :  { %v3699_v13 = vadd.f32 %v3698_v11, %v3697_v24  ;;  %v3700_v19 = vpop.f32.mrb[18].mxu0 }
 0x168   :  { %v3701_v31 = vpop.f32.mrb[19].mxu0 }
 0x169   :  { %v3702_v0 = vadd.f32 %v3701_v31, %v3700_v19 }
 0x16e   :  { %v3611_v54 = vpop.f32.mrb[12].mxu1 }
 0x16f   :  { %v3612_v48 = vpop.f32.mrb[13].mxu1 }
 0x170   :  { %v5088_v30 = vadd.f32 %v3612_v48, %v3611_v54  ;;  %v3614_v41 = vpop.f32.mrb[14].mxu1  ;;  %v3703_v62 = vpop.f32.mrb[20].mxu0 }
 0x171   :  { %v3615_v23 = vpop.f32.mrb[15].mxu1  ;;  %v3704_v9 = vpop.f32.mrb[21].mxu0 }
 0x172   :  { %v5090_v59 = vadd.f32 %v3615_v23, %v3614_v41  ;;  %v3705_v40 = vadd.f32 %v3704_v9, %v3703_v62  ;;  %v3706_v38 = vpop.f32.mrb[22].mxu0 }
 0x173   :  { %v3707_v39 = vpop.f32.mrb[23].mxu0 }
 0x174   :  { %v3708_v33 = vadd.f32 %v3707_v39, %v3706_v38 }
 0x176   :  { %v3633_v12 = vpop.f32.mrb[16].mxu1 }
 0x177   :  { %v3634_v37 = vpop.f32.mrb[17].mxu1 }
 0x178   :  { %v3635_v6 = vadd.f32 %v3634_v37, %v3633_v12  ;;  %v3636_v36 = vpop.f32.mrb[18].mxu1 }
 0x179   :  { %v3637_v18 = vpop.f32.mrb[19].mxu1  ;;  %v3709_v7 = vpop.f32.mrb[24].mxu0 }
 0x17a   :  { %v2893_v47 = vadd.f32 %v3635_v6, %v5042_v28  ;;  %v3638_v17 = vadd.f32 %v3637_v18, %v3636_v36  ;;  %v3710_v45 = vpop.f32.mrb[25].mxu0 }
 0x17b   :  { %v3711_v57 = vadd.f32 %v3710_v45, %v3709_v7  ;;  %v3712_v1 = vpop.f32.mrb[26].mxu0 }
 0x17c   :  { %v2896_v52 = vadd.f32 %v3638_v17, %v5046_v56  ;;  %v3713_v51 = vpop.f32.mrb[27].mxu0  ;;  %v5094_v4 = vadd.f32 %v3699_v13, %v2893_v47 }
 0x17d   :  { %v3714_v15 = vadd.f32 %v3713_v51, %v3712_v1 }
 0x17e   :  { %v3639_v3 = vpop.f32.mrb[20].mxu1  ;;  %v5096_v58 = vadd.f32 %v3702_v0, %v2896_v52 }
 0x17f   :  { %v3640_v46 = vpop.f32.mrb[21].mxu1 }
 0x180   :  { %v3641_v8 = vadd.f32 %v3640_v46, %v3639_v3  ;;  %v3642_v32 = vpop.f32.mrb[22].mxu1 }
 0x181   :  { %v3643_v16 = vpop.f32.mrb[23].mxu1 }
 0x182   :  { %v2901_v14 = vadd.f32 %v3641_v8, %v5061_v63  ;;  %v3644_v28 = vadd.f32 %v3643_v16, %v3642_v32 }
 0x184   :  { %v2904_v10 = vadd.f32 %v3644_v28, %v5063_v25  ;;  %v5100_v2 = vadd.f32 %v3705_v40, %v2901_v14 }
 0x186   :  { %v3645_v43 = vpop.f32.mrb[24].mxu1  ;;  %v5102_v56 = vadd.f32 %v3708_v33, %v2904_v10 }
 0x187   :  { %v3646_v29 = vpop.f32.mrb[25].mxu1 }
 0x188   :  { %v3647_v60 = vadd.f32 %v3646_v29, %v3645_v43  ;;  %v3648_v44 = vpop.f32.mrb[26].mxu1 }
 0x189   :  { %v3649_v49 = vpop.f32.mrb[27].mxu1 }
 0x18a   :  { %v2909_v53 = vadd.f32 %v3647_v60, %v5076_v5  ;;  %v3650_v50 = vadd.f32 %v3649_v49, %v3648_v44 }
 0x18c   :  { %v2912_v35 = vadd.f32 %v3650_v50, %v5078_v34  ;;  %v5106_v24 = vadd.f32 %v3711_v57, %v2909_v53 }
 0x18e   :  { %v3651_v63 = vpop.f32.mrb[28].mxu1  ;;  %v5108_v11 = vadd.f32 %v3714_v15, %v2912_v35 }
 0x18f   :  { %v3652_v25 = vpop.f32.mrb[29].mxu1 }
 0x190   :  { %v3653_v19 = vadd.f32 %v3652_v25, %v3651_v63  ;;  %v3654_v31 = vpop.f32.mrb[30].mxu1 }
 0x191   :  { %v3715_v13 = vpop.f32.mrb[28].mxu0  ;;  %v3655_v54 = vpop.f32.mrb[31].mxu1 }
 0x192   :  { %v3716_v0 = vpop.f32.mrb[29].mxu0  ;;  %v2917_v41 = vadd.f32 %v3653_v19, %v5084_v61  ;;  %v3656_v62 = vadd.f32 %v3655_v54, %v3654_v31 }
 0x193   :  { %v3717_v48 = vadd.f32 %v3716_v0, %v3715_v13  ;;  %v3718_v23 = vpop.f32.mrb[30].mxu0 }
 0x194   :  { %v3719_v5 = vpop.f32.mrb[31].mxu0  ;;  %v2920_v34 = vadd.f32 %v3656_v62, %v5086_v22 }
 0x195   :  { %v3720_v9 = vadd.f32 %v3719_v5, %v3718_v23  ;;  %v5112_v40 = vadd.f32 %v3717_v48, %v2917_v41 }
 0x196   :  { %v3657_v38 = vpop.f32.mrb[32].mxu1 }
 0x197   :  { %v5114_v39 = vadd.f32 %v3720_v9, %v2920_v34  ;;  %v3658_v33 = vpop.f32.mrb[33].mxu1 }
 0x198   :  { %v3659_v37 = vadd.f32 %v3658_v33, %v3657_v38  ;;  %v3660_v6 = vpop.f32.mrb[34].mxu1 }
 0x199   :  { %v3721_v12 = vpop.f32.mrb[32].mxu0  ;;  %v3661_v18 = vpop.f32.mrb[35].mxu1 }
 0x19a   :  { %v3722_v36 = vpop.f32.mrb[33].mxu0  ;;  %v2925_v61 = vadd.f32 %v3659_v37, %v5044_v20  ;;  %v3662_v17 = vadd.f32 %v3661_v18, %v3660_v6 }
 0x19b   :  { %v3723_v7 = vadd.f32 %v3722_v36, %v3721_v12  ;;  %v3724_v47 = vpop.f32.mrb[34].mxu0 }
 0x19c   :  { %v3725_v45 = vpop.f32.mrb[35].mxu0  ;;  %v2928_v22 = vadd.f32 %v3662_v17, %v5048_v21 }
 0x19d   :  { %v3726_v57 = vadd.f32 %v3725_v45, %v3724_v47  ;;  %v5118_v1 = vadd.f32 %v3723_v7, %v2925_v61 }
 0x19e   :  { %v3663_v52 = vpop.f32.mrb[36].mxu1 }
 0x19f   :  { %v5120_v51 = vadd.f32 %v3726_v57, %v2928_v22  ;;  %v3664_v15 = vpop.f32.mrb[37].mxu1 }
 0x1a0   :  { %v3665_v46 = vadd.f32 %v3664_v15, %v3663_v52  ;;  %v3666_v8 = vpop.f32.mrb[38].mxu1 }
 0x1a1   :  { %v3727_v3 = vpop.f32.mrb[36].mxu0  ;;  %v3667_v16 = vpop.f32.mrb[39].mxu1 }
 0x1a2   :  { %v3728_v32 = vpop.f32.mrb[37].mxu0  ;;  %v2933_v20 = vadd.f32 %v3665_v46, %v5072_v42  ;;  %v3668_v10 = vadd.f32 %v3667_v16, %v3666_v8 }
 0x1a3   :  { %v3729_v14 = vadd.f32 %v3728_v32, %v3727_v3  ;;  %v3730_v28 = vpop.f32.mrb[38].mxu0 }
 0x1a4   :  { %v3731_v43 = vpop.f32.mrb[39].mxu0  ;;  %v2936_v21 = vadd.f32 %v3668_v10, %v5074_v27 }
 0x1a5   :  { %v3732_v29 = vadd.f32 %v3731_v43, %v3730_v28  ;;  %v5124_v60 = vadd.f32 %v3729_v14, %v2933_v20 }
 0x1a6   :  { %v3669_v44 = vpop.f32.mrb[40].mxu1 }
 0x1a7   :  { %v5126_v49 = vadd.f32 %v3732_v29, %v2936_v21  ;;  %v3670_v53 = vpop.f32.mrb[41].mxu1 }
 0x1a8   :  { %v3671_v35 = vadd.f32 %v3670_v53, %v3669_v44  ;;  %v3672_v63 = vpop.f32.mrb[42].mxu1 }
 0x1a9   :  { %v3733_v50 = vpop.f32.mrb[40].mxu0  ;;  %v3673_v13 = vpop.f32.mrb[43].mxu1 }
 0x1aa   :  { %v3734_v25 = vpop.f32.mrb[41].mxu0  ;;  %v2941_v42 = vadd.f32 %v3671_v35, %v5080_v26  ;;  %v3674_v0 = vadd.f32 %v3673_v13, %v3672_v63 }
 0x1ab   :  { %v3735_v19 = vadd.f32 %v3734_v25, %v3733_v50  ;;  %v3736_v31 = vpop.f32.mrb[42].mxu0 }
 0x1ac   :  { %v3737_v54 = vpop.f32.mrb[43].mxu0  ;;  %v2944_v27 = vadd.f32 %v3674_v0, %v5082_v55 }
 0x1ad   :  { %v3738_v48 = vadd.f32 %v3737_v54, %v3736_v31  ;;  %v5130_v41 = vadd.f32 %v3735_v19, %v2941_v42 }
 0x1ae   :  { %v3675_v62 = vpop.f32.mrb[44].mxu1 }
 0x1af   :  { %v5132_v23 = vadd.f32 %v3738_v48, %v2944_v27  ;;  %v3676_v5 = vpop.f32.mrb[45].mxu1 }
 0x1b0   :  { %v3677_v9 = vadd.f32 %v3676_v5, %v3675_v62  ;;  %v3678_v34 = vpop.f32.mrb[46].mxu1 }
 0x1b1   :  { %v3679_v38 = vpop.f32.mrb[47].mxu1  ;;  %v3739_v37 = vpop.f32.mrb[44].mxu0 }
 0x1b2   :  { %v2949_v33 = vadd.f32 %v3677_v9, %v5088_v30  ;;  %v3680_v12 = vadd.f32 %v3679_v38, %v3678_v34  ;;  %v3740_v6 = vpop.f32.mrb[45].mxu0 }
 0x1b3   :  { %v3741_v36 = vadd.f32 %v3740_v6, %v3739_v37  ;;  %v3742_v18 = vpop.f32.mrb[46].mxu0 }
 0x1b4   :  { %v2952_v26 = vadd.f32 %v3680_v12, %v5090_v59  ;;  %v3743_v7 = vpop.f32.mrb[47].mxu0 }
 0x1b5   :  { %v3744_v55 = vadd.f32 %v3743_v7, %v3742_v18  ;;  %v5136_v47 = vadd.f32 %v3741_v36, %v2949_v33 }
 0x1b6   :  { %v3761_v61 = vpop.f32.mrb[48].mxu1 }
 0x1b7   :  { %v3762_v17 = vpop.f32.mrb[49].mxu1  ;;  %v5138_v22 = vadd.f32 %v3744_v55, %v2952_v26 }
 0x1b8   :  { %v3763_v45 = vadd.f32 %v3762_v17, %v3761_v61  ;;  %v3764_v57 = vpop.f32.mrb[50].mxu1 }
 0x1b9   :  { %v3765_v52 = vpop.f32.mrb[51].mxu1  ;;  %v3825_v15 = vpop.f32.mrb[48].mxu0 }
 0x1ba   :  { %v3087_v30 = vadd.f32 %v3763_v45, %v5094_v4  ;;  %v3766_v3 = vadd.f32 %v3765_v52, %v3764_v57  ;;  %v3826_v59 = vpop.f32.mrb[49].mxu0 }
 0x1bb   :  { %v3827_v46 = vadd.f32 %v3826_v59, %v3825_v15  ;;  %v3828_v8 = vpop.f32.mrb[50].mxu0 }
 0x1bc   :  { %v3090_v32 = vadd.f32 %v3766_v3, %v5096_v58  ;;  %v3829_v16 = vpop.f32.mrb[51].mxu0 }
 0x1bd   :  { %v3184_v14 = vadd.f32 %v3827_v46, %v3087_v30  ;;  %v3830_v20 = vadd.f32 %v3829_v16, %v3828_v8 }
 0x1be   :  { %v3767_v28 = vpop.f32.mrb[52].mxu1 }
 0x1bf   :  { %v3768_v10 = vpop.f32.mrb[53].mxu1  ;;  %v3187_v43 = vadd.f32 %v3830_v20, %v3090_v32 }
 0x1c0   :  { %v3769_v29 = vadd.f32 %v3768_v10, %v3767_v28  ;;  %v3770_v21 = vpop.f32.mrb[54].mxu1 }
 0x1c1   :  { %v3771_v44 = vpop.f32.mrb[55].mxu1  ;;  %v3509_v53 = vpack.c.bf16 %v3187_v43, %v3184_v14  ;;  %v3831_v50 = vpop.f32.mrb[52].mxu0 }
 0x1c2   :  { %v3095_v35 = vadd.f32 %v3769_v29, %v5100_v2  ;;  %v3772_v4 = vadd.f32 %v3771_v44, %v3770_v21  ;;  %v3832_v63 = vpop.f32.mrb[53].mxu0 }
 0x1c3   :  { %3510 = vst [vmem:[%s5183_s3] sm:$0xff] %v3509_v53   ;;  %v3833_v58 = vadd.f32 %v3832_v63, %v3831_v50  ;;  %v3834_v25 = vpop.f32.mrb[54].mxu0 }
 0x1c4   :  { %v3098_v13 = vadd.f32 %v3772_v4, %v5102_v56  ;;  %v3835_v19 = vpop.f32.mrb[55].mxu0 }
 0x1c5   :  { %v3192_v42 = vadd.f32 %v3833_v58, %v3095_v35  ;;  %v3836_v31 = vadd.f32 %v3835_v19, %v3834_v25 }
 0x1c6   :  { %v3773_v0 = vpop.f32.mrb[56].mxu1 }
 0x1c7   :  { %v3774_v54 = vpop.f32.mrb[57].mxu1  ;;  %v3195_v48 = vadd.f32 %v3836_v31, %v3098_v13 }
 0x1c8   :  { %v3775_v27 = vadd.f32 %v3774_v54, %v3773_v0  ;;  %v3776_v62 = vpop.f32.mrb[58].mxu1 }
 0x1c9   :  { %v3777_v5 = vpop.f32.mrb[59].mxu1  ;;  %v3514_v2 = vpack.c.bf16 %v3195_v48, %v3192_v42  ;;  %v3837_v9 = vpop.f32.mrb[56].mxu0 }
 0x1ca   :  { %v3103_v34 = vadd.f32 %v3775_v27, %v5106_v24  ;;  %v3778_v38 = vadd.f32 %v3777_v5, %v3776_v62  ;;  %v3838_v33 = vpop.f32.mrb[57].mxu0 }
 0x1cb   :  { %3546 = vst [vmem:[%s5183_s3 + $0x8] sm:$0xff] %v3514_v2   ;;  %v3839_v56 = vadd.f32 %v3838_v33, %v3837_v9  ;;  %v3840_v12 = vpop.f32.mrb[58].mxu0 }
 0x1cc   :  { %v3106_v26 = vadd.f32 %v3778_v38, %v5108_v11  ;;  %v3841_v37 = vpop.f32.mrb[59].mxu0 }
 0x1cd   :  { %v3200_v6 = vadd.f32 %v3839_v56, %v3103_v34  ;;  %v3842_v36 = vadd.f32 %v3841_v37, %v3840_v12 }
 0x1ce   :  { %v3779_v18 = vpop.f32.mrb[60].mxu1 }
 0x1cf   :  { %v3780_v7 = vpop.f32.mrb[61].mxu1  ;;  %v3203_v55 = vadd.f32 %v3842_v36, %v3106_v26 }
 0x1d0   :  { %v3781_v61 = vadd.f32 %v3780_v7, %v3779_v18  ;;  %v3782_v17 = vpop.f32.mrb[62].mxu1 }
 0x1d1   :  { %v3783_v45 = vpop.f32.mrb[63].mxu1  ;;  %v3519_v24 = vpack.c.bf16 %v3203_v55, %v3200_v6  ;;  %v3843_v57 = vpop.f32.mrb[60].mxu0 }
 0x1d2   :  { %v3111_v52 = vadd.f32 %v3781_v61, %v5112_v40  ;;  %v3784_v15 = vadd.f32 %v3783_v45, %v3782_v17  ;;  %v3844_v30 = vpop.f32.mrb[61].mxu0 }
 0x1d3   :  { %3547 = vst [vmem:[%s5183_s3 + $0x10] sm:$0xff] %v3519_v24   ;;  %v3845_v11 = vadd.f32 %v3844_v30, %v3843_v57  ;;  %v3846_v3 = vpop.f32.mrb[62].mxu0 }
 0x1d4   :  { %v3114_v59 = vadd.f32 %v3784_v15, %v5114_v39  ;;  %v3847_v46 = vpop.f32.mrb[63].mxu0 }
 0x1d5   :  { %v3208_v8 = vadd.f32 %v3845_v11, %v3111_v52  ;;  %v3848_v32 = vadd.f32 %v3847_v46, %v3846_v3 }
 0x1d6   :  { %v3785_v16 = vpop.f32.mrb[64].mxu1 }
 0x1d7   :  { %v3786_v14 = vpop.f32.mrb[65].mxu1  ;;  %v3211_v20 = vadd.f32 %v3848_v32, %v3114_v59 }
 0x1d8   :  { %v3787_v28 = vadd.f32 %v3786_v14, %v3785_v16  ;;  %v3788_v10 = vpop.f32.mrb[66].mxu1 }
 0x1d9   :  { %v3789_v43 = vpop.f32.mrb[67].mxu1  ;;  %v3524_v40 = vpack.c.bf16 %v3211_v20, %v3208_v8  ;;  %v3849_v29 = vpop.f32.mrb[64].mxu0 }
 0x1da   :  { %v3119_v21 = vadd.f32 %v3787_v28, %v5118_v1  ;;  %v3790_v44 = vadd.f32 %v3789_v43, %v3788_v10  ;;  %v3850_v53 = vpop.f32.mrb[65].mxu0 }
 0x1db   :  { %3548 = vst [vmem:[%s5183_s3 + $0x18] sm:$0xff] %v3524_v40   ;;  %v3851_v39 = vadd.f32 %v3850_v53, %v3849_v29  ;;  %v3852_v50 = vpop.f32.mrb[66].mxu0 }
 0x1dc   :  { %v3122_v35 = vadd.f32 %v3790_v44, %v5120_v51  ;;  %v3853_v4 = vpop.f32.mrb[67].mxu0 }
 0x1dd   :  { %v3216_v63 = vadd.f32 %v3851_v39, %v3119_v21  ;;  %v3854_v58 = vadd.f32 %v3853_v4, %v3852_v50 }
 0x1de   :  { %v3791_v25 = vpop.f32.mrb[68].mxu1 }
 0x1df   :  { %v3792_v13 = vpop.f32.mrb[69].mxu1  ;;  %v3219_v19 = vadd.f32 %v3854_v58, %v3122_v35 }
 0x1e0   :  { %v3793_v42 = vadd.f32 %v3792_v13, %v3791_v25  ;;  %v3794_v31 = vpop.f32.mrb[70].mxu1 }
 0x1e1   :  { %v3795_v0 = vpop.f32.mrb[71].mxu1  ;;  %v3529_v1 = vpack.c.bf16 %v3219_v19, %v3216_v63  ;;  %v3855_v54 = vpop.f32.mrb[68].mxu0 }
 0x1e2   :  { %v3127_v48 = vadd.f32 %v3793_v42, %v5124_v60  ;;  %v3796_v27 = vadd.f32 %v3795_v0, %v3794_v31  ;;  %v3856_v62 = vpop.f32.mrb[69].mxu0 }
 0x1e3   :  { %3549 = vst [vmem:[%s5183_s3 + $0x20] sm:$0xff] %v3529_v1   ;;  %v3857_v51 = vadd.f32 %v3856_v62, %v3855_v54  ;;  %v3858_v5 = vpop.f32.mrb[70].mxu0 }
 0x1e4   :  { %v3130_v2 = vadd.f32 %v3796_v27, %v5126_v49  ;;  %v3859_v9 = vpop.f32.mrb[71].mxu0 }
 0x1e5   :  { %v3224_v34 = vadd.f32 %v3857_v51, %v3127_v48  ;;  %v3860_v38 = vadd.f32 %v3859_v9, %v3858_v5 }
 0x1e6   :  { %v3797_v33 = vpop.f32.mrb[72].mxu1 }
 0x1e7   :  { %v3798_v56 = vpop.f32.mrb[73].mxu1  ;;  %v3227_v12 = vadd.f32 %v3860_v38, %v3130_v2 }
 0x1e8   :  { %v3799_v26 = vadd.f32 %v3798_v56, %v3797_v33  ;;  %v3800_v37 = vpop.f32.mrb[74].mxu1 }
 0x1e9   :  { %v3801_v6 = vpop.f32.mrb[75].mxu1  ;;  %v3534_v60 = vpack.c.bf16 %v3227_v12, %v3224_v34  ;;  %v3861_v36 = vpop.f32.mrb[72].mxu0 }
 0x1ea   :  { %v3135_v18 = vadd.f32 %v3799_v26, %v5130_v41  ;;  %v3802_v7 = vadd.f32 %v3801_v6, %v3800_v37  ;;  %v3862_v55 = vpop.f32.mrb[73].mxu0 }
 0x1eb   :  { %3550 = vst [vmem:[%s5183_s3 + $0x28] sm:$0xff] %v3534_v60   ;;  %v3863_v49 = vadd.f32 %v3862_v55, %v3861_v36  ;;  %v3864_v61 = vpop.f32.mrb[74].mxu0 }
 0x1ec   :  { %v3138_v17 = vadd.f32 %v3802_v7, %v5132_v23  ;;  %v3865_v45 = vpop.f32.mrb[75].mxu0 }
 0x1ed   :  { %v3232_v24 = vadd.f32 %v3863_v49, %v3135_v18  ;;  %v3866_v57 = vadd.f32 %v3865_v45, %v3864_v61 }
 0x1ee   :  { %v3803_v52 = vpop.f32.mrb[76].mxu1 }
 0x1ef   :  { %v3804_v15 = vpop.f32.mrb[77].mxu1  ;;  %v3235_v30 = vadd.f32 %v3866_v57, %v3138_v17 }
 0x1f0   :  { %v3805_v11 = vadd.f32 %v3804_v15, %v3803_v52  ;;  %v3806_v3 = vpop.f32.mrb[78].mxu1 }
 0x1f1   :  { %v3807_v59 = vpop.f32.mrb[79].mxu1  ;;  %v3539_v41 = vpack.c.bf16 %v3235_v30, %v3232_v24  ;;  %v3867_v46 = vpop.f32.mrb[76].mxu0 }
 0x1f2   :  { %v3143_v8 = vadd.f32 %v3805_v11, %v5136_v47  ;;  %v3808_v32 = vadd.f32 %v3807_v59, %v3806_v3  ;;  %v3868_v16 = vpop.f32.mrb[77].mxu0 }
 0x1f3   :  { %3551 = vst [vmem:[%s5183_s3 + $0x30] sm:$0xff] %v3539_v41   ;;  %v3869_v23 = vadd.f32 %v3868_v16, %v3867_v46  ;;  %v3870_v14 = vpop.f32.mrb[78].mxu0 }
 0x1f4   :  { %v3146_v20 = vadd.f32 %v3808_v32, %v5138_v22  ;;  %v3871_v28 = vpop.f32.mrb[79].mxu0 }
 0x1f5   :  { %v3240_v10 = vadd.f32 %v3869_v23, %v3143_v8  ;;  %v3872_v43 = vadd.f32 %v3871_v28, %v3870_v14 }
 0x1f7   :  { %v3243_v40 = vadd.f32 %v3872_v43, %v3146_v20 }
 0x1f9   :  { %v3544_v29 = vpack.c.bf16 %v3243_v40, %v3240_v10 }
 0x1fb   :  { %3552 = vst [vmem:[%s5183_s3 + $0x38] sm:$0xff] %v3544_v29  }

</bundles_post_ra>
